<compile_context>
chip_gen: v6e
topology: v6e:2x2x1
jax: 0.10.0
libtpu: 0.0.40
codegen_flags: <defaults>
</compile_context>

<pallas_src>
import jax
import jax.numpy as jnp
from jax.experimental import pallas as pl
from jax.experimental.pallas import tpu as pltpu

EPS_IN = 1e-3   # nn.InstanceNorm2d(eps=0.001)
EPS_BN = 1e-5   # nn.BatchNorm2d default eps


def global_cluster_kernel(x_ref, colc_ref, rowk_ref, biasf_ref,
                          wf_ref, w1_ref, w2t_ref, w3_ref, o_ref):
    f32 = jnp.float32
    mxu_dt = wf_ref.dtype                      # bf16 (or f32 if the caller opts out)

    x = x_ref[...]                             # (Bt, C, N) f32
    Bt, C, N = x.shape
    K = w2t_ref.shape[0]

    # ---- batch-block <-> lane-slab packing helpers (N, K are 128-multiples -> aligned copies) ----
    def to_slab(a):                            # (Bt, D, M) -> (D, Bt*M), sample b in lanes [b*M,(b+1)*M)
        return jnp.concatenate([a[b] for b in range(Bt)], axis=1)

    def from_slab(s, m):                       # (D, Bt*M) -> (Bt, D, M)
        return jnp.stack([s[:, b * m:(b + 1) * m] for b in range(Bt)], axis=0)

    def in_bn_relu(v, mu, rstd, scale, shift):
        # fused InstanceNorm -> folded BatchNorm -> ReLU:  relu(v * m + a)
        m = rstd * scale
        a = shift - mu * m
        return jnp.maximum(v * m + a, 0.0)

    # ---- shared single-pass instance-norm stats of x (used by pool AND unpool front-ends) ----
    inv_n = 1.0 / N
    mu_x = jnp.sum(x, axis=2, keepdims=True) * inv_n              # (Bt, C, 1)
    ex2_x = jnp.sum(x * x, axis=2, keepdims=True) * inv_n
    rstd_x = jax.lax.rsqrt(ex2_x - mu_x * mu_x + EPS_IN)          # (Bt, C, 1)

    # ============ fused DiffPool + DiffUnpool projection (ONE block-diagonal matmul) ============
    hp = in_bn_relu(x, mu_x, rstd_x, colc_ref[0], colc_ref[1])    # (Bt, C, N)
    hu = in_bn_relu(x, mu_x, rstd_x, colc_ref[8], colc_ref[9])    # (Bt, C, N)
    hpu = jnp.concatenate([hp, hu], axis=1)                       # (Bt, 2C, N)
    logits = jnp.dot(wf_ref[...], to_slab(hpu).astype(mxu_dt),
                     preferred_element_type=f32) + biasf_ref[...] # (2K, Bt*N)
    lp = logits[:K, :]                                            # pool logits   (K, Bt*N)
    lu = logits[K:, :]                                            # unpool logits (K, Bt*N)

    # ---- unpool softmax over clusters (per column): slab-wide, normalization deferred ----
    cmax = jnp.max(lu, axis=0, keepdims=True)                     # (1, Bt*N)
    eu = jnp.exp(lu - cmax)                                       # (K, Bt*N) f32
    inv_colsum = pl.reciprocal(jnp.sum(eu, axis=0, keepdims=True), approx=True)   # (1, Bt*N)
    eu_b16 = eu.astype(mxu_dt)

    # ---- pool softmax over points (per-sample lane segment) + pooled features ----
    # Append a block of ones-rows to x so the softmax denominator (row-sum of exp) rides along in
    # the same MXU contraction; 8 rows keep everything sublane-aligned, only one row is read.
    x_aug = jnp.concatenate([x, jnp.ones((Bt, 8, N), f32)], axis=1).astype(mxu_dt)   # (Bt, C+8, N)
    xd_list = []
    for b in range(Bt):
        lp_b = lp[:, b * N:(b + 1) * N]                                           # (K, N)
        ep_b = jnp.exp(lp_b - jnp.max(lp_b, axis=1, keepdims=True))               # (K, N)
        aug = jax.lax.dot_general(x_aug[b], ep_b.astype(mxu_dt),
                                  (((1,), (1,)), ((), ())),
                                  preferred_element_type=f32)                     # (C+8, K)
        xd_list.append(aug[:C, :] * pl.reciprocal(aug[C:C + 1, :], approx=True))  # (C, K)
    x_down = jnp.stack(xd_list, axis=0)                                           # (Bt, C, K)

    # ===================== OAFilter on (Bt, C, K); points = K =====================
    inv_k = 1.0 / K
    mu_d = jnp.sum(x_down, axis=2, keepdims=True) * inv_k
    ex2_d = jnp.sum(x_down * x_down, axis=2, keepdims=True) * inv_k
    rstd_d = jax.lax.rsqrt(ex2_d - mu_d * mu_d + EPS_IN)
    v1 = in_bn_relu(x_down, mu_d, rstd_d, colc_ref[2], colc_ref[3])               # (Bt, C, K)

    # conv1: ONE wide matmul over the whole batch block (trans(1,2) removed algebraically)
    t1_slab = jnp.dot(w1_ref[...], to_slab(v1).astype(mxu_dt),
                      preferred_element_type=f32) + colc_ref[4]                   # (C, Bt*K)
    t1 = from_slab(t1_slab, K)                                                    # (Bt, C, K)

    # conv2: per-cluster BN -> ReLU -> 1x1 conv over clusters == z @ w2^T; batch stacked on rows.
    z2 = jnp.maximum(t1 * rowk_ref[0] + rowk_ref[1], 0.0)                         # (Bt, C, K)
    h2 = jnp.dot(z2.reshape(Bt * C, K).astype(mxu_dt), w2t_ref[...],
                 preferred_element_type=f32) + rowk_ref[2]                        # (Bt*C, K)
    t2 = t1 + h2.reshape(Bt, C, K)

    # conv3 (already back in (C, K) orientation)
    mu_t = jnp.sum(t2, axis=2, keepdims=True) * inv_k
    ex2_t = jnp.sum(t2 * t2, axis=2, keepdims=True) * inv_k
    rstd_t = jax.lax.rsqrt(ex2_t - mu_t * mu_t + EPS_IN)
    v3 = in_bn_relu(t2, mu_t, rstd_t, colc_ref[5], colc_ref[6])                   # (Bt, C, K)
    h3_slab = jnp.dot(w3_ref[...], to_slab(v3).astype(mxu_dt),
                      preferred_element_type=f32) + colc_ref[7]                   # (C, Bt*K)
    d = from_slab(h3_slab, K) + x_down                            # identity shortcut (out_ch == ch)

    # ============================ DiffUnpool (deferred normalization) ============================
    d_b16 = d.astype(mxu_dt)
    for b in range(Bt):
        seg = slice(b * N, (b + 1) * N)
        out_b = jnp.dot(d_b16[b], eu_b16[:, seg],
                        preferred_element_type=f32) * inv_colsum[:, seg]          # (C, N)
        o_ref[b] = out_b


def _fold_bn(bn):
    gamma, beta, rmean, rvar = bn
    scale = gamma * jax.lax.rsqrt(rvar + EPS_BN)
    return scale, beta - rmean * scale


def global_cluster_pallas(x_nchw, params, block_b=None, mxu_dtype=jnp.bfloat16):
    """x_nchw: (B, C, N, 1) float32. Returns (B, C, N, 1) float32.

    block_b: samples per grid step.  Default: whole batch in one step (best for v5e/v6e at small B).
    On v7x prefer block_b = B // 2 so both TensorCores get an equal grid step.
    """
    B, C, N, W = x_nchw.shape
    assert W == 1
    x = x_nchw[..., 0]                                            # (B, C, N)
    K = params["pool"]["w"].shape[0]

    if block_b is None:
        block_b = B if B <= 8 else next(d for d in (8, 4, 2, 1) if B % d == 0)
    assert B % block_b == 0, "batch must be divisible by block_b"
    nb = B // block_b

    ps, psh = _fold_bn(params["pool"]["bn"])
    s1, sh1 = _fold_bn(params["oa1"]["bn"])
    s2, sh2 = _fold_bn(params["oa2"]["bn"])
    s3, sh3 = _fold_bn(params["oa3"]["bn"])
    us, ush = _fold_bn(params["up"]["bn"])

    # per-channel column params (C, 1); per-cluster row params (1, K)
    col_c = jnp.stack([ps, psh,
                       s1, sh1, params["oa1"]["b"],
                       s3, sh3, params["oa3"]["b"],
                       us, ush], axis=0)[..., None]               # (10, C, 1)
    row_k = jnp.stack([s2, sh2, params["oa2"]["b"]], axis=0)[:, None, :]          # (3, 1, K)
    bias_f = jnp.concatenate([params["pool"]["b"], params["up"]["b"]])[:, None]   # (2K, 1)

    # block-diagonal fused pool/unpool projection weight (zero blocks contribute exactly 0)
    wf = jnp.zeros((2 * K, 2 * C), jnp.float32)
    wf = wf.at[:K, :C].set(params["pool"]["w"]).at[K:, C:].set(params["up"]["w"])
    wf = wf.astype(mxu_dtype)                                     # (2K, 2C)
    w1 = params["oa1"]["w"].astype(mxu_dtype)                     # (C, C)
    w2t = params["oa2"]["w"].T.astype(mxu_dtype)                  # (K, K), pre-transposed host-side
    w3 = params["oa3"]["w"].astype(mxu_dtype)                     # (C, C)

    kern = pl.pallas_call(
        global_cluster_kernel,
        out_shape=jax.ShapeDtypeStruct((B, C, N), jnp.float32),
        grid_spec=pltpu.PrefetchScalarGridSpec(
            num_scalar_prefetch=0,
            grid=(nb,),
            in_specs=[
                pl.BlockSpec((block_b, C, N), lambda g: (g, 0, 0)),   # x, Bt samples per step
                pl.BlockSpec((10, C, 1), lambda g: (0, 0, 0)),        # per-channel scale/shift/bias
                pl.BlockSpec((3, 1, K), lambda g: (0, 0, 0)),         # per-cluster BN + conv2 bias
                pl.BlockSpec((2 * K, 1), lambda g: (0, 0)),           # fused pool/unpool conv bias
                pl.BlockSpec((2 * K, 2 * C), lambda g: (0, 0)),       # block-diag [wp,0;0,wu]
                pl.BlockSpec((C, C), lambda g: (0, 0)),               # w1
                pl.BlockSpec((K, K), lambda g: (0, 0)),               # w2^T
                pl.BlockSpec((C, C), lambda g: (0, 0)),               # w3
            ],
            out_specs=pl.BlockSpec((block_b, C, N), lambda g: (g, 0, 0)),
        ),
        compiler_params=pltpu.CompilerParams(
            dimension_semantics=("parallel",),
        ),
    )
    out = kern(x, col_c, row_k, bias_f, wf, w1, w2t, w3)
    return out[..., None]


# ----------------------------- pure-JAX reference (mirrors PyTorch eval forward) -----------------------------
def global_cluster_reference(x_nchw, p, mm_dtype=jnp.float32):
    x = x_nchw[..., 0]                                            # (B, C, N)
    f32 = jnp.float32
    cast = lambda t: t.astype(mm_dtype)

    def inorm(a):                                                 # (B, D, M), per-channel over M
        mu = jnp.mean(a, axis=2, keepdims=True)
        var = jnp.mean((a - mu) ** 2, axis=2, keepdims=True)
        return (a - mu) * jax.lax.rsqrt(var + EPS_IN)

    def bn(a, b_):                                                # per-channel over dim 1
        g, be, rm, rv = (t[None, :, None] for t in b_)
        return g * (a - rm) * jax.lax.rsqrt(rv + EPS_BN) + be

    def conv_block(a, blk):                                       # IN -> BN -> ReLU -> 1x1 conv
        h = jnp.maximum(bn(inorm(a), blk["bn"]), 0.0)
        return jnp.einsum("oc,bcm->bom", cast(blk["w"]), cast(h),
                          preferred_element_type=f32) + blk["b"][None, :, None]

    # DiffPool
    S = jax.nn.softmax(conv_block(x, p["pool"]), axis=2)          # (B, K, N)
    xd = jnp.einsum("bcn,bkn->bck", cast(x), cast(S), preferred_element_type=f32)

    # OAFilter (points = K)
    t1 = jnp.swapaxes(conv_block(xd, p["oa1"]), 1, 2)             # (B, K, C)
    z = jnp.maximum(bn(t1, p["oa2"]["bn"]), 0.0)
    h2 = jnp.einsum("pq,bqc->bpc", cast(p["oa2"]["w"]), cast(z),
                    preferred_element_type=f32) + p["oa2"]["b"][None, :, None]
    t2 = t1 + h2
    d = conv_block(jnp.swapaxes(t2, 1, 2), p["oa3"]) + xd         # (B, C, K)

    # DiffUnpool
    S2 = jax.nn.softmax(conv_block(x, p["up"]), axis=1)           # (B, K, N)
    out = jnp.einsum("bck,bkn->bcn", cast(d), cast(S2), preferred_element_type=f32)
    return out[..., None]


def make_params(key, C, K):
    keys = iter(jax.random.split(key, 40))

    def bn_params(D):
        return (1.0 + 0.1 * jax.random.normal(next(keys), (D,), jnp.float32),
                0.1 * jax.random.normal(next(keys), (D,), jnp.float32),
                0.1 * jax.random.normal(next(keys), (D,), jnp.float32),
                jax.random.uniform(next(keys), (D,), jnp.float32, minval=0.5, maxval=1.5))

    def conv(out_d, in_d, scale):
        return (scale * jax.random.normal(next(keys), (out_d, in_d), jnp.float32),
                0.05 * jax.random.normal(next(keys), (out_d,), jnp.float32))

    wp, bp = conv(K, C, 0.2)
    w1, b1 = conv(C, C, 0.2)
    w2, b2 = conv(K, K, 0.1)
    w3, b3 = conv(C, C, 0.2)
    wu, bu = conv(K, C, 0.2)
    return {
        "pool": {"bn": bn_params(C), "w": wp, "b": bp},
        "oa1":  {"bn": bn_params(C), "w": w1, "b": b1},
        "oa2":  {"bn": bn_params(K), "w": w2, "b": b2},
        "oa3":  {"bn": bn_params(C), "w": w3, "b": b3},
        "up":   {"bn": bn_params(C), "w": wu, "b": bu},
    }


if __name__ == "__main__":
    # batch=2, in_dim(C)=32, points(N)=256, cluster_num(K)=128  -> lane-dense N and K.
    B, C, N, K = 2, 32, 256, 128
    key = jax.random.PRNGKey(0)
    kx, kp = jax.random.split(key)
    x = jax.random.normal(kx, (B, C, N, 1), jnp.float32)          # NCHW with W=1
    params = make_params(kp, C, K)

    # default block_b: both samples in one grid step (amortized per-step overhead; on v7x
    # pass block_b=B//2 instead so both TensorCores get work).
    out = jax.block_until_ready(global_cluster_pallas(x, params))
    assert out.shape == (B, C, N, 1)

    # loose check vs the full-f32 reference (bf16 MXU operands + deferred softmax normalization
    # are the only approximations)
    ref_f32 = jax.block_until_ready(global_cluster_reference(x, params, mm_dtype=jnp.float32))
    assert jnp.allclose(out, ref_f32, atol=5e-2, rtol=5e-2), \
        float(jnp.max(jnp.abs(out - ref_f32)))

    # tighter check vs a reference that also uses bf16 matmul operands (f32 accumulation)
    ref_bf16 = jax.block_until_ready(global_cluster_reference(x, params, mm_dtype=jnp.bfloat16))
    assert jnp.allclose(out, ref_bf16, atol=2e-2, rtol=2e-2), \
        float(jnp.max(jnp.abs(out - ref_bf16)))

    print("KERNEL_OK")
</pallas_src>

<mosaic_0001>
module attributes {stable_mosaic.version = 11 : i64} {
  func.func @global_cluster_kernel(%arg0: i32, %arg1: memref<2x32x256xf32, #tpu.memory_space<vmem>>, %arg2: memref<10x32x1xf32, #tpu.memory_space<vmem>>, %arg3: memref<3x1x128xf32, #tpu.memory_space<vmem>>, %arg4: memref<256x1xf32, #tpu.memory_space<vmem>>, %arg5: memref<256x64xbf16, #tpu.memory_space<vmem>>, %arg6: memref<32x32xbf16, #tpu.memory_space<vmem>>, %arg7: memref<128x128xbf16, #tpu.memory_space<vmem>>, %arg8: memref<32x32xbf16, #tpu.memory_space<vmem>>, %arg9: memref<2x32x256xf32, #tpu.memory_space<vmem>>) attributes {dimension_semantics = [#tpu.dimension_semantics<parallel>], iteration_bounds = array<i64: 1>, scalar_prefetch = 0 : i64, scratch_operands = 0 : i64, tpu.core_type = #tpu.core_type<tc>, window_params = [{transform_indices = @transform_0, window_bounds = array<i64: 2, 32, 256>}, {pipeline_mode = #tpu.pipeline_mode<synchronous>, transform_indices = @transform_1, window_bounds = array<i64: 10, 32, 1>}, {pipeline_mode = #tpu.pipeline_mode<synchronous>, transform_indices = @transform_2, window_bounds = array<i64: 3, 1, 128>}, {pipeline_mode = #tpu.pipeline_mode<synchronous>, transform_indices = @transform_3, window_bounds = array<i64: 256, 1>}, {pipeline_mode = #tpu.pipeline_mode<synchronous>, transform_indices = @transform_4, window_bounds = array<i64: 256, 64>}, {pipeline_mode = #tpu.pipeline_mode<synchronous>, transform_indices = @transform_5, window_bounds = array<i64: 32, 32>}, {pipeline_mode = #tpu.pipeline_mode<synchronous>, transform_indices = @transform_6, window_bounds = array<i64: 128, 128>}, {pipeline_mode = #tpu.pipeline_mode<synchronous>, transform_indices = @transform_7, window_bounds = array<i64: 32, 32>}, {transform_indices = @transform_8, window_bounds = array<i64: 2, 32, 256>}]} {
    %c0 = arith.constant 0 : index
    %c0_0 = arith.constant 0 : index
    %c0_1 = arith.constant 0 : index
    %0 = vector.load %arg1[%c0, %c0_0, %c0_1] : memref<2x32x256xf32, #tpu.memory_space<vmem>>, vector<2x32x256xf32>
    %cst = arith.constant dense<0.000000e+00> : vector<2x32xf32>
    %1 = vector.multi_reduction <add>, %0, %cst [2] : vector<2x32x256xf32> to vector<2x32xf32>
    %2 = vector.shape_cast %1 : vector<2x32xf32> to vector<2x32x1xf32>
    %cst_2 = arith.constant 3.906250e-03 : f32
    %3 = vector.broadcast %cst_2 : f32 to vector<2x32x1xf32>
    %4 = arith.mulf %2, %3 : vector<2x32x1xf32>
    %5 = arith.mulf %0, %0 : vector<2x32x256xf32>
    %cst_3 = arith.constant dense<0.000000e+00> : vector<2x32xf32>
    %6 = vector.multi_reduction <add>, %5, %cst_3 [2] : vector<2x32x256xf32> to vector<2x32xf32>
    %7 = vector.shape_cast %6 : vector<2x32xf32> to vector<2x32x1xf32>
    %cst_4 = arith.constant 3.906250e-03 : f32
    %8 = vector.broadcast %cst_4 : f32 to vector<2x32x1xf32>
    %9 = arith.mulf %7, %8 : vector<2x32x1xf32>
    %10 = arith.mulf %4, %4 : vector<2x32x1xf32>
    %11 = arith.subf %9, %10 : vector<2x32x1xf32>
    %cst_5 = arith.constant 1.000000e-03 : f32
    %12 = vector.broadcast %cst_5 : f32 to vector<2x32x1xf32>
    %13 = arith.addf %11, %12 : vector<2x32x1xf32>
    %14 = math.rsqrt %13 : vector<2x32x1xf32>
    %c0_6 = arith.constant 0 : index
    %c0_7 = arith.constant 0 : index
    %c0_8 = arith.constant 0 : index
    %15 = vector.load %arg2[%c0_6, %c0_7, %c0_8] : memref<10x32x1xf32, #tpu.memory_space<vmem>>, vector<1x32x1xf32>
    %16 = vector.shape_cast %15 : vector<1x32x1xf32> to vector<32x1xf32>
    %c1 = arith.constant 1 : index
    %c0_9 = arith.constant 0 : index
    %c0_10 = arith.constant 0 : index
    %17 = vector.load %arg2[%c1, %c0_9, %c0_10] : memref<10x32x1xf32, #tpu.memory_space<vmem>>, vector<1x32x1xf32>
    %18 = vector.shape_cast %17 : vector<1x32x1xf32> to vector<32x1xf32>
    %19 = vector.shape_cast %16 : vector<32x1xf32> to vector<1x32x1xf32>
    %20 = vector.broadcast %19 : vector<1x32x1xf32> to vector<2x32x1xf32>
    %21 = arith.mulf %14, %20 : vector<2x32x1xf32>
    %22 = arith.mulf %4, %21 : vector<2x32x1xf32>
    %23 = vector.shape_cast %18 : vector<32x1xf32> to vector<1x32x1xf32>
    %24 = vector.broadcast %23 : vector<1x32x1xf32> to vector<2x32x1xf32>
    %25 = arith.subf %24, %22 : vector<2x32x1xf32>
    %26 = vector.broadcast %21 : vector<2x32x1xf32> to vector<2x32x256xf32>
    %27 = arith.mulf %0, %26 : vector<2x32x256xf32>
    %28 = vector.broadcast %25 : vector<2x32x1xf32> to vector<2x32x256xf32>
    %29 = arith.addf %27, %28 : vector<2x32x256xf32>
    %cst_11 = arith.constant 0.000000e+00 : f32
    %30 = vector.broadcast %cst_11 : f32 to vector<2x32x256xf32>
    %31 = arith.maximumf %29, %30 : vector<2x32x256xf32>
    %c8 = arith.constant 8 : index
    %c0_12 = arith.constant 0 : index
    %c0_13 = arith.constant 0 : index
    %32 = vector.load %arg2[%c8, %c0_12, %c0_13] : memref<10x32x1xf32, #tpu.memory_space<vmem>>, vector<1x32x1xf32>
    %33 = vector.shape_cast %32 : vector<1x32x1xf32> to vector<32x1xf32>
    %c9 = arith.constant 9 : index
    %c0_14 = arith.constant 0 : index
    %c0_15 = arith.constant 0 : index
    %34 = vector.load %arg2[%c9, %c0_14, %c0_15] : memref<10x32x1xf32, #tpu.memory_space<vmem>>, vector<1x32x1xf32>
    %35 = vector.shape_cast %34 : vector<1x32x1xf32> to vector<32x1xf32>
    %36 = vector.shape_cast %33 : vector<32x1xf32> to vector<1x32x1xf32>
    %37 = vector.broadcast %36 : vector<1x32x1xf32> to vector<2x32x1xf32>
    %38 = arith.mulf %14, %37 : vector<2x32x1xf32>
    %39 = arith.mulf %4, %38 : vector<2x32x1xf32>
    %40 = vector.shape_cast %35 : vector<32x1xf32> to vector<1x32x1xf32>
    %41 = vector.broadcast %40 : vector<1x32x1xf32> to vector<2x32x1xf32>
    %42 = arith.subf %41, %39 : vector<2x32x1xf32>
    %43 = vector.broadcast %38 : vector<2x32x1xf32> to vector<2x32x256xf32>
    %44 = arith.mulf %0, %43 : vector<2x32x256xf32>
    %45 = vector.broadcast %42 : vector<2x32x1xf32> to vector<2x32x256xf32>
    %46 = arith.addf %44, %45 : vector<2x32x256xf32>
    %cst_16 = arith.constant 0.000000e+00 : f32
    %47 = vector.broadcast %cst_16 : f32 to vector<2x32x256xf32>
    %48 = arith.maximumf %46, %47 : vector<2x32x256xf32>
    %49 = tpu.concatenate %31, %48 in 1 : vector<2x32x256xf32>, vector<2x32x256xf32> -> vector<2x64x256xf32>
    %c0_17 = arith.constant 0 : index
    %c0_18 = arith.constant 0 : index
    %50 = vector.load %arg5[%c0_17, %c0_18] : memref<256x64xbf16, #tpu.memory_space<vmem>>, vector<256x64xbf16>
    %51 = vector.extract_strided_slice %49 {offsets = [0, 0, 0], sizes = [1, 64, 256], strides = [1, 1, 1]} : vector<2x64x256xf32> to vector<1x64x256xf32>
    %52 = vector.shape_cast %51 : vector<1x64x256xf32> to vector<64x256xf32>
    %53 = vector.extract_strided_slice %49 {offsets = [1, 0, 0], sizes = [1, 64, 256], strides = [1, 1, 1]} : vector<2x64x256xf32> to vector<1x64x256xf32>
    %54 = vector.shape_cast %53 : vector<1x64x256xf32> to vector<64x256xf32>
    %55 = tpu.concatenate %52, %54 in 1 : vector<64x256xf32>, vector<64x256xf32> -> vector<64x512xf32>
    %56 = arith.truncf %55 : vector<64x512xf32> to vector<64x512xbf16>
    %cst_19 = arith.constant dense<0.000000e+00> : vector<256x512xf32>
    %57 = tpu.matmul %50, %56, %cst_19 {dimension_numbers = #tpu.dot_dimension_numbers<[1], [0], [0], [1], [0, 0, 1, 1], [], []>} : vector<256x64xbf16>, vector<64x512xbf16>, vector<256x512xf32> -> vector<256x512xf32>
    %c0_20 = arith.constant 0 : index
    %c0_21 = arith.constant 0 : index
    %58 = vector.load %arg4[%c0_20, %c0_21] : memref<256x1xf32, #tpu.memory_space<vmem>>, vector<256x1xf32>
    %59 = vector.broadcast %58 : vector<256x1xf32> to vector<256x512xf32>
    %60 = arith.addf %57, %59 : vector<256x512xf32>
    %61 = vector.extract_strided_slice %60 {offsets = [0, 0], sizes = [128, 512], strides = [1, 1]} : vector<256x512xf32> to vector<128x512xf32>
    %62 = vector.extract_strided_slice %60 {offsets = [128, 0], sizes = [128, 512], strides = [1, 1]} : vector<256x512xf32> to vector<128x512xf32>
    %cst_22 = arith.constant dense<0xFF800000> : vector<512xf32>
    %63 = vector.multi_reduction <maximumf>, %62, %cst_22 [0] : vector<128x512xf32> to vector<512xf32>
    %64 = vector.shape_cast %63 : vector<512xf32> to vector<1x512xf32>
    %65 = vector.broadcast %64 : vector<1x512xf32> to vector<128x512xf32>
    %66 = arith.subf %62, %65 : vector<128x512xf32>
    %67 = math.exp %66 : vector<128x512xf32>
    %cst_23 = arith.constant dense<0.000000e+00> : vector<512xf32>
    %68 = vector.multi_reduction <add>, %67, %cst_23 [0] : vector<128x512xf32> to vector<512xf32>
    %69 = vector.shape_cast %68 : vector<512xf32> to vector<1x512xf32>
    %70 = tpu.reciprocal %69 {approx = true} : vector<1x512xf32> -> vector<1x512xf32>
    %71 = arith.truncf %67 : vector<128x512xf32> to vector<128x512xbf16>
    %cst_24 = arith.constant 1.000000e+00 : f32
    %72 = vector.broadcast %cst_24 : f32 to vector<2x8x256xf32>
    %73 = tpu.concatenate %0, %72 in 1 : vector<2x32x256xf32>, vector<2x8x256xf32> -> vector<2x40x256xf32>
    %74 = arith.truncf %73 : vector<2x40x256xf32> to vector<2x40x256xbf16>
    %75 = vector.extract_strided_slice %61 {offsets = [0, 0], sizes = [128, 256], strides = [1, 1]} : vector<128x512xf32> to vector<128x256xf32>
    %cst_25 = arith.constant dense<0xFF800000> : vector<128xf32>
    %76 = vector.multi_reduction <maximumf>, %75, %cst_25 [1] : vector<128x256xf32> to vector<128xf32>
    %77 = vector.shape_cast %76 : vector<128xf32> to vector<128x1xf32>
    %78 = vector.broadcast %77 : vector<128x1xf32> to vector<128x256xf32>
    %79 = arith.subf %75, %78 : vector<128x256xf32>
    %80 = math.exp %79 : vector<128x256xf32>
    %81 = vector.extract_strided_slice %74 {offsets = [0, 0, 0], sizes = [1, 40, 256], strides = [1, 1, 1]} : vector<2x40x256xbf16> to vector<1x40x256xbf16>
    %82 = vector.shape_cast %81 : vector<1x40x256xbf16> to vector<40x256xbf16>
    %83 = arith.truncf %80 : vector<128x256xf32> to vector<128x256xbf16>
    %cst_26 = arith.constant dense<0.000000e+00> : vector<40x128xf32>
    %84 = tpu.matmul %82, %83, %cst_26 {dimension_numbers = #tpu.dot_dimension_numbers<[1], [1], [0], [0], [0, 0, 1, 0], [], []>} : vector<40x256xbf16>, vector<128x256xbf16>, vector<40x128xf32> -> vector<40x128xf32>
    %85 = vector.extract_strided_slice %84 {offsets = [0, 0], sizes = [32, 128], strides = [1, 1]} : vector<40x128xf32> to vector<32x128xf32>
    %86 = vector.extract_strided_slice %84 {offsets = [32, 0], sizes = [1, 128], strides = [1, 1]} : vector<40x128xf32> to vector<1x128xf32>
    %87 = tpu.reciprocal %86 {approx = true} : vector<1x128xf32> -> vector<1x128xf32>
    %88 = vector.broadcast %87 : vector<1x128xf32> to vector<32x128xf32>
    %89 = arith.mulf %85, %88 : vector<32x128xf32>
    %90 = vector.extract_strided_slice %61 {offsets = [0, 256], sizes = [128, 256], strides = [1, 1]} : vector<128x512xf32> to vector<128x256xf32>
    %cst_27 = arith.constant dense<0xFF800000> : vector<128xf32>
    %91 = vector.multi_reduction <maximumf>, %90, %cst_27 [1] : vector<128x256xf32> to vector<128xf32>
    %92 = vector.shape_cast %91 : vector<128xf32> to vector<128x1xf32>
    %93 = vector.broadcast %92 : vector<128x1xf32> to vector<128x256xf32>
    %94 = arith.subf %90, %93 : vector<128x256xf32>
    %95 = math.exp %94 : vector<128x256xf32>
    %96 = vector.extract_strided_slice %74 {offsets = [1, 0, 0], sizes = [1, 40, 256], strides = [1, 1, 1]} : vector<2x40x256xbf16> to vector<1x40x256xbf16>
    %97 = vector.shape_cast %96 : vector<1x40x256xbf16> to vector<40x256xbf16>
    %98 = arith.truncf %95 : vector<128x256xf32> to vector<128x256xbf16>
    %cst_28 = arith.constant dense<0.000000e+00> : vector<40x128xf32>
    %99 = tpu.matmul %97, %98, %cst_28 {dimension_numbers = #tpu.dot_dimension_numbers<[1], [1], [0], [0], [0, 0, 1, 0], [], []>} : vector<40x256xbf16>, vector<128x256xbf16>, vector<40x128xf32> -> vector<40x128xf32>
    %100 = vector.extract_strided_slice %99 {offsets = [0, 0], sizes = [32, 128], strides = [1, 1]} : vector<40x128xf32> to vector<32x128xf32>
    %101 = vector.extract_strided_slice %99 {offsets = [32, 0], sizes = [1, 128], strides = [1, 1]} : vector<40x128xf32> to vector<1x128xf32>
    %102 = tpu.reciprocal %101 {approx = true} : vector<1x128xf32> -> vector<1x128xf32>
    %103 = vector.broadcast %102 : vector<1x128xf32> to vector<32x128xf32>
    %104 = arith.mulf %100, %103 : vector<32x128xf32>
    %105 = vector.shape_cast %89 : vector<32x128xf32> to vector<1x32x128xf32>
    %106 = vector.shape_cast %104 : vector<32x128xf32> to vector<1x32x128xf32>
    %107 = tpu.concatenate %105, %106 in 0 : vector<1x32x128xf32>, vector<1x32x128xf32> -> vector<2x32x128xf32>
    %cst_29 = arith.constant dense<0.000000e+00> : vector<2x32xf32>
    %108 = vector.multi_reduction <add>, %107, %cst_29 [2] : vector<2x32x128xf32> to vector<2x32xf32>
    %109 = vector.shape_cast %108 : vector<2x32xf32> to vector<2x32x1xf32>
    %cst_30 = arith.constant 7.812500e-03 : f32
    %110 = vector.broadcast %cst_30 : f32 to vector<2x32x1xf32>
    %111 = arith.mulf %109, %110 : vector<2x32x1xf32>
    %112 = arith.mulf %107, %107 : vector<2x32x128xf32>
    %cst_31 = arith.constant dense<0.000000e+00> : vector<2x32xf32>
    %113 = vector.multi_reduction <add>, %112, %cst_31 [2] : vector<2x32x128xf32> to vector<2x32xf32>
    %114 = vector.shape_cast %113 : vector<2x32xf32> to vector<2x32x1xf32>
    %cst_32 = arith.constant 7.812500e-03 : f32
    %115 = vector.broadcast %cst_32 : f32 to vector<2x32x1xf32>
    %116 = arith.mulf %114, %115 : vector<2x32x1xf32>
    %117 = arith.mulf %111, %111 : vector<2x32x1xf32>
    %118 = arith.subf %116, %117 : vector<2x32x1xf32>
    %cst_33 = arith.constant 1.000000e-03 : f32
    %119 = vector.broadcast %cst_33 : f32 to vector<2x32x1xf32>
    %120 = arith.addf %118, %119 : vector<2x32x1xf32>
    %121 = math.rsqrt %120 : vector<2x32x1xf32>
    %c2 = arith.constant 2 : index
    %c0_34 = arith.constant 0 : index
    %c0_35 = arith.constant 0 : index
    %122 = vector.load %arg2[%c2, %c0_34, %c0_35] : memref<10x32x1xf32, #tpu.memory_space<vmem>>, vector<1x32x1xf32>
    %123 = vector.shape_cast %122 : vector<1x32x1xf32> to vector<32x1xf32>
    %c3 = arith.constant 3 : index
    %c0_36 = arith.constant 0 : index
    %c0_37 = arith.constant 0 : index
    %124 = vector.load %arg2[%c3, %c0_36, %c0_37] : memref<10x32x1xf32, #tpu.memory_space<vmem>>, vector<1x32x1xf32>
    %125 = vector.shape_cast %124 : vector<1x32x1xf32> to vector<32x1xf32>
    %126 = vector.shape_cast %123 : vector<32x1xf32> to vector<1x32x1xf32>
    %127 = vector.broadcast %126 : vector<1x32x1xf32> to vector<2x32x1xf32>
    %128 = arith.mulf %121, %127 : vector<2x32x1xf32>
    %129 = arith.mulf %111, %128 : vector<2x32x1xf32>
    %130 = vector.shape_cast %125 : vector<32x1xf32> to vector<1x32x1xf32>
    %131 = vector.broadcast %130 : vector<1x32x1xf32> to vector<2x32x1xf32>
    %132 = arith.subf %131, %129 : vector<2x32x1xf32>
    %133 = vector.broadcast %128 : vector<2x32x1xf32> to vector<2x32x128xf32>
    %134 = arith.mulf %107, %133 : vector<2x32x128xf32>
    %135 = vector.broadcast %132 : vector<2x32x1xf32> to vector<2x32x128xf32>
    %136 = arith.addf %134, %135 : vector<2x32x128xf32>
    %cst_38 = arith.constant 0.000000e+00 : f32
    %137 = vector.broadcast %cst_38 : f32 to vector<2x32x128xf32>
    %138 = arith.maximumf %136, %137 : vector<2x32x128xf32>
    %c0_39 = arith.constant 0 : index
    %c0_40 = arith.constant 0 : index
    %139 = vector.load %arg6[%c0_39, %c0_40] : memref<32x32xbf16, #tpu.memory_space<vmem>>, vector<32x32xbf16>
    %140 = vector.extract_strided_slice %138 {offsets = [0, 0, 0], sizes = [1, 32, 128], strides = [1, 1, 1]} : vector<2x32x128xf32> to vector<1x32x128xf32>
    %141 = vector.shape_cast %140 : vector<1x32x128xf32> to vector<32x128xf32>
    %142 = vector.extract_strided_slice %138 {offsets = [1, 0, 0], sizes = [1, 32, 128], strides = [1, 1, 1]} : vector<2x32x128xf32> to vector<1x32x128xf32>
    %143 = vector.shape_cast %142 : vector<1x32x128xf32> to vector<32x128xf32>
    %144 = tpu.concatenate %141, %143 in 1 : vector<32x128xf32>, vector<32x128xf32> -> vector<32x256xf32>
    %145 = arith.truncf %144 : vector<32x256xf32> to vector<32x256xbf16>
    %cst_41 = arith.constant dense<0.000000e+00> : vector<32x256xf32>
    %146 = tpu.matmul %139, %145, %cst_41 {dimension_numbers = #tpu.dot_dimension_numbers<[1], [0], [0], [1], [0, 0, 1, 1], [], []>} : vector<32x32xbf16>, vector<32x256xbf16>, vector<32x256xf32> -> vector<32x256xf32>
    %c4 = arith.constant 4 : index
    %c0_42 = arith.constant 0 : index
    %c0_43 = arith.constant 0 : index
    %147 = vector.load %arg2[%c4, %c0_42, %c0_43] : memref<10x32x1xf32, #tpu.memory_space<vmem>>, vector<1x32x1xf32>
    %148 = vector.shape_cast %147 : vector<1x32x1xf32> to vector<32x1xf32>
    %149 = vector.broadcast %148 : vector<32x1xf32> to vector<32x256xf32>
    %150 = arith.addf %146, %149 : vector<32x256xf32>
    %151 = vector.extract_strided_slice %150 {offsets = [0, 0], sizes = [32, 128], strides = [1, 1]} : vector<32x256xf32> to vector<32x128xf32>
    %152 = vector.extract_strided_slice %150 {offsets = [0, 128], sizes = [32, 128], strides = [1, 1]} : vector<32x256xf32> to vector<32x128xf32>
    %153 = vector.shape_cast %151 : vector<32x128xf32> to vector<1x32x128xf32>
    %154 = vector.shape_cast %152 : vector<32x128xf32> to vector<1x32x128xf32>
    %155 = tpu.concatenate %153, %154 in 0 : vector<1x32x128xf32>, vector<1x32x128xf32> -> vector<2x32x128xf32>
    %c0_44 = arith.constant 0 : index
    %c0_45 = arith.constant 0 : index
    %c0_46 = arith.constant 0 : index
    %156 = vector.load %arg3[%c0_44, %c0_45, %c0_46] : memref<3x1x128xf32, #tpu.memory_space<vmem>>, vector<1x1x128xf32>
    %157 = vector.shape_cast %156 : vector<1x1x128xf32> to vector<1x128xf32>
    %158 = vector.shape_cast %157 : vector<1x128xf32> to vector<1x1x128xf32>
    %159 = vector.broadcast %158 : vector<1x1x128xf32> to vector<2x32x128xf32>
    %160 = arith.mulf %155, %159 : vector<2x32x128xf32>
    %c1_47 = arith.constant 1 : index
    %c0_48 = arith.constant 0 : index
    %c0_49 = arith.constant 0 : index
    %161 = vector.load %arg3[%c1_47, %c0_48, %c0_49] : memref<3x1x128xf32, #tpu.memory_space<vmem>>, vector<1x1x128xf32>
    %162 = vector.shape_cast %161 : vector<1x1x128xf32> to vector<1x128xf32>
    %163 = vector.shape_cast %162 : vector<1x128xf32> to vector<1x1x128xf32>
    %164 = vector.broadcast %163 : vector<1x1x128xf32> to vector<2x32x128xf32>
    %165 = arith.addf %160, %164 : vector<2x32x128xf32>
    %cst_50 = arith.constant 0.000000e+00 : f32
    %166 = vector.broadcast %cst_50 : f32 to vector<2x32x128xf32>
    %167 = arith.maximumf %165, %166 : vector<2x32x128xf32>
    %168 = vector.shape_cast %167 : vector<2x32x128xf32> to vector<64x128xf32>
    %169 = arith.truncf %168 : vector<64x128xf32> to vector<64x128xbf16>
    %c0_51 = arith.constant 0 : index
    %c0_52 = arith.constant 0 : index
    %170 = vector.load %arg7[%c0_51, %c0_52] : memref<128x128xbf16, #tpu.memory_space<vmem>>, vector<128x128xbf16>
    %cst_53 = arith.constant dense<0.000000e+00> : vector<64x128xf32>
    %171 = tpu.matmul %169, %170, %cst_53 {dimension_numbers = #tpu.dot_dimension_numbers<[1], [0], [0], [1], [0, 0, 1, 1], [], []>} : vector<64x128xbf16>, vector<128x128xbf16>, vector<64x128xf32> -> vector<64x128xf32>
    %c2_54 = arith.constant 2 : index
    %c0_55 = arith.constant 0 : index
    %c0_56 = arith.constant 0 : index
    %172 = vector.load %arg3[%c2_54, %c0_55, %c0_56] : memref<3x1x128xf32, #tpu.memory_space<vmem>>, vector<1x1x128xf32>
    %173 = vector.shape_cast %172 : vector<1x1x128xf32> to vector<1x128xf32>
    %174 = vector.broadcast %173 : vector<1x128xf32> to vector<64x128xf32>
    %175 = arith.addf %171, %174 : vector<64x128xf32>
    %176 = vector.shape_cast %175 : vector<64x128xf32> to vector<2x32x128xf32>
    %177 = arith.addf %155, %176 : vector<2x32x128xf32>
    %cst_57 = arith.constant dense<0.000000e+00> : vector<2x32xf32>
    %178 = vector.multi_reduction <add>, %177, %cst_57 [2] : vector<2x32x128xf32> to vector<2x32xf32>
    %179 = vector.shape_cast %178 : vector<2x32xf32> to vector<2x32x1xf32>
    %cst_58 = arith.constant 7.812500e-03 : f32
    %180 = vector.broadcast %cst_58 : f32 to vector<2x32x1xf32>
    %181 = arith.mulf %179, %180 : vector<2x32x1xf32>
    %182 = arith.mulf %177, %177 : vector<2x32x128xf32>
    %cst_59 = arith.constant dense<0.000000e+00> : vector<2x32xf32>
    %183 = vector.multi_reduction <add>, %182, %cst_59 [2] : vector<2x32x128xf32> to vector<2x32xf32>
    %184 = vector.shape_cast %183 : vector<2x32xf32> to vector<2x32x1xf32>
    %cst_60 = arith.constant 7.812500e-03 : f32
    %185 = vector.broadcast %cst_60 : f32 to vector<2x32x1xf32>
    %186 = arith.mulf %184, %185 : vector<2x32x1xf32>
    %187 = arith.mulf %181, %181 : vector<2x32x1xf32>
    %188 = arith.subf %186, %187 : vector<2x32x1xf32>
    %cst_61 = arith.constant 1.000000e-03 : f32
    %189 = vector.broadcast %cst_61 : f32 to vector<2x32x1xf32>
    %190 = arith.addf %188, %189 : vector<2x32x1xf32>
    %191 = math.rsqrt %190 : vector<2x32x1xf32>
    %c5 = arith.constant 5 : index
    %c0_62 = arith.constant 0 : index
    %c0_63 = arith.constant 0 : index
    %192 = vector.load %arg2[%c5, %c0_62, %c0_63] : memref<10x32x1xf32, #tpu.memory_space<vmem>>, vector<1x32x1xf32>
    %193 = vector.shape_cast %192 : vector<1x32x1xf32> to vector<32x1xf32>
    %c6 = arith.constant 6 : index
    %c0_64 = arith.constant 0 : index
    %c0_65 = arith.constant 0 : index
    %194 = vector.load %arg2[%c6, %c0_64, %c0_65] : memref<10x32x1xf32, #tpu.memory_space<vmem>>, vector<1x32x1xf32>
    %195 = vector.shape_cast %194 : vector<1x32x1xf32> to vector<32x1xf32>
    %196 = vector.shape_cast %193 : vector<32x1xf32> to vector<1x32x1xf32>
    %197 = vector.broadcast %196 : vector<1x32x1xf32> to vector<2x32x1xf32>
    %198 = arith.mulf %191, %197 : vector<2x32x1xf32>
    %199 = arith.mulf %181, %198 : vector<2x32x1xf32>
    %200 = vector.shape_cast %195 : vector<32x1xf32> to vector<1x32x1xf32>
    %201 = vector.broadcast %200 : vector<1x32x1xf32> to vector<2x32x1xf32>
    %202 = arith.subf %201, %199 : vector<2x32x1xf32>
    %203 = vector.broadcast %198 : vector<2x32x1xf32> to vector<2x32x128xf32>
    %204 = arith.mulf %177, %203 : vector<2x32x128xf32>
    %205 = vector.broadcast %202 : vector<2x32x1xf32> to vector<2x32x128xf32>
    %206 = arith.addf %204, %205 : vector<2x32x128xf32>
    %cst_66 = arith.constant 0.000000e+00 : f32
    %207 = vector.broadcast %cst_66 : f32 to vector<2x32x128xf32>
    %208 = arith.maximumf %206, %207 : vector<2x32x128xf32>
    %c0_67 = arith.constant 0 : index
    %c0_68 = arith.constant 0 : index
    %209 = vector.load %arg8[%c0_67, %c0_68] : memref<32x32xbf16, #tpu.memory_space<vmem>>, vector<32x32xbf16>
    %210 = vector.extract_strided_slice %208 {offsets = [0, 0, 0], sizes = [1, 32, 128], strides = [1, 1, 1]} : vector<2x32x128xf32> to vector<1x32x128xf32>
    %211 = vector.shape_cast %210 : vector<1x32x128xf32> to vector<32x128xf32>
    %212 = vector.extract_strided_slice %208 {offsets = [1, 0, 0], sizes = [1, 32, 128], strides = [1, 1, 1]} : vector<2x32x128xf32> to vector<1x32x128xf32>
    %213 = vector.shape_cast %212 : vector<1x32x128xf32> to vector<32x128xf32>
    %214 = tpu.concatenate %211, %213 in 1 : vector<32x128xf32>, vector<32x128xf32> -> vector<32x256xf32>
    %215 = arith.truncf %214 : vector<32x256xf32> to vector<32x256xbf16>
    %cst_69 = arith.constant dense<0.000000e+00> : vector<32x256xf32>
    %216 = tpu.matmul %209, %215, %cst_69 {dimension_numbers = #tpu.dot_dimension_numbers<[1], [0], [0], [1], [0, 0, 1, 1], [], []>} : vector<32x32xbf16>, vector<32x256xbf16>, vector<32x256xf32> -> vector<32x256xf32>
    %c7 = arith.constant 7 : index
    %c0_70 = arith.constant 0 : index
    %c0_71 = arith.constant 0 : index
    %217 = vector.load %arg2[%c7, %c0_70, %c0_71] : memref<10x32x1xf32, #tpu.memory_space<vmem>>, vector<1x32x1xf32>
    %218 = vector.shape_cast %217 : vector<1x32x1xf32> to vector<32x1xf32>
    %219 = vector.broadcast %218 : vector<32x1xf32> to vector<32x256xf32>
    %220 = arith.addf %216, %219 : vector<32x256xf32>
    %221 = vector.extract_strided_slice %220 {offsets = [0, 0], sizes = [32, 128], strides = [1, 1]} : vector<32x256xf32> to vector<32x128xf32>
    %222 = vector.extract_strided_slice %220 {offsets = [0, 128], sizes = [32, 128], strides = [1, 1]} : vector<32x256xf32> to vector<32x128xf32>
    %223 = vector.shape_cast %221 : vector<32x128xf32> to vector<1x32x128xf32>
    %224 = vector.shape_cast %222 : vector<32x128xf32> to vector<1x32x128xf32>
    %225 = tpu.concatenate %223, %224 in 0 : vector<1x32x128xf32>, vector<1x32x128xf32> -> vector<2x32x128xf32>
    %226 = arith.addf %225, %107 : vector<2x32x128xf32>
    %227 = arith.truncf %226 : vector<2x32x128xf32> to vector<2x32x128xbf16>
    %228 = vector.extract_strided_slice %227 {offsets = [0, 0, 0], sizes = [1, 32, 128], strides = [1, 1, 1]} : vector<2x32x128xbf16> to vector<1x32x128xbf16>
    %229 = vector.shape_cast %228 : vector<1x32x128xbf16> to vector<32x128xbf16>
    %230 = vector.extract_strided_slice %71 {offsets = [0, 0], sizes = [128, 256], strides = [1, 1]} : vector<128x512xbf16> to vector<128x256xbf16>
    %cst_72 = arith.constant dense<0.000000e+00> : vector<32x256xf32>
    %231 = tpu.matmul %229, %230, %cst_72 {dimension_numbers = #tpu.dot_dimension_numbers<[1], [0], [0], [1], [0, 0, 1, 1], [], []>} : vector<32x128xbf16>, vector<128x256xbf16>, vector<32x256xf32> -> vector<32x256xf32>
    %232 = vector.extract_strided_slice %70 {offsets = [0, 0], sizes = [1, 256], strides = [1, 1]} : vector<1x512xf32> to vector<1x256xf32>
    %233 = vector.broadcast %232 : vector<1x256xf32> to vector<32x256xf32>
    %234 = arith.mulf %231, %233 : vector<32x256xf32>
    %c0_73 = arith.constant 0 : index
    %c0_74 = arith.constant 0 : index
    %c0_75 = arith.constant 0 : index
    %235 = vector.load %arg9[%c0_73, %c0_74, %c0_75] : memref<2x32x256xf32, #tpu.memory_space<vmem>>, vector<1x32x256xf32>
    %236 = vector.shape_cast %235 : vector<1x32x256xf32> to vector<32x256xf32>
    %237 = vector.shape_cast %234 : vector<32x256xf32> to vector<1x32x256xf32>
    tpu.vector_store %arg9[%c0_73, %c0_74, %c0_75], %237 {strides = array<i32>} : memref<2x32x256xf32, #tpu.memory_space<vmem>>, vector<1x32x256xf32>,
    %238 = vector.extract_strided_slice %227 {offsets = [1, 0, 0], sizes = [1, 32, 128], strides = [1, 1, 1]} : vector<2x32x128xbf16> to vector<1x32x128xbf16>
    %239 = vector.shape_cast %238 : vector<1x32x128xbf16> to vector<32x128xbf16>
    %240 = vector.extract_strided_slice %71 {offsets = [0, 256], sizes = [128, 256], strides = [1, 1]} : vector<128x512xbf16> to vector<128x256xbf16>
    %cst_76 = arith.constant dense<0.000000e+00> : vector<32x256xf32>
    %241 = tpu.matmul %239, %240, %cst_76 {dimension_numbers = #tpu.dot_dimension_numbers<[1], [0], [0], [1], [0, 0, 1, 1], [], []>} : vector<32x128xbf16>, vector<128x256xbf16>, vector<32x256xf32> -> vector<32x256xf32>
    %242 = vector.extract_strided_slice %70 {offsets = [0, 256], sizes = [1, 256], strides = [1, 1]} : vector<1x512xf32> to vector<1x256xf32>
    %243 = vector.broadcast %242 : vector<1x256xf32> to vector<32x256xf32>
    %244 = arith.mulf %241, %243 : vector<32x256xf32>
    %c1_77 = arith.constant 1 : index
    %c0_78 = arith.constant 0 : index
    %c0_79 = arith.constant 0 : index
    %245 = vector.load %arg9[%c1_77, %c0_78, %c0_79] : memref<2x32x256xf32, #tpu.memory_space<vmem>>, vector<1x32x256xf32>
    %246 = vector.shape_cast %245 : vector<1x32x256xf32> to vector<32x256xf32>
    %247 = vector.shape_cast %244 : vector<32x256xf32> to vector<1x32x256xf32>
    tpu.vector_store %arg9[%c1_77, %c0_78, %c0_79], %247 {strides = array<i32>} : memref<2x32x256xf32, #tpu.memory_space<vmem>>, vector<1x32x256xf32>,
    return
  }
  func.func @transform_0(%arg0: i32) -> (i32, i32, i32) {
    %c0_i32 = arith.constant 0 : i32
    %c0_i32_0 = arith.constant 0 : i32
    %c0_i32_1 = arith.constant 0 : i32
    return %arg0, %c0_i32, %c0_i32_0 : i32, i32, i32
  }
  func.func @transform_1(%arg0: i32) -> (i32, i32, i32) {
    %c0_i32 = arith.constant 0 : i32
    %c0_i32_0 = arith.constant 0 : i32
    %c0_i32_1 = arith.constant 0 : i32
    %c0_i32_2 = arith.constant 0 : i32
    return %c0_i32, %c0_i32_0, %c0_i32_1 : i32, i32, i32
  }
  func.func @transform_2(%arg0: i32) -> (i32, i32, i32) {
    %c0_i32 = arith.constant 0 : i32
    %c0_i32_0 = arith.constant 0 : i32
    %c0_i32_1 = arith.constant 0 : i32
    %c0_i32_2 = arith.constant 0 : i32
    return %c0_i32, %c0_i32_0, %c0_i32_1 : i32, i32, i32
  }
  func.func @transform_3(%arg0: i32) -> (i32, i32) {
    %c0_i32 = arith.constant 0 : i32
    %c0_i32_0 = arith.constant 0 : i32
    %c0_i32_1 = arith.constant 0 : i32
    return %c0_i32, %c0_i32_0 : i32, i32
  }
  func.func @transform_4(%arg0: i32) -> (i32, i32) {
    %c0_i32 = arith.constant 0 : i32
    %c0_i32_0 = arith.constant 0 : i32
    %c0_i32_1 = arith.constant 0 : i32
    return %c0_i32, %c0_i32_0 : i32, i32
  }
  func.func @transform_5(%arg0: i32) -> (i32, i32) {
    %c0_i32 = arith.constant 0 : i32
    %c0_i32_0 = arith.constant 0 : i32
    %c0_i32_1 = arith.constant 0 : i32
    return %c0_i32, %c0_i32_0 : i32, i32
  }
  func.func @transform_6(%arg0: i32) -> (i32, i32) {
    %c0_i32 = arith.constant 0 : i32
    %c0_i32_0 = arith.constant 0 : i32
    %c0_i32_1 = arith.constant 0 : i32
    return %c0_i32, %c0_i32_0 : i32, i32
  }
  func.func @transform_7(%arg0: i32) -> (i32, i32) {
    %c0_i32 = arith.constant 0 : i32
    %c0_i32_0 = arith.constant 0 : i32
    %c0_i32_1 = arith.constant 0 : i32
    return %c0_i32, %c0_i32_0 : i32, i32
  }
  func.func @transform_8(%arg0: i32) -> (i32, i32, i32) {
    %c0_i32 = arith.constant 0 : i32
    %c0_i32_0 = arith.constant 0 : i32
    %c0_i32_1 = arith.constant 0 : i32
    return %arg0, %c0_i32, %c0_i32_0 : i32, i32, i32
  }
}

</mosaic_0001>

<bundles_post_ra>
// kernel: tpu_custom_call.1
= control target key start
LH: loop header
LB: loop body
LE: loop exit
PB: predicated region body
PF: predicated region fallthrough
CT: control target
= control target key end

     0   :  { %s5637_s0 = inlined_call_operand.vmem [shape: f32[2,32,256], index: 0, kind: input, shape index: {}]   ;;  %s5638_s1 = inlined_call_operand.vmem [shape: f32[10,32,1], index: 1, kind: input, shape index: {}]   ;;  %s5639_s2 = inlined_call_operand.vmem [shape: f32[3,1,128], index: 2, kind: input, shape index: {}]   ;;  %s5640_s3 = inlined_call_operand.vmem [shape: f32[256,1], index: 3, kind: input, shape index: {}]   ;;  %s5641_s4 = inlined_call_operand.vmem [shape: bf16[256,64], index: 4, kind: input, shape index: {}]   ;;  %s5642_s5 = inlined_call_operand.vmem [shape: bf16[32,32], index: 5, kind: input, shape index: {}]   ;;  %s5643_s6 = inlined_call_operand.vmem [shape: bf16[128,128], index: 6, kind: input, shape index: {}]   ;;  %s5644_s7 = inlined_call_operand.vmem [shape: bf16[32,32], index: 7, kind: input, shape index: {}]   ;;  %s5645_s8 = inlined_call_operand.hbm [shape: f32[2,32,256], index: 8, kind: output, shape index: {}]  }
   0x1   :  { %v3687_v0 = vld [vmem:[%s5637_s0 + $0x60] sm:$0xff]  ;;  %v3692_v1 = vld [vmem:[%s5637_s0 + $0x68] sm:$0xff]  ;;  %v3709_v5 = vld [vmem:[%s5637_s0 + $0x70] sm:$0xff] }
   0x2   :  { %v3697_v2 = vld [vmem:[%s5637_s0 + $0x20] sm:$0xff]  ;;  %v65_v3 = vadd.f32 %v3692_v1, %v3687_v0  ;;  %v3704_v4 = vld [vmem:[%s5637_s0 + $0x28] sm:$0xff]  ;;  %v3714_v6 = vld [vmem:[%s5637_s0 + $0x78] sm:$0xff]  ;;  %v91_v11 = vmul.f32 %v3687_v0, %v3687_v0  ;;  %v92_v12 = vmul.f32 %v3692_v1, %v3692_v1  ;;  %v93_v14 = vmul.f32 %v3709_v5, %v3709_v5 }
   0x3   :  { %v53_v7 = vadd.f32 %v3704_v4, %v3697_v2  ;;  %v3721_v8 = vld [vmem:[%s5637_s0 + $0x30] sm:$0xff]  ;;  %v3726_v9 = vld [vmem:[%s5637_s0 + $0x38] sm:$0xff]  ;;  %v68_v10 = vadd.f32 %v3714_v6, %v3709_v5  ;;  %v94_v15 = vmul.f32 %v3714_v6, %v3714_v6  ;;  %v83_v17 = vmul.f32 %v3697_v2, %v3697_v2  ;;  %v3751_v22 = vld [vmem:[%s5637_s0 + $0x40] sm:$0xff] }
   0x4   :  { %66 = vadd.xlane.f32.xlu0 %v65_v3  ;;  %v56_v13 = vadd.f32 %v3726_v9, %v3721_v8  ;;  %v113_v16 = vadd.f32 %v92_v12, %v91_v11  ;;  %v84_v18 = vmul.f32 %v3704_v4, %v3704_v4  ;;  %v85_v20 = vmul.f32 %v3721_v8, %v3721_v8  ;;  %v3756_v23 = vld [vmem:[%s5637_s0 + $0x48] sm:$0xff]  ;;  %v3761_v25 = vld [vmem:[%s5637_s0 + $0x50] sm:$0xff]  ;;  %v3766_v26 = vld [vmem:[%s5637_s0 + $0x58] sm:$0xff] }
   0x5   :  { %54 = vadd.xlane.f32.xlu1 %v53_v7  ;;  %v116_v19 = vadd.f32 %v94_v15, %v93_v14  ;;  %v86_v21 = vmul.f32 %v3726_v9, %v3726_v9  ;;  %v3771_v28 = vld [vmem:[%s5637_s0] sm:$0xff]  ;;  %v3776_v29 = vld [vmem:[%s5637_s0 + $0x8] sm:$0xff]  ;;  %v59_v30 = vadd.f32 %v3756_v23, %v3751_v22  ;;  %v3783_v31 = vld [vmem:[%s5637_s0 + $0x10] sm:$0xff]  ;;  %v62_v33 = vadd.f32 %v3766_v26, %v3761_v25 }
   0x6   :  { %v101_v24 = vadd.f32 %v84_v18, %v83_v17  ;;  %v3788_v32 = vld [vmem:[%s5637_s0 + $0x18] sm:$0xff]  ;;  %v47_v34 = vadd.f32 %v3776_v29, %v3771_v28  ;;  %v87_v35 = vmul.f32 %v3751_v22, %v3751_v22  ;;  %v88_v36 = vmul.f32 %v3756_v23, %v3756_v23 }
   0x7   :  { %v104_v27 = vadd.f32 %v86_v21, %v85_v20  ;;  %v50_v37 = vadd.f32 %v3788_v32, %v3783_v31  ;;  %v89_v38 = vmul.f32 %v3761_v25, %v3761_v25  ;;  %v90_v39 = vmul.f32 %v3766_v26, %v3766_v26 }
   0x8   :  { %69 = vadd.xlane.f32.xlu0 %v68_v10  ;;  %v107_v40 = vadd.f32 %v88_v36, %v87_v35  ;;  %v79_v41 = vmul.f32 %v3771_v28, %v3771_v28  ;;  %v80_v42 = vmul.f32 %v3776_v29, %v3776_v29  ;;  %v81_v44 = vmul.f32 %v3783_v31, %v3783_v31 }
   0x9   :  { %57 = vadd.xlane.f32.xlu1 %v56_v13  ;;  %v110_v43 = vadd.f32 %v90_v39, %v89_v38  ;;  %v82_v45 = vmul.f32 %v3788_v32, %v3788_v32 }
   0xc   :  { %114 = vadd.xlane.f32.xlu0 %v113_v16 }
   0xd   :  { %117 = vadd.xlane.f32.xlu1 %v116_v19 }
  0x10   :  { %102 = vadd.xlane.f32.xlu0 %v101_v24 }
  0x11   :  { %105 = vadd.xlane.f32.xlu1 %v104_v27 }
  0x14   :  { %60 = vadd.xlane.f32.xlu0 %v59_v30 }
  0x15   :  { %63 = vadd.xlane.f32.xlu1 %v62_v33 }
  0x18   :  { %48 = vadd.xlane.f32.xlu0 %v47_v34 }
  0x19   :  { %51 = vadd.xlane.f32.xlu1 %v50_v37 }
  0x1a   :  { %13 = vsyncpa [#allocation3], 0  ;;  %v95_v46 = vadd.f32 %v80_v42, %v79_v41  ;;  %v98_v47 = vadd.f32 %v82_v45, %v81_v44  ;;  %v5646_v48 = vmov 0   ;;  %v3111_v45 = vld [vmem:[%s5638_s1 + $0x118] sm:$0xff]  ;;  %vm802_vm0 = vcmask 523264  }
  0x1b   :  { %3251 = vset.pattern.permute.xlu1 %v5646_v48  ;;  %3250 = vset.pattern.permute.xlu0 %v5646_v48  ;;  %vm2361_vm1 = vcmask 261120  }
  0x1c   :  { %108 = vadd.xlane.f32.xlu0 %v107_v40  ;;  %1076 = vmatprep.mubr.bf16.mxu1 %v5646_v48 }
  0x1d   :  { %111 = vadd.xlane.f32.xlu1 %v110_v43  ;;  %883 = vmatprep.mubr.bf16.mxu0 %v5646_v48  ;;  %v3110_v43 = vld [vmem:[%s5638_s1 + $0x110] sm:$0xff] }
  0x20   :  { %96 = vadd.xlane.f32.xlu0 %v95_v46 }
  0x21   :  { %99 = vadd.xlane.f32.xlu1 %v98_v47 }
  0x8d   :  { %v67_v49 = vpop.xlane.xlu0 %66 }
  0x8e   :  { %v55_v50 = vpop.xlane.xlu1 %54  ;;  %v3816_v52 = vmul.f32 0.00390625, %v67_v49 }
  0x8f   :  { %v3820_v56 = vmul.f32 0.00390625, %v55_v50 }
  0x90   :  { %v133_v57 = vmul.f32 %v3816_v52, %v3816_v52 }
  0x91   :  { %v70_v51 = vpop.xlane.xlu0 %69  ;;  %v129_v12 = vmul.f32 %v3820_v56, %v3820_v56 }
  0x92   :  { %v58_v53 = vpop.xlane.xlu1 %57  ;;  %v3818_v54 = vmul.f32 0.00390625, %v70_v51 }
  0x93   :  { %v3824_v60 = vmul.f32 0.00390625, %v58_v53 }
  0x94   :  { %v134_v61 = vmul.f32 %v3818_v54, %v3818_v54 }
  0x95   :  { %v115_v55 = vpop.xlane.xlu0 %114  ;;  %v130_v15 = vmul.f32 %v3824_v60, %v3824_v60 }
  0x96   :  { %v125_v58 = vmul.f32 0.00390625, %v115_v55  ;;  %v118_v59 = vpop.xlane.xlu1 %117 }
  0x97   :  { %v126_v62 = vmul.f32 0.00390625, %v118_v59 }
  0x98   :  { %v141_v63 = vsub.f32 %v125_v58, %v133_v57 }
  0x99   :  { %v142_v3 = vsub.f32 %v126_v62, %v134_v61  ;;  %v103_v7 = vpop.xlane.xlu0 %102 }
  0x9a   :  { %v149_v10 = vadd.f32 0.001, %v141_v63  ;;  %v121_v11 = vmul.f32 0.00390625, %v103_v7  ;;  %v106_v13 = vpop.xlane.xlu1 %105 }
  0x9b   :  { %v150_v14 = vadd.f32 0.001, %v142_v3  ;;  %v122_v16 = vmul.f32 0.00390625, %v106_v13 }
  0x9c   :  { %3280 = vrsqrt.f32 %v149_v10  ;;  %v137_v17 = vsub.f32 %v121_v11, %v129_v12 }
  0x9d   :  { %3282 = vrsqrt.f32 %v150_v14  ;;  %v138_v18 = vsub.f32 %v122_v16, %v130_v15  ;;  %v61_v19 = vpop.xlane.xlu0 %60  ;;  %v3108_v16 = vld [vmem:[%s5638_s1 + $0x100] sm:$0xff] }
  0x9e   :  { %v145_v20 = vadd.f32 0.001, %v137_v17  ;;  %v64_v21 = vpop.xlane.xlu1 %63  ;;  %v3834_v33 = vmul.f32 0.00390625, %v61_v19  ;;  %v3109_v17 = vld [vmem:[%s5638_s1 + $0x108] sm:$0xff] }
  0x9f   :  { %v146_v24 = vadd.f32 0.001, %v138_v18  ;;  %v3832_v27 = vmul.f32 0.00390625, %v64_v21 }
  0xa0   :  { %3284 = vrsqrt.f32 %v145_v20  ;;  %v131_v40 = vmul.f32 %v3834_v33, %v3834_v33 }
  0xa1   :  { %v49_v30 = vpop.xlane.xlu0 %48  ;;  %3286 = vrsqrt.f32 %v146_v24  ;;  %v132_v36 = vmul.f32 %v3832_v27, %v3832_v27 }
  0xa2   :  { %v52_v34 = vpop.xlane.xlu1 %51  ;;  %v3840_v38 = vmul.f32 0.00390625, %v49_v30 }
  0xa3   :  { %v3836_v35 = vmul.f32 0.00390625, %v52_v34 }
  0xa4   :  { %v127_v57 = vmul.f32 %v3840_v38, %v3840_v38 }
  0xa5   :  { %v109_v37 = vpop.xlane.xlu0 %108  ;;  %v128_v49 = vmul.f32 %v3836_v35, %v3836_v35 }
  0xa6   :  { %v112_v39 = vpop.xlane.xlu1 %111  ;;  %v123_v41 = vmul.f32 0.00390625, %v109_v37  ;;  %v161_v37 = vld [vmem:[%s5638_s1 + $0x10] sm:$0xff] }
  0xa7   :  { %v124_v42 = vmul.f32 0.00390625, %v112_v39  ;;  %v162_v39 = vld [vmem:[%s5638_s1 + $0x18] sm:$0xff] }
  0xa8   :  { %v139_v44 = vsub.f32 %v123_v41, %v131_v40 }
  0xa9   :  { %v3281_v46 = vpop.eup %3280  ;;  %v140_v47 = vsub.f32 %v124_v42, %v132_v36  ;;  %v97_v50 = vpop.xlane.xlu0 %96 }
  0xaa   :  { %v3283_v51 = vpop.eup %3282  ;;  %v147_v53 = vadd.f32 0.001, %v139_v44  ;;  %v100_v55 = vpop.xlane.xlu1 %99  ;;  %v119_v58 = vmul.f32 0.00390625, %v97_v50  ;;  %v336_v59 = vmul.f32 %v3281_v46, %v3110_v43  ;;  %v174_v40 = vmul.f32 %v3281_v46, %v161_v37  ;;  %v159_v44 = vld [vmem:[%s5638_s1] sm:$0xff] }
  0xab   :  { %v148_v61 = vadd.f32 0.001, %v140_v47  ;;  %v120_v62 = vmul.f32 0.00390625, %v100_v55  ;;  %v337_v63 = vmul.f32 %v3283_v51, %v3111_v45  ;;  %v175_v41 = vmul.f32 %v3283_v51, %v162_v39  ;;  %v3114_v55 = vld [vmem:[%s5638_s1 + $0x130] sm:$0xff] }
  0xac   :  { %3288 = vrsqrt.f32 %v147_v53  ;;  %v135_v3 = vsub.f32 %v119_v58, %v127_v57  ;;  %386 = vperm.xlu0 %3250, %v336_v59   ;;  %v344_v50 = vmul.f32 %v336_v59, %v3816_v52  ;;  %v3113_v57 = vld [vmem:[%s5638_s1 + $0x128] sm:$0xff]  ;;  %v3115_v59 = vld [vmem:[%s5638_s1 + $0x138] sm:$0xff] }
  0xad   :  { %v3285_v7 = vpop.eup %3284  ;;  %3290 = vrsqrt.f32 %v148_v61  ;;  %v136_v10 = vsub.f32 %v120_v62, %v128_v49  ;;  %391 = vperm.xlu1 %3251, %v337_v63   ;;  %v345_v61 = vmul.f32 %v337_v63, %v3818_v54  ;;  %v3107_v63 = vld [vmem:[%s5638_s1 + $0x38] sm:$0xff] }
  0xae   :  { %v143_v11 = vadd.f32 0.001, %v135_v3  ;;  %v332_v12 = vmul.f32 %v3285_v7, %v3110_v43  ;;  %v3287_v14 = vpop.eup %3286  ;;  %v170_v42 = vmul.f32 %v3285_v7, %v161_v37  ;;  %v352_v58 = vsub.f32 %v3114_v55, %v344_v50  ;;  %v539_v50 = vld [vmem:[%s5640_s3 + $0x48] sm:$0xff] }
  0xaf   :  { %v144_v13 = vadd.f32 0.001, %v136_v10  ;;  %v333_v15 = vmul.f32 %v3287_v14, %v3111_v45  ;;  %v171_v43 = vmul.f32 %v3287_v14, %v162_v39  ;;  %v160_v45 = vld [vmem:[%s5638_s1 + $0x8] sm:$0xff]  ;;  %v353_v7 = vsub.f32 %v3115_v59, %v345_v61  ;;  %v536_v61 = vld [vmem:[%s5640_s3 + $0x30] sm:$0xff] }
  0xb0   :  { %3292 = vrsqrt.f32 %v143_v11  ;;  %v340_v10 = vmul.f32 %v332_v12, %v3820_v56 }
  0xb1   :  { %3294 = vrsqrt.f32 %v144_v13  ;;  %366 = vperm.xlu1 %3251, %v332_v12   ;;  %v183_v13 = vmul.f32 %v175_v41, %v3818_v54 }
  0xb2   :  { %v348_v14 = vsub.f32 %v3114_v55, %v340_v10  ;;  %v533_v55 = vld [vmem:[%s5640_s3 + $0x18] sm:$0xff] }
  0xb5   :  { %371 = vperm.xlu1 %3251, %v333_v15  }
  0xb9   :  { %v3289_v18 = vpop.eup %3288 }
  0xba   :  { %v3291_v19 = vpop.eup %3290  ;;  %v334_v20 = vmul.f32 %v3289_v18, %v3108_v16  ;;  %v172_v47 = vmul.f32 %v3289_v18, %v159_v44  ;;  %v179_v18 = vmul.f32 %v171_v43, %v3824_v60 }
  0xbb   :  { %v335_v21 = vmul.f32 %v3291_v19, %v3109_v17  ;;  %v173_v49 = vmul.f32 %v3291_v19, %v160_v45 }
  0xbc   :  { %376 = vperm.xlu1 %3251, %v334_v20   ;;  %v342_v12 = vmul.f32 %v334_v20, %v3834_v33 }
  0xbd   :  { %v3293_v24 = vpop.eup %3292  ;;  %381 = vperm.xlu0 %3250, %v335_v21   ;;  %v343_v53 = vmul.f32 %v335_v21, %v3832_v27  ;;  %v187_v21 = vsub.f32 %v3107_v63, %v179_v18  ;;  %v181_v54 = vmul.f32 %v173_v49, %v3832_v27  ;;  %v182_v27 = vmul.f32 %v174_v40, %v3816_v52  ;;  %v543_v52 = vld [vmem:[%s5640_s3 + $0x68] sm:$0xff] }
  0xbe   :  { %v3295_v30 = vpop.eup %3294  ;;  %v330_v34 = vmul.f32 %v3293_v24, %v3108_v16  ;;  %v168_v46 = vmul.f32 %v3293_v24, %v159_v44  ;;  %v341_v16 = vmul.f32 %v333_v15, %v3824_v60  ;;  %v3112_v24 = vld [vmem:[%s5638_s1 + $0x120] sm:$0xff]  ;;  %v3105_v15 = vld [vmem:[%s5638_s1 + $0x28] sm:$0xff]  ;;  %v178_v44 = vmul.f32 %v170_v42, %v3820_v56 }
  0xbf   :  { %v331_v36 = vmul.f32 %v3295_v30, %v3109_v17  ;;  %v169_v51 = vmul.f32 %v3295_v30, %v160_v45  ;;  %v351_v62 = vsub.f32 %v3113_v57, %v343_v53  ;;  %v191_v17 = vsub.f32 %v3107_v63, %v183_v13  ;;  %v3104_v45 = vld [vmem:[%s5638_s1 + $0x20] sm:$0xff]  ;;  %v540_v53 = vld [vmem:[%s5640_s3 + $0x50] sm:$0xff] }
  0xc0   :  { %356 = vperm.xlu1 %3251, %v330_v34   ;;  %v349_v19 = vsub.f32 %v3115_v59, %v341_v16  ;;  %v350_v30 = vsub.f32 %v3112_v24, %v342_v12  ;;  %v338_v60 = vmul.f32 %v330_v34, %v3840_v38  ;;  %v530_v59 = vld [vmem:[%s5640_s3] sm:$0xff] }
  0xc1   :  { %361 = vperm.xlu0 %3250, %v331_v36   ;;  %v339_v3 = vmul.f32 %v331_v36, %v3836_v35  ;;  %v189_v36 = vsub.f32 %v3105_v15, %v181_v54  ;;  %v177_v37 = vmul.f32 %v169_v51, %v3836_v35 }
  0xc2   :  { %v346_v20 = vsub.f32 %v3112_v24, %v338_v60 }
  0xc3   :  { %v347_v11 = vsub.f32 %v3113_v57, %v339_v3  ;;  %v185_v39 = vsub.f32 %v3105_v15, %v177_v37  ;;  %v538_v57 = vld [vmem:[%s5640_s3 + $0x40] sm:$0xff]  ;;  %v532_v3 = vld [vmem:[%s5640_s3 + $0x10] sm:$0xff] }
  0xc4   :  { %224 = vperm.xlu1 %3251, %v174_v40   ;;  %v180_v40 = vmul.f32 %v172_v47, %v3834_v33 }
  0xc5   :  { %229 = vperm.xlu0 %3250, %v175_v41   ;;  %v3106_v41 = vld [vmem:[%s5638_s1 + $0x30] sm:$0xff] }
  0xc6   :  { %v190_v34 = vsub.f32 %v3106_v41, %v182_v27  ;;  %v186_v35 = vsub.f32 %v3106_v41, %v178_v44  ;;  %v188_v56 = vsub.f32 %v3104_v45, %v180_v40 }
  0xc8   :  { %204 = vperm.xlu1 %3251, %v170_v42   ;;  %v176_v42 = vmul.f32 %v168_v46, %v3840_v38  ;;  %v542_v38 = vld [vmem:[%s5640_s3 + $0x60] sm:$0xff] }
  0xc9   :  { %209 = vperm.xlu0 %3250, %v171_v43   ;;  %v545_v43 = vld [vmem:[%s5640_s3 + $0x78] sm:$0xff] }
  0xca   :  { %v184_v33 = vsub.f32 %v3104_v45, %v176_v42 }
  0xcc   :  { %214 = vperm.xlu1 %3251, %v172_v47   ;;  %v544_v47 = vld [vmem:[%s5640_s3 + $0x70] sm:$0xff] }
  0xcd   :  { %219 = vperm.xlu0 %3250, %v173_v49   ;;  %v541_v49 = vld [vmem:[%s5640_s3 + $0x58] sm:$0xff] }
  0xd0   :  { %194 = vperm.xlu1 %3251, %v168_v46   ;;  %v535_v46 = vld [vmem:[%s5640_s3 + $0x28] sm:$0xff] }
  0xd1   :  { %199 = vperm.xlu0 %3250, %v169_v51   ;;  %v537_v51 = vld [vmem:[%s5640_s3 + $0x38] sm:$0xff] }
  0xd4   :  { %442 = vperm.xlu1 %3251, %v352_v58   ;;  %v531_v58 = vld [vmem:[%s5640_s3 + $0x8] sm:$0xff] }
  0xd5   :  { %437 = vperm.xlu0 %3250, %v351_v62   ;;  %v534_v62 = vld [vmem:[%s5640_s3 + $0x20] sm:$0xff] }
  0xd8   :  { %447 = vperm.xlu1 %3251, %v353_v7  }
  0xd9   :  { %417 = vperm.xlu0 %3250, %v347_v11  }
  0xdc   :  { %422 = vperm.xlu1 %3251, %v348_v14  }
  0xdd   :  { %285 = vperm.xlu0 %3250, %v191_v17  }
  0xe0   :  { %427 = vperm.xlu1 %3251, %v349_v19  }
  0xe1   :  { %265 = vperm.xlu0 %3250, %v187_v21  }
  0xe4   :  { %432 = vperm.xlu1 %3251, %v350_v30  }
  0xe5   :  { %275 = vperm.xlu0 %3250, %v189_v36  }
  0xe8   :  { %412 = vperm.xlu1 %3251, %v346_v20  }
  0xe9   :  { %255 = vperm.xlu0 %3250, %v185_v39  }
  0xec   :  { %280 = vperm.xlu1 %3251, %v190_v34  }
  0xed   :  { %639 = vperm.xlu0 %3250, %v545_v43  }
  0xf0   :  { %260 = vperm.xlu1 %3251, %v186_v35  }
  0xf1   :  { %629 = vperm.xlu0 %3250, %v543_v52  }
  0xf4   :  { %270 = vperm.xlu1 %3251, %v188_v56  }
  0xf5   :  { %619 = vperm.xlu0 %3250, %v541_v49  }
  0xf8   :  { %250 = vperm.xlu1 %3251, %v184_v33  }
  0xf9   :  { %609 = vperm.xlu0 %3250, %v539_v50  }
  0xfc   :  { %634 = vperm.xlu1 %3251, %v544_v47  }
  0xfd   :  { %599 = vperm.xlu0 %3250, %v537_v51  }
 0x100   :  { %624 = vperm.xlu1 %3251, %v542_v38  }
 0x101   :  { %589 = vperm.xlu0 %3250, %v535_v46  }
 0x104   :  { %614 = vperm.xlu1 %3251, %v540_v53  }
 0x105   :  { %579 = vperm.xlu0 %3250, %v533_v55  }
 0x108   :  { %604 = vperm.xlu1 %3251, %v538_v57  }
 0x109   :  { %569 = vperm.xlu0 %3250, %v531_v58  }
 0x10c   :  { %594 = vperm.xlu1 %3251, %v536_v61  }
 0x110   :  { %584 = vperm.xlu1 %3251, %v534_v62  }
 0x114   :  { %574 = vperm.xlu1 %3251, %v532_v3  }
 0x118   :  { %564 = vperm.xlu1 %3251, %v530_v59  }
 0x127   :  { %v387_v13 = vpop.permute.xlu0 %386 }
 0x128   :  { %v392_v7 = vpop.permute.xlu1 %391  ;;  %v406_v36 = vmul.f32 %v387_v13, %v3687_v0  ;;  %v407_v37 = vmul.f32 %v387_v13, %v3692_v1 }
 0x129   :  { %v408_v27 = vmul.f32 %v392_v7, %v3709_v5  ;;  %v409_v39 = vmul.f32 %v392_v7, %v3714_v6 }
 0x12c   :  { %v367_v10 = vpop.permute.xlu1 %366 }
 0x12d   :  { %v398_v50 = vmul.f32 %v367_v10, %v3697_v2  ;;  %v399_v33 = vmul.f32 %v367_v10, %v3704_v4 }
 0x130   :  { %v372_v11 = vpop.permute.xlu1 %371 }
 0x131   :  { %v400_v38 = vmul.f32 %v372_v11, %v3721_v8  ;;  %v401_v46 = vmul.f32 %v372_v11, %v3726_v9 }
 0x137   :  { %v377_v63 = vpop.permute.xlu1 %376 }
 0x138   :  { %v382_v14 = vpop.permute.xlu0 %381  ;;  %v402_v59 = vmul.f32 %v377_v63, %v3751_v22  ;;  %v403_v7 = vmul.f32 %v377_v63, %v3756_v23 }
 0x139   :  { %v404_v57 = vmul.f32 %v382_v14, %v3761_v25  ;;  %v405_v58 = vmul.f32 %v382_v14, %v3766_v26 }
 0x13b   :  { %v357_v16 = vpop.permute.xlu1 %356 }
 0x13c   :  { %v362_v17 = vpop.permute.xlu0 %361  ;;  %v395_v63 = vmul.f32 %v357_v16, %v3776_v29 }
 0x13f   :  { %v3960_v18 = vpop.permute.xlu1 %224 }
 0x140   :  { %v3962_v19 = vpop.permute.xlu0 %229 }
 0x143   :  { %v3964_v12 = vpop.permute.xlu1 %204 }
 0x144   :  { %v3966_v21 = vpop.permute.xlu0 %209 }
 0x147   :  { %v3968_v54 = vpop.permute.xlu1 %214 }
 0x148   :  { %v3970_v24 = vpop.permute.xlu0 %219 }
 0x14b   :  { %v3972_v15 = vpop.permute.xlu1 %194 }
 0x14c   :  { %v3974_v30 = vpop.permute.xlu0 %199 }
 0x14f   :  { %v443_v60 = vpop.permute.xlu1 %442 }
 0x150   :  { %v438_v20 = vpop.permute.xlu0 %437  ;;  %v462_v41 = vadd.f32 %v443_v60, %v406_v36  ;;  %v463_v43 = vadd.f32 %v443_v60, %v407_v37 }
 0x151   :  { %v460_v10 = vadd.f32 %v438_v20, %v404_v57  ;;  %v461_v13 = vadd.f32 %v438_v20, %v405_v58 }
 0x152   :  { %v479_v35 = vmax.f32 %v463_v43, 0.0  ;;  %v478_v45 = vmax.f32 %v462_v41, 0.0  ;;  %v397_v41 = vmul.f32 %v362_v17, %v3788_v32 }
 0x153   :  { %v448_v34 = vpop.permute.xlu1 %447  ;;  %v477_v20 = vmax.f32 %v461_v13, 0.0 }
 0x154   :  { %v464_v44 = vadd.f32 %v448_v34, %v408_v27  ;;  %v465_v52 = vadd.f32 %v448_v34, %v409_v39  ;;  %v418_v56 = vpop.permute.xlu0 %417  ;;  %v396_v39 = vmul.f32 %v362_v17, %v3783_v31  ;;  %v247_v17 = vmul.f32 %v3962_v19, %v3714_v6 }
 0x155   :  { %v238_v6 = vmul.f32 %v3966_v21, %v3721_v8 }
 0x156   :  { %v481_v40 = vmax.f32 %v465_v52, 0.0  ;;  %v480_v49 = vmax.f32 %v464_v44, 0.0 }
 0x157   :  { %v423_v42 = vpop.permute.xlu1 %422 }
 0x158   :  { %v529_v47 = vpack.c.bf16 %v481_v40, %v479_v35  ;;  %v528_v51 = vpack.c.bf16 %v480_v49, %v478_v45  ;;  %v454_v53 = vadd.f32 %v423_v42, %v398_v50  ;;  %v455_v55 = vadd.f32 %v423_v42, %v399_v33  ;;  %v286_v60 = vpop.permute.xlu0 %285 }
 0x159   :  { %v394_v35 = vmul.f32 %v357_v16, %v3771_v28  ;;  %v476_v40 = vmax.f32 %v460_v10, 0.0  ;;  %v452_v45 = vadd.f32 %v418_v56, %v396_v39  ;;  %v453_v49 = vadd.f32 %v418_v56, %v397_v41 }
 0x15a   :  { %1052 = vmatprep.subr.bf16.mxu1 %v529_v47  ;;  %v471_v36 = vmax.f32 %v455_v55, 0.0  ;;  %v470_v37 = vmax.f32 %v454_v53, 0.0  ;;  %v246_v33 = vmul.f32 %v3962_v19, %v3709_v5  ;;  %v244_v55 = vmul.f32 %v3960_v18, %v3687_v0 }
 0x15b   :  { %v428_v61 = vpop.permute.xlu1 %427  ;;  %1053 = vmatpush1.bf16.msra.mxu1 %v528_v51  ;;  %v245_v56 = vmul.f32 %v3960_v18, %v3692_v1  ;;  %v303_v58 = vadd.f32 %v286_v60, %v247_v17  ;;  %v469_v5 = vmax.f32 %v453_v49, 0.0  ;;  %v239_v19 = vmul.f32 %v3966_v21, %v3726_v9 }
 0x15c   :  { %v456_v62 = vadd.f32 %v428_v61, %v400_v38  ;;  %v457_v3 = vadd.f32 %v428_v61, %v401_v46  ;;  %v266_v47 = vpop.permute.xlu0 %265  ;;  %v302_v57 = vadd.f32 %v286_v60, %v246_v33  ;;  %v468_v61 = vmax.f32 %v452_v45, 0.0 }
 0x15d   :  { %v236_v1 = vmul.f32 %v3964_v12, %v3697_v2  ;;  %v237_v18 = vmul.f32 %v3964_v12, %v3704_v4  ;;  %v295_v8 = vadd.f32 %v266_v47, %v239_v19  ;;  %v242_v9 = vmul.f32 %v3970_v24, %v3761_v25  ;;  %v3258_v19 = vld [vmem:[%s5641_s4 + $0x30] sm:$0xff]  }
 0x15e   :  { %v473_v11 = vmax.f32 %v457_v3, 0.0  ;;  %v472_v27 = vmax.f32 %v456_v62, 0.0  ;;  %v318_v60 = vmax.f32 %v302_v57, 0.0  ;;  %v243_v21 = vmul.f32 %v3970_v24, %v3766_v26 }
 0x15f   :  { %v433_v14 = vpop.permute.xlu1 %432  ;;  %v240_v12 = vmul.f32 %v3968_v54, %v3751_v22  ;;  %v234_v26 = vmul.f32 %v3974_v30, %v3783_v31  ;;  %v235_v24 = vmul.f32 %v3974_v30, %v3788_v32 }
 0x160   :  { %v458_v43 = vadd.f32 %v433_v14, %v402_v59  ;;  %v459_v34 = vadd.f32 %v433_v14, %v403_v7  ;;  %v527_v44 = vpack.c.bf16 %v473_v11, %v471_v36  ;;  %v526_v52 = vpack.c.bf16 %v472_v27, %v470_v37  ;;  %v276_v11 = vpop.permute.xlu0 %275 }
 0x161   :  { %v319_v36 = vmax.f32 %v303_v58, 0.0  ;;  %v294_v37 = vadd.f32 %v266_v47, %v238_v6  ;;  %v3257_v6 = vld [vmem:[%s5641_s4 + $0x28] sm:$0xff]  }
 0x162   :  { %v474_v42 = vmax.f32 %v458_v43, 0.0  ;;  %v475_v50 = vmax.f32 %v459_v34, 0.0  ;;  %859 = vmatprep.subr.bf16.mxu0 %v527_v44  ;;  %v241_v34 = vmul.f32 %v3968_v54, %v3756_v23  ;;  %v298_v44 = vadd.f32 %v276_v11, %v242_v9 }
 0x163   :  { %860 = vmatpush1.bf16.msra.mxu0 %v526_v52  ;;  %v413_v51 = vpop.permute.xlu1 %412  ;;  %v299_v52 = vadd.f32 %v276_v11, %v243_v21  ;;  %v232_v54 = vmul.f32 %v3972_v15, %v3771_v28 }
 0x164   :  { %v450_v38 = vadd.f32 %v413_v51, %v394_v35  ;;  %v451_v46 = vadd.f32 %v413_v51, %v395_v63  ;;  %v525_v53 = vpack.c.bf16 %v477_v20, %v475_v50  ;;  %v524_v16 = vpack.c.bf16 %v476_v40, %v474_v42  ;;  %v256_v20 = vpop.permute.xlu0 %255 }
 0x165   :  { %v310_v35 = vmax.f32 %v294_v37, 0.0  ;;  %v311_v63 = vmax.f32 %v295_v8, 0.0  ;;  %v233_v50 = vmul.f32 %v3972_v15, %v3776_v29  ;;  %v314_v33 = vmax.f32 %v298_v44, 0.0  ;;  %v3252_v29 = vld [vmem:[%s5641_s4] sm:$0xff]  }
 0x166   :  { %v466_v62 = vmax.f32 %v450_v38, 0.0  ;;  %v467_v3 = vmax.f32 %v451_v46, 0.0  ;;  %1054 = vmatprep.subr.bf16.mxu1 %v525_v53  ;;  %v315_v17 = vmax.f32 %v299_v52, 0.0  ;;  %v290_v47 = vadd.f32 %v256_v20, %v234_v26 }
 0x167   :  { %v281_v59 = vpop.permute.xlu1 %280  ;;  %1055 = vmatpush1.bf16.msra.mxu1 %v524_v16  ;;  %v291_v31 = vadd.f32 %v256_v20, %v235_v24 }
 0x168   :  { %v300_v7 = vadd.f32 %v281_v59, %v244_v55  ;;  %v301_v0 = vadd.f32 %v281_v59, %v245_v56  ;;  %v523_v10 = vpack.c.bf16 %v469_v5, %v467_v3  ;;  %v522_v13 = vpack.c.bf16 %v468_v61, %v466_v62  ;;  %v3253_v61 = vld [vmem:[%s5641_s4 + $0x8] sm:$0xff]   ;;  %v3254_v5 = vld [vmem:[%s5641_s4 + $0x10] sm:$0xff]   ;;  %v3255_v62 = vld [vmem:[%s5641_s4 + $0x18] sm:$0xff]  }
 0x169   :  { %v306_v55 = vmax.f32 %v290_v47, 0.0  ;;  %v307_v56 = vmax.f32 %v291_v31, 0.0  ;;  %v3256_v3 = vld [vmem:[%s5641_s4 + $0x20] sm:$0xff]   ;;  %v3259_v59 = vld [vmem:[%s5641_s4 + $0x38] sm:$0xff]  }
 0x16a   :  { %v316_v27 = vmax.f32 %v300_v7, 0.0  ;;  %v317_v39 = vmax.f32 %v301_v0, 0.0  ;;  %861 = vmatprep.subr.bf16.mxu0 %v523_v10 }
 0x16b   :  { %v261_v41 = vpop.permute.xlu1 %260  ;;  %862 = vmatpush1.bf16.msra.mxu0 %v522_v13 }
 0x16c   :  { %v292_v2 = vadd.f32 %v261_v41, %v236_v1  ;;  %v293_v14 = vadd.f32 %v261_v41, %v237_v18  ;;  %v521_v43 = vpack.c.bf16 %v319_v36, %v317_v39  ;;  %v520_v4 = vpack.c.bf16 %v318_v60, %v316_v27 }
 0x16e   :  { %v308_v25 = vmax.f32 %v292_v2, 0.0  ;;  %v309_v40 = vmax.f32 %v293_v14, 0.0  ;;  %1056 = vmatprep.subr.bf16.mxu1 %v521_v43 }
 0x16f   :  { %v271_v45 = vpop.permute.xlu1 %270  ;;  %1057 = vmatpush1.bf16.msra.mxu1 %v520_v4 }
 0x170   :  { %v296_v22 = vadd.f32 %v271_v45, %v240_v12  ;;  %v297_v49 = vadd.f32 %v271_v45, %v241_v34  ;;  %v519_v42 = vpack.c.bf16 %v311_v63, %v309_v40  ;;  %v518_v23 = vpack.c.bf16 %v310_v35, %v308_v25 }
 0x172   :  { %v312_v51 = vmax.f32 %v296_v22, 0.0  ;;  %v313_v38 = vmax.f32 %v297_v49, 0.0  ;;  %863 = vmatprep.subr.bf16.mxu0 %v519_v42 }
 0x173   :  { %v251_v32 = vpop.permute.xlu1 %250  ;;  %864 = vmatpush1.bf16.msra.mxu0 %v518_v23 }
 0x174   :  { %v288_v30 = vadd.f32 %v251_v32, %v232_v54  ;;  %v289_v46 = vadd.f32 %v251_v32, %v233_v50  ;;  %v517_v53 = vpack.c.bf16 %v315_v17, %v313_v38  ;;  %v516_v16 = vpack.c.bf16 %v314_v33, %v312_v51 }
 0x176   :  { %v304_v57 = vmax.f32 %v288_v30, 0.0  ;;  %v305_v28 = vmax.f32 %v289_v46, 0.0  ;;  %1058 = vmatprep.subr.bf16.mxu1 %v517_v53 }
 0x177   :  { %1059 = vmatpush1.bf16.msra.mxu1 %v516_v16 }
 0x178   :  { %v515_v15 = vpack.c.bf16 %v307_v56, %v305_v28  ;;  %v514_v58 = vpack.c.bf16 %v306_v55, %v304_v57 }
 0x17a   :  { %865 = vmatprep.subr.bf16.mxu0 %v515_v15  ;;  %3148 = vmatmul.mubr.msk.bf16.vlgmr.msra.gmra.mxu1 %vm802_vm0, %v3252_v29 }
 0x17b   :  { %866 = vmatpush1.bf16.msra.mxu0 %v514_v58  ;;  %1086 = vmatprep.mubr.bf16.mxu1 %v5646_v48 }
 0x17e   :  { %3132 = vmatmul.mubr.msk.bf16.vlgmr.msra.gmra.mxu0 %vm802_vm0, %v3252_v29 }
 0x17f   :  { %893 = vmatprep.mubr.bf16.mxu0 %v5646_v48 }
 0x182   :  { %3149 = vmatmul.mubr.msk.bf16.gmra.mxu1 %vm802_vm0, %v3253_v61 }
 0x183   :  { %1096 = vmatprep.mubr.bf16.mxu1 %v5646_v48 }
 0x186   :  { %3133 = vmatmul.mubr.msk.bf16.gmra.mxu0 %vm802_vm0, %v3253_v61  ;;  %v635_v61 = vpop.permute.xlu1 %634 }
 0x187   :  { %903 = vmatprep.mubr.bf16.mxu0 %v5646_v48 }
 0x18a   :  { %3150 = vmatmul.mubr.msk.bf16.gmra.mxu1 %vm802_vm0, %v3254_v5 }
 0x18b   :  { %1106 = vmatprep.mubr.bf16.mxu1 %v5646_v48 }
 0x18e   :  { %3134 = vmatmul.mubr.msk.bf16.gmra.mxu0 %vm802_vm0, %v3254_v5 }
 0x18f   :  { %913 = vmatprep.mubr.bf16.mxu0 %v5646_v48 }
 0x192   :  { %3151 = vmatmul.mubr.msk.bf16.gmra.mxu1 %vm802_vm0, %v3255_v62 }
 0x193   :  { %1116 = vmatprep.mubr.bf16.mxu1 %v5646_v48 }
 0x196   :  { %3135 = vmatmul.mubr.msk.bf16.gmra.mxu0 %vm802_vm0, %v3255_v62 }
 0x197   :  { %923 = vmatprep.mubr.bf16.mxu0 %v5646_v48 }
 0x19a   :  { %3152 = vmatmul.mubr.msk.bf16.gmra.mxu1 %vm802_vm0, %v3256_v3 }
 0x19b   :  { %1126 = vmatprep.mubr.bf16.mxu1 %v5646_v48 }
 0x19e   :  { %3136 = vmatmul.mubr.msk.bf16.gmra.mxu0 %vm802_vm0, %v3256_v3 }
 0x19f   :  { %933 = vmatprep.mubr.bf16.mxu0 %v5646_v48 }
 0x1a2   :  { %3153 = vmatmul.mubr.msk.bf16.gmra.mxu1 %vm802_vm0, %v3257_v6 }
 0x1a3   :  { %1136 = vmatprep.mubr.bf16.mxu1 %v5646_v48 }
 0x1a6   :  { %3137 = vmatmul.mubr.msk.bf16.gmra.mxu0 %vm802_vm0, %v3257_v6 }
 0x1a7   :  { %943 = vmatprep.mubr.bf16.mxu0 %v5646_v48 }
 0x1aa   :  { %3154 = vmatmul.mubr.msk.bf16.gmra.mxu1 %vm802_vm0, %v3258_v19 }
 0x1ab   :  { %1146 = vmatprep.mubr.bf16.mxu1 %v5646_v48 }
 0x1ae   :  { %3138 = vmatmul.mubr.msk.bf16.gmra.mxu0 %vm802_vm0, %v3258_v19 }
 0x1af   :  { %953 = vmatprep.mubr.bf16.mxu0 %v5646_v48 }
 0x1b2   :  { %3155 = vmatmul.mubr.msk.bf16.gmra.mxu1 %vm802_vm0, %v3259_v59 }
 0x1b3   :  { %1156 = vmatprep.mubr.bf16.mxu1 %v5646_v48 }
 0x1b6   :  { %3139 = vmatmul.mubr.msk.bf16.gmra.mxu0 %vm802_vm0, %v3259_v59 }
 0x1b7   :  { %963 = vmatprep.mubr.bf16.mxu0 %v5646_v48  ;;  %v640_v48 = vpop.permute.xlu0 %639 }
 0x23a   :  { %v4080_v7 = vpop.f32.mrf.mxu1 }
 0x23b   :  { %5714 = vst [vmem:[#allocation5_spill] sm:$0xff] %v4080_v7 }
 0x23c   :  { %v4082_v0 = vpop.f32.mrf.mxu1 }
 0x23d   :  { %5715 = vst [vmem:[#allocation6_spill] sm:$0xff] %v4082_v0 }
 0x23e   :  { %v4084_v10 = vpop.f32.mrf.mxu0  ;;  %v4086_v13 = vpop.f32.mrf.mxu1 }
 0x23f   :  { %5716 = vst [vmem:[#allocation7_spill] sm:$0xff] %v4084_v10  ;;  %5717 = vst [vmem:[#allocation8_spill] sm:$0xff] %v4086_v13 }
 0x240   :  { %v4088_v1 = vpop.f32.mrf.mxu0  ;;  %v4090_v18 = vpop.f32.mrf.mxu1 }
 0x241   :  { %5718 = vst [vmem:[#allocation9_spill] sm:$0xff] %v4088_v1  ;;  %5719 = vst [vmem:[#allocation10_spill] sm:$0xff] %v4090_v18 }
 0x242   :  { %v4092_v60 = vpop.f32.mrf.mxu0  ;;  %v4094_v36 = vpop.f32.mrf.mxu1 }
 0x243   :  { %5720 = vst [vmem:[#allocation11_spill] sm:$0xff] %v4092_v60 }
 0x244   :  { %v4096_v11 = vpop.f32.mrf.mxu0  ;;  %v4098_v37 = vpop.f32.mrf.mxu1 }
 0x245   :  { %5721 = vst [vmem:[#allocation12_spill] sm:$0xff] %v4096_v11 }
 0x246   :  { %v4100_v8 = vpop.f32.mrf.mxu0  ;;  %v4102_v27 = vpop.f32.mrf.mxu1 }
 0x247   :  { %5722 = vst [vmem:[#allocation13_spill] sm:$0xff] %v4100_v8 }
 0x248   :  { %v4104_v39 = vpop.f32.mrf.mxu0  ;;  %v4106_v9 = vpop.f32.mrf.mxu1 }
 0x24a   :  { %v4108_v21 = vpop.f32.mrf.mxu0  ;;  %v4110_v41 = vpop.f32.mrf.mxu1 }
 0x24b   :  { %5723 = vst [vmem:[#allocation14_spill] sm:$0xff] %v4108_v21 }
 0x24c   :  { %v4112_v2 = vpop.f32.mrf.mxu0  ;;  %v4114_v14 = vpop.f32.mrf.mxu1 }
 0x24e   :  { %v4116_v43 = vpop.f32.mrf.mxu0  ;;  %v4118_v4 = vpop.f32.mrf.mxu1 }
 0x250   :  { %v4120_v12 = vpop.f32.mrf.mxu0  ;;  %v4122_v34 = vpop.f32.mrf.mxu1 }
 0x252   :  { %v4124_v44 = vpop.f32.mrf.mxu0  ;;  %v4126_v52 = vpop.f32.mrf.mxu1 }
 0x254   :  { %v4128_v35 = vpop.f32.mrf.mxu0  ;;  %v4130_v63 = vpop.f32.mrf.mxu1 }
 0x256   :  { %v4132_v25 = vpop.f32.mrf.mxu0  ;;  %v4134_v40 = vpop.f32.mrf.mxu1 }
 0x258   :  { %v4136_v26 = vpop.f32.mrf.mxu0  ;;  %v4138_v24 = vpop.f32.mrf.mxu1 }
 0x25a   :  { %v4140_v20 = vpop.f32.mrf.mxu0  ;;  %v4142_v45 = vpop.f32.mrf.mxu1 }
 0x25c   :  { %v4144_v22 = vpop.f32.mrf.mxu0  ;;  %v4146_v49 = vpop.f32.mrf.mxu1 }
 0x25e   :  { %v4148_v42 = vpop.f32.mrf.mxu0  ;;  %v4150_v23 = vpop.f32.mrf.mxu1 }
 0x260   :  { %v4152_v54 = vpop.f32.mrf.mxu0  ;;  %v4154_v50 = vpop.f32.mrf.mxu1 }
 0x262   :  { %v4156_v33 = vpop.f32.mrf.mxu0  ;;  %v4158_v17 = vpop.f32.mrf.mxu1 }
 0x264   :  { %v4160_v47 = vpop.f32.mrf.mxu0  ;;  %v1130_v31 = vpop.f32.mrf.mxu1 }
 0x266   :  { %v4162_v51 = vpop.f32.mrf.mxu0  ;;  %v1132_v38 = vpop.f32.mrf.mxu1 }
 0x268   :  { %v937_v32 = vpop.f32.mrf.mxu0  ;;  %v1134_v30 = vpop.f32.mrf.mxu1 }
 0x26a   :  { %v4164_v46 = vpop.f32.mrf.mxu0  ;;  %v1138_v53 = vpop.f32.mrf.mxu1 }
 0x26c   :  { %v941_v16 = vpop.f32.mrf.mxu0  ;;  %v1140_v55 = vpop.f32.mrf.mxu1 }
 0x26e   :  { %v945_v56 = vpop.f32.mrf.mxu0  ;;  %v1142_v57 = vpop.f32.mrf.mxu1 }
 0x270   :  { %v947_v28 = vpop.f32.mrf.mxu0  ;;  %v1144_v29 = vpop.f32.mrf.mxu1 }
 0x272   :  { %v949_v15 = vpop.f32.mrf.mxu0  ;;  %v1148_v58 = vpop.f32.mrf.mxu1 }
 0x273   :  { %v4166_v3 = vadd.f32 %v1148_v58, %v635_v61 }
 0x274   :  { %v951_v5 = vpop.f32.mrf.mxu0  ;;  %v1150_v62 = vpop.f32.mrf.mxu1 }
 0x275   :  { %5724 = vst [vmem:[#allocation15_spill] sm:$0xff] %v4166_v3  ;;  %v4168_v6 = vadd.f32 %v1150_v62, %v635_v61 }
 0x276   :  { %v955_v19 = vpop.f32.mrf.mxu0  ;;  %v1152_v59 = vpop.f32.mrf.mxu1 }
 0x277   :  { %5725 = vst [vmem:[#allocation16_spill] sm:$0xff] %v4168_v6  ;;  %v1909_v60 = vmax.f32 %v4166_v3, %v4168_v6  ;;  %v4172_v1 = vadd.f32 %v1152_v59, %v640_v48  ;;  %v4180_v0 = vadd.f32 %v955_v19, %v635_v61  ;;  %v630_v6 = vpop.permute.xlu0 %629  ;;  %v625_v59 = vpop.permute.xlu1 %624 }
 0x278   :  { %v957_v10 = vpop.f32.mrf.mxu0  ;;  %v1154_v11 = vpop.f32.mrf.mxu1  ;;  %v4186_v3 = vadd.f32 %v1140_v55, %v625_v59  ;;  %v4206_v19 = vadd.f32 %v945_v56, %v625_v59 }
 0x279   :  { %v4174_v13 = vadd.f32 %v1154_v11, %v640_v48  ;;  %1910 = vmax.xlane.f32.xlu1 %v1909_v60  ;;  %v4176_v18 = vadd.f32 %v957_v10, %v635_v61  ;;  %v4188_v11 = vadd.f32 %v1144_v29, %v630_v6  ;;  %v4196_v61 = vadd.f32 %v1142_v57, %v630_v6 }
 0x27a   :  { %v959_v7 = vpop.f32.mrf.mxu0 }
 0x27b   :  { %5726 = vst [vmem:[#allocation17_spill] sm:$0xff] %v4174_v13  ;;  %v1912_v58 = vmax.f32 %v4172_v1, %v4174_v13  ;;  %v4182_v21 = vadd.f32 %v959_v7, %v640_v48  ;;  %v1684_v10 = vmax.f32 %v4180_v0, %v4176_v18  ;;  %v4194_v13 = vadd.f32 %v1138_v53, %v625_v59  ;;  %v620_v53 = vpop.permute.xlu0 %619  ;;  %v615_v57 = vpop.permute.xlu1 %614 }
 0x27c   :  { %v961_v62 = vpop.f32.mrf.mxu0  ;;  %v4200_v7 = vadd.f32 %v951_v5, %v630_v6  ;;  %v1906_v29 = vmax.f32 %v4196_v61, %v4188_v11  ;;  %v4221_v56 = vadd.f32 %v1132_v38, %v620_v53 }
 0x27d   :  { %v4184_v8 = vadd.f32 %v961_v62, %v640_v48  ;;  %1913 = vmax.xlane.f32.xlu0 %v1912_v58  ;;  %v4198_v48 = vadd.f32 %v947_v28, %v625_v59  ;;  %v1903_v55 = vmax.f32 %v4194_v13, %v4186_v3  ;;  %v4208_v58 = vadd.f32 %v949_v15, %v630_v6 }
 0x27e   :  { %v4210_v62 = vadd.f32 %v1130_v31, %v615_v57  ;;  %v4212_v28 = vadd.f32 %v1134_v30, %v620_v53  ;;  %v4223_v15 = vadd.f32 %v937_v32, %v615_v57  ;;  %v4225_v6 = vadd.f32 %v941_v16, %v620_v53 }
 0x27f   :  { %v1687_v60 = vmax.f32 %v4182_v21, %v4184_v8  ;;  %v1678_v5 = vmax.f32 %v4206_v19, %v4198_v48  ;;  %v4232_v59 = vadd.f32 %v4162_v51, %v615_v57  ;;  %v610_v38 = vpop.permute.xlu0 %609 }
 0x280   :  { %v1900_v30 = vmax.f32 %v4221_v56, %v4212_v28  ;;  %v4241_v16 = vadd.f32 %v4154_v50, %v610_v38  ;;  %v4257_v50 = vadd.f32 %v4160_v47, %v610_v38  ;;  %v3260_v47 = vld [vmem:[%s5641_s4 + $0x40] sm:$0xff]  }
 0x281   :  { %1685 = vmax.xlane.f32.xlu0 %v1684_v10  ;;  %1688 = vmax.xlane.f32.xlu1 %v1687_v60  ;;  %v1681_v10 = vmax.f32 %v4208_v58, %v4200_v7  ;;  %v4219_v60 = vadd.f32 %v4158_v17, %v615_v57  ;;  %v4235_v17 = vadd.f32 %v4164_v46, %v620_v53 }
 0x282   :  { %v4251_v46 = vadd.f32 %v4150_v23, %v610_v38  ;;  %v4267_v23 = vadd.f32 %v4156_v33, %v610_v38  ;;  %3156 = vmatmul.mubr.msk.bf16.gmra.mxu1 %vm802_vm0, %v3260_v47  ;;  %3140 = vmatmul.mubr.msk.bf16.gmra.mxu0 %vm802_vm0, %v3260_v47 }
 0x283   :  { %v1897_v31 = vmax.f32 %v4219_v60, %v4210_v62  ;;  %v1675_v51 = vmax.f32 %v4235_v17, %v4225_v6 }
 0x284   :  { %v1669_v33 = vmax.f32 %v4267_v23, %v4257_v50 }
 0x285   :  { %1904 = vmax.xlane.f32.xlu0 %v1903_v55  ;;  %1907 = vmax.xlane.f32.xlu1 %v1906_v29  ;;  %v605_v55 = vpop.permute.xlu1 %604  ;;  %v1672_v29 = vmax.f32 %v4232_v59, %v4223_v15 }
 0x286   :  { %v4238_v32 = vadd.f32 %v4146_v49, %v605_v55  ;;  %v4248_v57 = vadd.f32 %v4142_v45, %v605_v55  ;;  %v4254_v49 = vadd.f32 %v4152_v54, %v605_v55  ;;  %v4264_v45 = vadd.f32 %v4148_v42, %v605_v55 }
 0x288   :  { %v1891_v53 = vmax.f32 %v4248_v57, %v4238_v32  ;;  %v1666_v42 = vmax.f32 %v4264_v45, %v4254_v49 }
 0x289   :  { %1679 = vmax.xlane.f32.xlu0 %v1678_v5  ;;  %1682 = vmax.xlane.f32.xlu1 %v1681_v10  ;;  %v1894_v5 = vmax.f32 %v4251_v46, %v4241_v16  ;;  %v600_v10 = vpop.permute.xlu0 %599  ;;  %v595_v54 = vpop.permute.xlu1 %594 }
 0x28a   :  { %v4285_v38 = vadd.f32 %v4126_v52, %v595_v54  ;;  %v4288_v55 = vadd.f32 %v4134_v40, %v600_v10  ;;  %v4303_v40 = vadd.f32 %v4132_v25, %v595_v54 }
 0x28d   :  { %1898 = vmax.xlane.f32.xlu0 %v1897_v31  ;;  %1901 = vmax.xlane.f32.xlu1 %v1900_v30  ;;  %v4273_v31 = vadd.f32 %v4130_v63, %v595_v54  ;;  %v4276_v30 = vadd.f32 %v4138_v24, %v600_v10  ;;  %v5727_v63 = vmov 0   ;;  %v4293_v24 = vadd.f32 %v4136_v26, %v595_v54  ;;  %v585_v26 = vpop.permute.xlu1 %584 }
 0x28e   :  { %1166 = vmatprep.mubr.bf16.mxu1 %v5727_v63  ;;  %973 = vmatprep.mubr.bf16.mxu0 %v5727_v63  ;;  %v4312_v47 = vadd.f32 %v4114_v14, %v585_v26  ;;  %v4332_v14 = vadd.f32 %v4120_v12, %v585_v26 }
 0x28f   :  { %v1888_v52 = vmax.f32 %v4288_v55, %v4276_v30  ;;  %v1660_v25 = vmax.f32 %v4303_v40, %v4293_v24 }
 0x290   :  { %5728 = vst [vmem:[#allocation18_spill] sm:$0xff] %v4332_v14 }
 0x291   :  { %1673 = vmax.xlane.f32.xlu0 %v1672_v29  ;;  %1676 = vmax.xlane.f32.xlu1 %v1675_v51  ;;  %v4296_v29 = vadd.f32 %v4144_v22, %v600_v10  ;;  %v1885_v51 = vmax.f32 %v4285_v38, %v4273_v31  ;;  %v3261_v22 = vld [vmem:[%s5641_s4 + $0x48] sm:$0xff]   ;;  %v575_v12 = vpop.permute.xlu1 %574 }
 0x292   :  { %3157 = vmatmul.mubr.msk.bf16.gmra.mxu1 %vm802_vm0, %v3261_v22  ;;  %3141 = vmatmul.mubr.msk.bf16.gmra.mxu0 %vm802_vm0, %v3261_v22  ;;  %v4351_v22 = vadd.f32 %v4098_v37, %v575_v12  ;;  %v4371_v37 = vadd.f32 %v4104_v39, %v575_v12 }
 0x293   :  { %1176 = vmatprep.mubr.bf16.mxu1 %v5727_v63  ;;  %983 = vmatprep.mubr.bf16.mxu0 %v5727_v63 }
 0x294   :  { %5729 = vst [vmem:[#allocation19_spill] sm:$0xff] %v4351_v22  ;;  %5731 = vst [vmem:[#allocation21_spill] sm:$0xff] %v4371_v37 }
 0x295   :  { %1892 = vmax.xlane.f32.xlu0 %v1891_v53  ;;  %1895 = vmax.xlane.f32.xlu1 %v1894_v5  ;;  %v4306_v53 = vadd.f32 %v4140_v20, %v600_v10  ;;  %v590_v5 = vpop.permute.xlu0 %589  ;;  %v4324_v10 = vadd.f32 %v4110_v41, %v585_v26  ;;  %v565_v39 = vpop.permute.xlu1 %564 }
 0x296   :  { %v4327_v54 = vadd.f32 %v4118_v4, %v590_v5  ;;  %v4342_v4 = vadd.f32 %v4116_v43, %v585_v26 }
 0x297   :  { %v1663_v20 = vmax.f32 %v4306_v53, %v4296_v29 }
 0x298   :  { %v1654_v43 = vmax.f32 %v4342_v4, %v4332_v14 }
 0x299   :  { %1667 = vmax.xlane.f32.xlu0 %v1666_v42  ;;  %1670 = vmax.xlane.f32.xlu1 %v1669_v33  ;;  %v4315_v42 = vadd.f32 %v4122_v34, %v590_v5  ;;  %v4335_v34 = vadd.f32 %v4128_v35, %v590_v5  ;;  %v1879_v33 = vmax.f32 %v4324_v10, %v4312_v47  ;;  %v3262_v35 = vld [vmem:[%s5641_s4 + $0x50] sm:$0xff]  }
 0x29a   :  { %3158 = vmatmul.mubr.msk.bf16.gmra.mxu1 %vm802_vm0, %v3262_v35  ;;  %3142 = vmatmul.mubr.msk.bf16.gmra.mxu0 %vm802_vm0, %v3262_v35 }
 0x29b   :  { %v1882_v41 = vmax.f32 %v4327_v54, %v4315_v42  ;;  %1186 = vmatprep.mubr.bf16.mxu1 %v5727_v63  ;;  %993 = vmatprep.mubr.bf16.mxu0 %v5727_v63 }
 0x29d   :  { %1886 = vmax.xlane.f32.xlu0 %v1885_v51  ;;  %1889 = vmax.xlane.f32.xlu1 %v1888_v52  ;;  %v4345_v51 = vadd.f32 %v4124_v44, %v590_v5  ;;  %v580_v52 = vpop.permute.xlu0 %579  ;;  %v4363_v5 = vadd.f32 %v4094_v36, %v575_v12 }
 0x29e   :  { %v4366_v26 = vadd.f32 %v4102_v27, %v580_v52  ;;  %v5733_v27 = vld [vmem:[#allocation13_spill] sm:$0xff] }
 0x29f   :  { %v1657_v44 = vmax.f32 %v4345_v51, %v4335_v34  ;;  %5730 = vst [vmem:[#allocation20_spill] sm:$0xff] %v4363_v5 }
 0x2a1   :  { %1661 = vmax.xlane.f32.xlu0 %v1660_v25  ;;  %1664 = vmax.xlane.f32.xlu1 %v1663_v20  ;;  %v4354_v25 = vadd.f32 %v4106_v9, %v580_v52  ;;  %v4374_v9 = vadd.f32 %v4112_v2, %v580_v52  ;;  %v1873_v20 = vmax.f32 %v4363_v5, %v4351_v22  ;;  %v3263_v2 = vld [vmem:[%s5641_s4 + $0x58] sm:$0xff]   ;;  %v5739_v22 = vld [vmem:[#allocation10_spill] sm:$0xff] }
 0x2a2   :  { %3159 = vmatmul.mubr.msk.bf16.gmra.mxu1 %vm802_vm0, %v3263_v2  ;;  %3143 = vmatmul.mubr.msk.bf16.gmra.mxu0 %vm802_vm0, %v3263_v2 }
 0x2a3   :  { %5732 = vst [vmem:[#allocation22_spill] sm:$0xff] %v4374_v9  ;;  %v1876_v36 = vmax.f32 %v4366_v26, %v4354_v25  ;;  %1196 = vmatprep.mubr.bf16.mxu1 %v5727_v63  ;;  %1003 = vmatprep.mubr.bf16.mxu0 %v5727_v63 }
 0x2a5   :  { %1880 = vmax.xlane.f32.xlu0 %v1879_v33  ;;  %1883 = vmax.xlane.f32.xlu1 %v1882_v41  ;;  %v4381_v33 = vadd.f32 %v5733_v27, %v575_v12  ;;  %v5735_v41 = vld [vmem:[#allocation14_spill] sm:$0xff]  ;;  %v5743_v27 = vld [vmem:[#allocation8_spill] sm:$0xff] }
 0x2a6   :  { %v4384_v35 = vadd.f32 %v5735_v41, %v580_v52 }
 0x2a7   :  { %5734 = vst [vmem:[#allocation13_spill] sm:$0xff] %v4381_v33  ;;  %v1648_v12 = vmax.f32 %v4381_v33, %v4371_v37  ;;  %v5747_v33 = vld [vmem:[#allocation12_spill] sm:$0xff] }
 0x2a8   :  { %5736 = vst [vmem:[#allocation14_spill] sm:$0xff] %v4384_v35  ;;  %v1651_v52 = vmax.f32 %v4384_v35, %v4374_v9 }
 0x2a9   :  { %1655 = vmax.xlane.f32.xlu0 %v1654_v43  ;;  %1658 = vmax.xlane.f32.xlu1 %v1657_v44  ;;  %v570_v43 = vpop.permute.xlu0 %569  ;;  %v5737_v44 = vld [vmem:[#allocation6_spill] sm:$0xff] }
 0x2aa   :  { %v4390_v14 = vadd.f32 %v5737_v44, %v565_v39  ;;  %v4393_v5 = vadd.f32 %v5739_v22, %v570_v43  ;;  %v4405_v41 = vadd.f32 %v5743_v27, %v570_v43  ;;  %v5745_v22 = vld [vmem:[#allocation9_spill] sm:$0xff]  ;;  %v4415_v2 = vadd.f32 %v5747_v33, %v570_v43  ;;  %v5749_v27 = vld [vmem:[#allocation7_spill] sm:$0xff] }
 0x2ab   :  { %v4410_v44 = vadd.f32 %v5745_v22, %v565_v39  ;;  %v4420_v9 = vadd.f32 %v5749_v27, %v565_v39  ;;  %v3264_v22 = vld [vmem:[%s5641_s4 + $0x60] sm:$0xff]  }
 0x2ac   :  { %5738 = vst [vmem:[#allocation6_spill] sm:$0xff] %v4390_v14  ;;  %5740 = vst [vmem:[#allocation10_spill] sm:$0xff] %v4393_v5  ;;  %v1870_v37 = vmax.f32 %v4405_v41, %v4393_v5  ;;  %3160 = vmatmul.mubr.msk.bf16.gmra.mxu1 %vm802_vm0, %v3264_v22  ;;  %3144 = vmatmul.mubr.msk.bf16.gmra.mxu0 %vm802_vm0, %v3264_v22  ;;  %v3599_v22 = vld [vmem:[%s5637_s0 + $0x18] sm:$0xff] }
 0x2ad   :  { %1874 = vmax.xlane.f32.xlu0 %v1873_v20  ;;  %1877 = vmax.xlane.f32.xlu1 %v1876_v36  ;;  %v5741_v20 = vld [vmem:[#allocation5_spill] sm:$0xff]  ;;  %5744 = vst [vmem:[#allocation8_spill] sm:$0xff] %v4405_v41  ;;  %5746 = vst [vmem:[#allocation9_spill] sm:$0xff] %v4410_v44  ;;  %v1642_v33 = vmax.f32 %v4420_v9, %v4410_v44 }
 0x2ae   :  { %v4402_v36 = vadd.f32 %v5741_v20, %v565_v39  ;;  %5748 = vst [vmem:[#allocation12_spill] sm:$0xff] %v4415_v2  ;;  %5750 = vst [vmem:[#allocation7_spill] sm:$0xff] %v4420_v9  ;;  %1206 = vmatprep.mubr.bf16.mxu1 %v5727_v63  ;;  %1013 = vmatprep.mubr.bf16.mxu0 %v5727_v63  ;;  %v3596_v39 = vld [vmem:[%s5637_s0 + $0x48] sm:$0xff] }
 0x2b0   :  { %5742 = vst [vmem:[#allocation5_spill] sm:$0xff] %v4402_v36  ;;  %v1867_v20 = vmax.f32 %v4402_v36, %v4390_v14 }
 0x2b1   :  { %1649 = vmax.xlane.f32.xlu0 %v1648_v12  ;;  %1652 = vmax.xlane.f32.xlu1 %v1651_v52  ;;  %v5751_v12 = vld [vmem:[#allocation11_spill] sm:$0xff] }
 0x2b2   :  { %v4423_v52 = vadd.f32 %v5751_v12, %v570_v43  ;;  %v3267_v43 = vld [vmem:[%s5641_s4 + $0x78] sm:$0xff]   ;;  %v3598_v12 = vld [vmem:[%s5637_s0 + $0x8] sm:$0xff] }
 0x2b4   :  { %5752 = vst [vmem:[#allocation11_spill] sm:$0xff] %v4423_v52  ;;  %v1645_v5 = vmax.f32 %v4423_v52, %v4415_v2 }
 0x2b5   :  { %1868 = vmax.xlane.f32.xlu0 %v1867_v20  ;;  %1871 = vmax.xlane.f32.xlu1 %v1870_v37  ;;  %v3265_v37 = vld [vmem:[%s5641_s4 + $0x68] sm:$0xff]   ;;  %v3597_v20 = vld [vmem:[%s5637_s0 + $0x58] sm:$0xff] }
 0x2b6   :  { %3161 = vmatmul.mubr.msk.bf16.gmra.mxu1 %vm802_vm0, %v3265_v37  ;;  %3145 = vmatmul.mubr.msk.bf16.gmra.mxu0 %vm802_vm0, %v3265_v37  ;;  %v1639_v27 = vpack.c.bf16 %v3597_v20, %v3596_v39  ;;  %v5755_v20 = vld [vmem:[#allocation17_spill] sm:$0xff] }
 0x2b7   :  { %1216 = vmatprep.mubr.bf16.mxu1 %v5727_v63  ;;  %1023 = vmatprep.mubr.bf16.mxu0 %v5727_v63 }
 0x2b9   :  { %1643 = vmax.xlane.f32.xlu0 %v1642_v33  ;;  %1646 = vmax.xlane.f32.xlu1 %v1645_v5  ;;  %v3266_v5 = vld [vmem:[%s5641_s4 + $0x70] sm:$0xff]   ;;  %v1634_v33 = vpack.c.bf16 %v3599_v22, %v3598_v12 }
 0x2be   :  { %3162 = vmatmul.mubr.msk.bf16.gmra.mxu1 %vm802_vm0, %v3266_v5  ;;  %3146 = vmatmul.mubr.msk.bf16.gmra.mxu0 %vm802_vm0, %v3266_v5  ;;  %v5753_v5 = vld [vmem:[#allocation15_spill] sm:$0xff] }
 0x2bf   :  { %1226 = vmatprep.mubr.bf16.mxu1 %v5727_v63  ;;  %1033 = vmatprep.mubr.bf16.mxu0 %v5727_v63  ;;  %v5754_v63 = vld [vmem:[#allocation16_spill] sm:$0xff] }
 0x2c6   :  { %3163 = vmatmul.mubr.msk.bf16.gmra.mxu1 %vm802_vm0, %v3267_v43  ;;  %3147 = vmatmul.mubr.msk.bf16.gmra.mxu0 %vm802_vm0, %v3267_v43 }
 0x2c7   :  { %2059 = vmatprep.mubr.bf16.mxu1 %v1639_v27  ;;  %1834 = vmatprep.mubr.bf16.mxu0 %v1634_v33 }
 0x302   :  { %v1911_v37 = vpop.xlane.xlu1 %1910 }
 0x303   :  { %v1943_v43 = vsub.f32 %v5753_v5, %v1911_v37  ;;  %v1944_v44 = vsub.f32 %v5754_v63, %v1911_v37 }
 0x305   :  { %v2003_v9 = vmul.f32 1.442695, %v1943_v43  ;;  %v2005_v2 = vmul.f32 1.442695, %v1944_v44 }
 0x306   :  { %v1914_v52 = vpop.xlane.xlu0 %1913 }
 0x307   :  { %v1945_v39 = vsub.f32 %v4172_v1, %v1914_v52  ;;  %v1946_v27 = vsub.f32 %v5755_v20, %v1914_v52  ;;  %3296 = vpow2.f32 %v2003_v9 }
 0x308   :  { %3298 = vpow2.f32 %v2005_v2 }
 0x309   :  { %v2007_v14 = vmul.f32 1.442695, %v1945_v39  ;;  %v2009_v36 = vmul.f32 1.442695, %v1946_v27 }
 0x30a   :  { %v1689_v41 = vpop.xlane.xlu1 %1688  ;;  %v1686_v35 = vpop.xlane.xlu0 %1685 }
 0x30b   :  { %3300 = vpow2.f32 %v2007_v14  ;;  %v1720_v12 = vsub.f32 %v4182_v21, %v1689_v41  ;;  %v1721_v22 = vsub.f32 %v4184_v8, %v1689_v41  ;;  %v1718_v63 = vsub.f32 %v4180_v0, %v1686_v35 }
 0x30c   :  { %3302 = vpow2.f32 %v2009_v36  ;;  %v1719_v44 = vsub.f32 %v4176_v18, %v1686_v35 }
 0x30d   :  { %v1782_v33 = vmul.f32 1.442695, %v1720_v12  ;;  %v1784_v1 = vmul.f32 1.442695, %v1721_v22  ;;  %v1778_v37 = vmul.f32 1.442695, %v1718_v63 }
 0x30e   :  { %v1780_v52 = vmul.f32 1.442695, %v1719_v44  ;;  %v1908_v9 = vpop.xlane.xlu1 %1907  ;;  %v1905_v5 = vpop.xlane.xlu0 %1904 }
 0x30f   :  { %3304 = vpow2.f32 %v1782_v33  ;;  %v1941_v2 = vsub.f32 %v4196_v61, %v1908_v9  ;;  %v1942_v14 = vsub.f32 %v4188_v11, %v1908_v9  ;;  %v1939_v21 = vsub.f32 %v4194_v13, %v1905_v5 }
 0x310   :  { %3306 = vpow2.f32 %v1784_v1  ;;  %v1940_v8 = vsub.f32 %v4186_v3, %v1905_v5 }
 0x311   :  { %3308 = vpow2.f32 %v1778_v37  ;;  %v1999_v0 = vmul.f32 1.442695, %v1941_v2  ;;  %v2001_v36 = vmul.f32 1.442695, %v1942_v14  ;;  %v1995_v18 = vmul.f32 1.442695, %v1939_v21 }
 0x312   :  { %3310 = vpow2.f32 %v1780_v52  ;;  %v1997_v35 = vmul.f32 1.442695, %v1940_v8  ;;  %v1683_v41 = vpop.xlane.xlu1 %1682  ;;  %v1680_v43 = vpop.xlane.xlu0 %1679 }
 0x313   :  { %3312 = vpow2.f32 %v1999_v0  ;;  %v1716_v39 = vsub.f32 %v4208_v58, %v1683_v41  ;;  %v1717_v61 = vsub.f32 %v4200_v7, %v1683_v41  ;;  %v1714_v11 = vsub.f32 %v4206_v19, %v1680_v43 }
 0x314   :  { %3314 = vpow2.f32 %v2001_v36  ;;  %v1715_v13 = vsub.f32 %v4198_v48, %v1680_v43  ;;  %v3297_v12 = vpop.eup %3296 }
 0x315   :  { %3316 = vpow2.f32 %v1995_v18  ;;  %v1774_v3 = vmul.f32 1.442695, %v1716_v39  ;;  %v1776_v20 = vmul.f32 1.442695, %v1717_v61  ;;  %v1770_v27 = vmul.f32 1.442695, %v1714_v11  ;;  %v3299_v33 = vpop.eup %3298 }
 0x316   :  { %3318 = vpow2.f32 %v1997_v35  ;;  %v1772_v22 = vmul.f32 1.442695, %v1715_v13  ;;  %v1902_v63 = vpop.xlane.xlu1 %1901  ;;  %v1899_v44 = vpop.xlane.xlu0 %1898 }
 0x317   :  { %3320 = vpow2.f32 %v1774_v3  ;;  %v1937_v58 = vsub.f32 %v4221_v56, %v1902_v63  ;;  %v1938_v7 = vsub.f32 %v4212_v28, %v1902_v63  ;;  %v1935_v19 = vsub.f32 %v4219_v60, %v1899_v44 }
 0x318   :  { %v3301_v1 = vpop.eup %3300  ;;  %3322 = vpow2.f32 %v1776_v20  ;;  %v1936_v48 = vsub.f32 %v4210_v62, %v1899_v44 }
 0x319   :  { %v3303_v37 = vpop.eup %3302  ;;  %3324 = vpow2.f32 %v1770_v27  ;;  %v1991_v52 = vmul.f32 1.442695, %v1937_v58  ;;  %v1993_v9 = vmul.f32 1.442695, %v1938_v7  ;;  %v1987_v5 = vmul.f32 1.442695, %v1935_v19 }
 0x31a   :  { %3326 = vpow2.f32 %v1772_v22  ;;  %v1989_v2 = vmul.f32 1.442695, %v1936_v48  ;;  %v1677_v14 = vpop.xlane.xlu1 %1676  ;;  %v1674_v21 = vpop.xlane.xlu0 %1673  ;;  %v2026_v8 = vpack.c.bf16 %v3303_v37, %v3299_v33  ;;  %v2025_v0 = vpack.c.bf16 %v3301_v1, %v3297_v12 }
 0x31b   :  { %3328 = vpow2.f32 %v1991_v52  ;;  %v1712_v28 = vsub.f32 %v4235_v17, %v1677_v14  ;;  %v1713_v60 = vsub.f32 %v4225_v6, %v1677_v14  ;;  %v1710_v56 = vsub.f32 %v4232_v59, %v1674_v21 }
 0x31c   :  { %v3305_v36 = vpop.eup %3304  ;;  %3330 = vpow2.f32 %v1993_v9  ;;  %v1711_v62 = vsub.f32 %v4223_v15, %v1674_v21  ;;  %2027 = vmatprep.subr.bf16.mxu1 %v2026_v8 }
 0x31d   :  { %v3307_v18 = vpop.eup %3306  ;;  %3332 = vpow2.f32 %v1987_v5  ;;  %v1766_v35 = vmul.f32 1.442695, %v1712_v28  ;;  %v1768_v41 = vmul.f32 1.442695, %v1713_v60  ;;  %v1762_v43 = vmul.f32 1.442695, %v1710_v56  ;;  %2028 = vmatpush1.bf16.xpose.msra.mxu1 %v2025_v0 }
 0x31e   :  { %v3309_v39 = vpop.eup %3308  ;;  %3334 = vpow2.f32 %v1989_v2  ;;  %v1764_v61 = vmul.f32 1.442695, %v1711_v62  ;;  %v1896_v11 = vpop.xlane.xlu1 %1895 }
 0x31f   :  { %v1893_v17 = vpop.xlane.xlu0 %1892  ;;  %v3311_v13 = vpop.eup %3310  ;;  %3336 = vpow2.f32 %v1766_v35  ;;  %v1933_v6 = vsub.f32 %v4251_v46, %v1896_v11  ;;  %v1934_v59 = vsub.f32 %v4241_v16, %v1896_v11  ;;  %v1800_v12 = vpack.c.bf16 %v3305_v36, %v3309_v39 }
 0x320   :  { %v1931_v15 = vsub.f32 %v4248_v57, %v1893_v17  ;;  %v3313_v3 = vpop.eup %3312  ;;  %3338 = vpow2.f32 %v1768_v41  ;;  %v1932_v20 = vsub.f32 %v4238_v32, %v1893_v17  ;;  %v1801_v27 = vpack.c.bf16 %v3307_v18, %v3311_v13 }
 0x321   :  { %v3315_v22 = vpop.eup %3314  ;;  %3340 = vpow2.f32 %v1762_v43  ;;  %v1983_v63 = vmul.f32 1.442695, %v1933_v6  ;;  %v1985_v44 = vmul.f32 1.442695, %v1934_v59 }
 0x322   :  { %v1979_v33 = vmul.f32 1.442695, %v1931_v15  ;;  %v3317_v58 = vpop.eup %3316  ;;  %3342 = vpow2.f32 %v1764_v61  ;;  %v1981_v7 = vmul.f32 1.442695, %v1932_v20  ;;  %1802 = vmatprep.subr.bf16.mxu0 %v1801_v27  ;;  %v1671_v46 = vpop.xlane.xlu1 %1670 }
 0x323   :  { %v1668_v19 = vpop.xlane.xlu0 %1667  ;;  %v3319_v16 = vpop.eup %3318  ;;  %3344 = vpow2.f32 %v1983_v63  ;;  %1803 = vmatpush1.bf16.xpose.msra.mxu0 %v1800_v12  ;;  %v1708_v57 = vsub.f32 %v4267_v23, %v1671_v46  ;;  %v1709_v32 = vsub.f32 %v4257_v50, %v1671_v46  ;;  %v2023_v9 = vpack.c.bf16 %v3313_v3, %v3317_v58 }
 0x324   :  { %v1706_v1 = vsub.f32 %v4264_v45, %v1668_v19  ;;  %v3321_v48 = vpop.eup %3320  ;;  %3346 = vpow2.f32 %v1985_v44  ;;  %v1707_v37 = vsub.f32 %v4254_v49, %v1668_v19  ;;  %v2024_v52 = vpack.c.bf16 %v3315_v22, %v3319_v16 }
 0x325   :  { %v3323_v5 = vpop.eup %3322  ;;  %3348 = vpow2.f32 %v1979_v33  ;;  %v1758_v2 = vmul.f32 1.442695, %v1708_v57  ;;  %v1760_v14 = vmul.f32 1.442695, %v1709_v32 }
 0x326   :  { %v1754_v21 = vmul.f32 1.442695, %v1706_v1  ;;  %v3325_v8 = vpop.eup %3324  ;;  %3350 = vpow2.f32 %v1981_v7  ;;  %v1756_v0 = vmul.f32 1.442695, %v1707_v37  ;;  %2029 = vmatprep.subr.bf16.mxu1 %v2024_v52  ;;  %v1890_v23 = vpop.xlane.xlu1 %1889 }
 0x327   :  { %v1887_v28 = vpop.xlane.xlu0 %1886  ;;  %v3327_v50 = vpop.eup %3326  ;;  %3352 = vpow2.f32 %v1758_v2  ;;  %2030 = vmatpush1.bf16.xpose.msra.mxu1 %v2023_v9  ;;  %v1929_v45 = vsub.f32 %v4288_v55, %v1890_v23  ;;  %v1930_v49 = vsub.f32 %v4276_v30, %v1890_v23  ;;  %v1798_v18 = vpack.c.bf16 %v3321_v48, %v3325_v8 }
 0x328   :  { %v1927_v60 = vsub.f32 %v4285_v38, %v1887_v28  ;;  %v3329_v56 = vpop.eup %3328  ;;  %3354 = vpow2.f32 %v1760_v14  ;;  %v1928_v36 = vsub.f32 %v4273_v31, %v1887_v28  ;;  %v1799_v62 = vpack.c.bf16 %v3323_v5, %v3327_v50  ;;  %v5756_v14 = vld [vmem:[#allocation18_spill] sm:$0xff] }
 0x329   :  { %v3331_v35 = vpop.eup %3330  ;;  %3356 = vpow2.f32 %v1754_v21  ;;  %v1975_v41 = vmul.f32 1.442695, %v1929_v45  ;;  %v1977_v43 = vmul.f32 1.442695, %v1930_v49 }
 0x32a   :  { %v1971_v39 = vmul.f32 1.442695, %v1927_v60  ;;  %v3333_v61 = vpop.eup %3332  ;;  %3358 = vpow2.f32 %v1756_v0  ;;  %v1973_v11 = vmul.f32 1.442695, %v1928_v36  ;;  %1804 = vmatprep.subr.bf16.mxu0 %v1799_v62  ;;  %v1665_v55 = vpop.xlane.xlu1 %1664  ;;  %v5757_v62 = vld [vmem:[#allocation20_spill] sm:$0xff] }
 0x32b   :  { %v1662_v17 = vpop.xlane.xlu0 %1661  ;;  %v3335_v30 = vpop.eup %3334  ;;  %3360 = vpow2.f32 %v1975_v41  ;;  %1805 = vmatpush1.bf16.xpose.msra.mxu0 %v1798_v18  ;;  %v1704_v38 = vsub.f32 %v4306_v53, %v1665_v55  ;;  %v1705_v31 = vsub.f32 %v4296_v29, %v1665_v55  ;;  %v2021_v3 = vpack.c.bf16 %v3329_v56, %v3333_v61  ;;  %v5758_v41 = vld [vmem:[#allocation19_spill] sm:$0xff] }
 0x32c   :  { %v1702_v13 = vsub.f32 %v4303_v40, %v1662_v17  ;;  %v3337_v6 = vpop.eup %3336  ;;  %3362 = vpow2.f32 %v1977_v43  ;;  %v1703_v59 = vsub.f32 %v4293_v24, %v1662_v17  ;;  %v2022_v15 = vpack.c.bf16 %v3331_v35, %v3335_v30 }
 0x32d   :  { %v3339_v20 = vpop.eup %3338  ;;  %3364 = vpow2.f32 %v1971_v39  ;;  %v1750_v27 = vmul.f32 1.442695, %v1704_v38  ;;  %v1752_v12 = vmul.f32 1.442695, %v1705_v31 }
 0x32e   :  { %v1746_v22 = vmul.f32 1.442695, %v1702_v13  ;;  %v3341_v63 = vpop.eup %3340  ;;  %3366 = vpow2.f32 %v1973_v11  ;;  %v1748_v44 = vmul.f32 1.442695, %v1703_v59  ;;  %2031 = vmatprep.subr.bf16.mxu1 %v2022_v15  ;;  %v1884_v53 = vpop.xlane.xlu1 %1883  ;;  %v5760_v15 = vld [vmem:[#allocation22_spill] sm:$0xff] }
 0x32f   :  { %v1881_v33 = vpop.xlane.xlu0 %1880  ;;  %v3343_v29 = vpop.eup %3342  ;;  %3368 = vpow2.f32 %v1750_v27  ;;  %2032 = vmatpush1.bf16.xpose.msra.mxu1 %v2021_v3  ;;  %v1925_v40 = vsub.f32 %v4327_v54, %v1884_v53  ;;  %v1926_v24 = vsub.f32 %v4315_v42, %v1884_v53  ;;  %v1796_v16 = vpack.c.bf16 %v3337_v6, %v3341_v63  ;;  %v5759_v6 = vld [vmem:[#allocation14_spill] sm:$0xff] }
 0x330   :  { %v1923_v58 = vsub.f32 %v4324_v10, %v1881_v33  ;;  %v3345_v7 = vpop.eup %3344  ;;  %3370 = vpow2.f32 %v1752_v12  ;;  %v1924_v46 = vsub.f32 %v4312_v47, %v1881_v33  ;;  %v1797_v19 = vpack.c.bf16 %v3339_v20, %v3343_v29  ;;  %v5761_v20 = vld [vmem:[#allocation13_spill] sm:$0xff] }
 0x331   :  { %v3347_v57 = vpop.eup %3346  ;;  %3372 = vpow2.f32 %v1746_v22  ;;  %v1967_v32 = vmul.f32 1.442695, %v1925_v40  ;;  %v1969_v1 = vmul.f32 1.442695, %v1926_v24  ;;  %v5762_v22 = vld [vmem:[#allocation21_spill] sm:$0xff] }
 0x332   :  { %v1963_v48 = vmul.f32 1.442695, %v1923_v58  ;;  %v3349_v37 = vpop.eup %3348  ;;  %3374 = vpow2.f32 %v1748_v44  ;;  %v1965_v52 = vmul.f32 1.442695, %v1924_v46  ;;  %1806 = vmatprep.subr.bf16.mxu0 %v1797_v19  ;;  %v1659_v54 = vpop.xlane.xlu1 %1658 }
 0x333   :  { %v1656_v9 = vpop.xlane.xlu0 %1655  ;;  %v3351_v42 = vpop.eup %3350  ;;  %3376 = vpow2.f32 %v1967_v32  ;;  %1807 = vmatpush1.bf16.xpose.msra.mxu0 %v1796_v16  ;;  %v1700_v10 = vsub.f32 %v4345_v51, %v1659_v54  ;;  %v1701_v47 = vsub.f32 %v4335_v34, %v1659_v54  ;;  %v2019_v0 = vpack.c.bf16 %v3345_v7, %v3349_v37  ;;  %v5765_v37 = vld [vmem:[#allocation5_spill] sm:$0xff] }
 0x334   :  { %v1698_v5 = vsub.f32 %v4342_v4, %v1656_v9  ;;  %v3353_v2 = vpop.eup %3352  ;;  %3378 = vpow2.f32 %v1969_v1  ;;  %v1699_v21 = vsub.f32 %v5756_v14, %v1656_v9  ;;  %v2020_v8 = vpack.c.bf16 %v3347_v57, %v3351_v42  ;;  %v5763_v57 = vld [vmem:[#allocation8_spill] sm:$0xff]  ;;  %v5764_v1 = vld [vmem:[#allocation10_spill] sm:$0xff] }
 0x335   :  { %v3355_v23 = vpop.eup %3354  ;;  %3380 = vpow2.f32 %v1963_v48  ;;  %v1742_v28 = vmul.f32 1.442695, %v1700_v10  ;;  %v1744_v50 = vmul.f32 1.442695, %v1701_v47  ;;  %v5766_v9 = vld [vmem:[#allocation6_spill] sm:$0xff] }
 0x336   :  { %v1738_v45 = vmul.f32 1.442695, %v1698_v5  ;;  %v3357_v49 = vpop.eup %3356  ;;  %3382 = vpow2.f32 %v1965_v52  ;;  %v1740_v60 = vmul.f32 1.442695, %v1699_v21  ;;  %2033 = vmatprep.subr.bf16.mxu1 %v2020_v8  ;;  %v1878_v51 = vpop.xlane.xlu1 %1877 }
 0x337   :  { %v1875_v56 = vpop.xlane.xlu0 %1874  ;;  %v3359_v34 = vpop.eup %3358  ;;  %3384 = vpow2.f32 %v1742_v28  ;;  %2034 = vmatpush1.bf16.xpose.msra.mxu1 %v2019_v0  ;;  %v1921_v4 = vsub.f32 %v4366_v26, %v1878_v51  ;;  %v1922_v36 = vsub.f32 %v4354_v25, %v1878_v51  ;;  %v1794_v61 = vpack.c.bf16 %v3353_v2, %v3357_v49 }
 0x338   :  { %v1919_v18 = vsub.f32 %v5757_v62, %v1875_v56  ;;  %v3361_v35 = vpop.eup %3360  ;;  %3386 = vpow2.f32 %v1744_v50  ;;  %v1920_v43 = vsub.f32 %v5758_v41, %v1875_v56  ;;  %v1795_v39 = vpack.c.bf16 %v3355_v23, %v3359_v34  ;;  %v5769_v56 = vld [vmem:[#allocation7_spill] sm:$0xff] }
 0x339   :  { %v3363_v11 = vpop.eup %3362  ;;  %3388 = vpow2.f32 %v1738_v45  ;;  %v1959_v55 = vmul.f32 1.442695, %v1921_v4  ;;  %v1961_v17 = vmul.f32 1.442695, %v1922_v36  ;;  %v5767_v45 = vld [vmem:[#allocation11_spill] sm:$0xff]  ;;  %v5770_v36 = vld [vmem:[#allocation9_spill] sm:$0xff] }
 0x33a   :  { %v1955_v30 = vmul.f32 1.442695, %v1919_v18  ;;  %v3365_v38 = vpop.eup %3364  ;;  %3390 = vpow2.f32 %v1740_v60  ;;  %v1957_v31 = vmul.f32 1.442695, %v1920_v43  ;;  %1808 = vmatprep.subr.bf16.mxu0 %v1795_v39  ;;  %v1653_v26 = vpop.xlane.xlu1 %1652  ;;  %v5768_v60 = vld [vmem:[#allocation12_spill] sm:$0xff] }
 0x33b   :  { %v1650_v13 = vpop.xlane.xlu0 %1649  ;;  %v3367_v25 = vpop.eup %3366  ;;  %3392 = vpow2.f32 %v1959_v55  ;;  %1809 = vmatpush1.bf16.xpose.msra.mxu0 %v1794_v61  ;;  %v1696_v59 = vsub.f32 %v5759_v6, %v1653_v26  ;;  %v1697_v3 = vsub.f32 %v5760_v15, %v1653_v26  ;;  %v2017_v53 = vpack.c.bf16 %v3361_v35, %v3365_v38 }
 0x33c   :  { %v1694_v27 = vsub.f32 %v5761_v20, %v1650_v13  ;;  %v3369_v12 = vpop.eup %3368  ;;  %3394 = vpow2.f32 %v1961_v17  ;;  %v1695_v63 = vsub.f32 %v5762_v22, %v1650_v13  ;;  %v2018_v44 = vpack.c.bf16 %v3363_v11, %v3367_v25 }
 0x33d   :  { %v3371_v33 = vpop.eup %3370  ;;  %3396 = vpow2.f32 %v1955_v30  ;;  %v1734_v29 = vmul.f32 1.442695, %v1696_v59  ;;  %v1736_v40 = vmul.f32 1.442695, %v1697_v3 }
 0x33e   :  { %v1730_v24 = vmul.f32 1.442695, %v1694_v27  ;;  %v3373_v58 = vpop.eup %3372  ;;  %3398 = vpow2.f32 %v1957_v31  ;;  %v1732_v7 = vmul.f32 1.442695, %v1695_v63  ;;  %2035 = vmatprep.subr.bf16.mxu1 %v2018_v44  ;;  %v1872_v46 = vpop.xlane.xlu1 %1871 }
 0x33f   :  { %v1869_v19 = vpop.xlane.xlu0 %1868  ;;  %v3375_v16 = vpop.eup %3374  ;;  %3400 = vpow2.f32 %v1734_v29  ;;  %2036 = vmatpush1.bf16.xpose.msra.mxu1 %v2017_v53  ;;  %v1917_v32 = vsub.f32 %v5763_v57, %v1872_v46  ;;  %v1918_v48 = vsub.f32 %v5764_v1, %v1872_v46  ;;  %v1792_v47 = vpack.c.bf16 %v3369_v12, %v3373_v58  ;;  %v3600_v57 = vld [vmem:[%s5637_s0 + $0x40] sm:$0xff] }
 0x340   :  { %v1915_v52 = vsub.f32 %v5765_v37, %v1869_v19  ;;  %v3377_v54 = vpop.eup %3376  ;;  %3402 = vpow2.f32 %v1736_v40  ;;  %v1916_v42 = vsub.f32 %v5766_v9, %v1869_v19  ;;  %v1793_v10 = vpack.c.bf16 %v3371_v33, %v3375_v16  ;;  %v3603_v37 = vld [vmem:[%s5637_s0 + $0x78] sm:$0xff]  ;;  %v3605_v9 = vld [vmem:[%s5637_s0 + $0x10] sm:$0xff] }
 0x341   :  { %v3379_v5 = vpop.eup %3378  ;;  %3404 = vpow2.f32 %v1730_v24  ;;  %v1951_v2 = vmul.f32 1.442695, %v1917_v32  ;;  %v1953_v14 = vmul.f32 1.442695, %v1918_v48  ;;  %v3601_v32 = vld [vmem:[%s5637_s0 + $0x50] sm:$0xff]  ;;  %v3602_v48 = vld [vmem:[%s5637_s0 + $0x68] sm:$0xff] }
 0x342   :  { %v1947_v21 = vmul.f32 1.442695, %v1915_v52  ;;  %v3381_v8 = vpop.eup %3380  ;;  %3406 = vpow2.f32 %v1732_v7  ;;  %v1949_v0 = vmul.f32 1.442695, %v1916_v42  ;;  %1810 = vmatprep.subr.bf16.mxu0 %v1793_v10  ;;  %v1647_v23 = vpop.xlane.xlu1 %1646  ;;  %v1638_v1 = vpack.c.bf16 %v3601_v32, %v3600_v57  ;;  %v3606_v10 = vld [vmem:[%s5637_s0 + $0x28] sm:$0xff] }
 0x343   :  { %v1644_v28 = vpop.xlane.xlu0 %1643  ;;  %v3383_v50 = vpop.eup %3382  ;;  %3408 = vpow2.f32 %v1951_v2  ;;  %1811 = vmatpush1.bf16.xpose.msra.mxu0 %v1792_v47  ;;  %v1692_v49 = vsub.f32 %v5767_v45, %v1647_v23  ;;  %v1693_v51 = vsub.f32 %v5768_v60, %v1647_v23  ;;  %v2015_v35 = vpack.c.bf16 %v3377_v54, %v3381_v8  ;;  %v3604_v54 = vld [vmem:[%s5637_s0] sm:$0xff]  ;;  %v3607_v47 = vld [vmem:[%s5637_s0 + $0x38] sm:$0xff] }
 0x344   :  { %v1690_v34 = vsub.f32 %v5769_v56, %v1644_v28  ;;  %v3385_v4 = vpop.eup %3384  ;;  %3410 = vpow2.f32 %v1953_v14  ;;  %v1691_v62 = vsub.f32 %v5770_v36, %v1644_v28  ;;  %v2016_v18 = vpack.c.bf16 %v3379_v5, %v3383_v50  ;;  %v3608_v2 = vld [vmem:[%s5637_s0 + $0x60] sm:$0xff]  ;;  %v3609_v14 = vld [vmem:[%s5637_s0 + $0x70] sm:$0xff]  ;;  %v4568_v45 = vpop.f32.mrf.mxu1 }
 0x345   :  { %v3387_v41 = vpop.eup %3386  ;;  %3412 = vpow2.f32 %v1947_v21  ;;  %v1726_v43 = vmul.f32 1.442695, %v1692_v49  ;;  %v1728_v39 = vmul.f32 1.442695, %v1693_v51  ;;  %v1641_v52 = vpack.c.bf16 %v3603_v37, %v3602_v48  ;;  %v3610_v8 = vld [vmem:[%s5637_s0 + $0x20] sm:$0xff]  ;;  %v4572_v60 = vpop.f32.mrf.mxu0 }
 0x346   :  { %v1722_v61 = vmul.f32 1.442695, %v1690_v34  ;;  %v3389_v11 = vpop.eup %3388  ;;  %3414 = vpow2.f32 %v1949_v0  ;;  %v1724_v55 = vmul.f32 1.442695, %v1691_v62  ;;  %2037 = vmatprep.subr.bf16.mxu1 %v2016_v18  ;;  %v1633_v42 = vpack.c.bf16 %v3605_v9, %v3604_v54  ;;  %v3611_v0 = vld [vmem:[%s5637_s0 + $0x30] sm:$0xff]  ;;  %v4570_v49 = vpop.f32.mrf.mxu1 }
 0x347   :  { %v3391_v17 = vpop.eup %3390  ;;  %3416 = vpow2.f32 %v1726_v43  ;;  %2038 = vmatpush1.bf16.xpose.msra.mxu1 %v2015_v35  ;;  %v1790_v30 = vpack.c.bf16 %v3385_v4, %v3389_v11  ;;  %v1636_v5 = vpack.c.bf16 %v3607_v47, %v3606_v10  ;;  %v1640_v21 = vpack.c.bf16 %v3609_v14, %v3608_v2  ;;  %v4576_v56 = vpop.f32.mrf.mxu0 }
 0x348   :  { %v3393_v38 = vpop.eup %3392  ;;  %3418 = vpow2.f32 %v1728_v39  ;;  %v1791_v31 = vpack.c.bf16 %v3387_v41, %v3391_v17  ;;  %v1635_v23 = vpack.c.bf16 %v3611_v0, %v3610_v8  ;;  %v3635_v28 = vmov 1.0|1.0   ;;  %v4574_v51 = vpop.f32.mrf.mxu1 }
 0x349   :  { %v3395_v26 = vpop.eup %3394  ;;  %3420 = vpow2.f32 %v1722_v61  ;;  %v5771_v50 = vmov 0   ;;  %v4580_v4 = vpop.f32.mrf.mxu0 }
 0x34a   :  { %v3397_v13 = vpop.eup %3396  ;;  %3422 = vpow2.f32 %v1724_v55  ;;  %1812 = vmatprep.subr.bf16.mxu0 %v1791_v31  ;;  %v4578_v34 = vpop.f32.mrf.mxu1 }
 0x34b   :  { %v3399_v25 = vpop.eup %3398  ;;  %1813 = vmatpush1.bf16.xpose.msra.mxu0 %v1790_v30  ;;  %v2013_v6 = vpack.c.bf16 %v3393_v38, %v3397_v13  ;;  %v4584_v62 = vpop.f32.mrf.mxu0 }
 0x34c   :  { %v3401_v59 = vpop.eup %3400  ;;  %v2014_v15 = vpack.c.bf16 %v3395_v26, %v3399_v25 }
 0x34d   :  { %v3403_v3 = vpop.eup %3402 }
 0x34e   :  { %v3405_v20 = vpop.eup %3404  ;;  %2039 = vmatprep.subr.bf16.mxu1 %v2014_v15 }
 0x34f   :  { %v3407_v27 = vpop.eup %3406  ;;  %2040 = vmatpush1.bf16.xpose.msra.mxu1 %v2013_v6  ;;  %v1788_v12 = vpack.c.bf16 %v3401_v59, %v3405_v20 }
 0x350   :  { %v3409_v22 = vpop.eup %3408  ;;  %v1789_v63 = vpack.c.bf16 %v3403_v3, %v3407_v27 }
 0x351   :  { %v3411_v44 = vpop.eup %3410 }
 0x352   :  { %v3413_v53 = vpop.eup %3412  ;;  %1814 = vmatprep.subr.bf16.mxu0 %v1789_v63  ;;  %v4582_v36 = vpop.f32.mrf.mxu1 }
 0x353   :  { %v3415_v33 = vpop.eup %3414  ;;  %1815 = vmatpush1.bf16.xpose.msra.mxu0 %v1788_v12  ;;  %v2011_v29 = vpack.c.bf16 %v3409_v22, %v3413_v53  ;;  %v4588_v35 = vpop.f32.mrf.mxu0 }
 0x354   :  { %v3417_v40 = vpop.eup %3416  ;;  %v2012_v24 = vpack.c.bf16 %v3411_v44, %v3415_v33  ;;  %v4586_v18 = vpop.f32.mrf.mxu1 }
 0x355   :  { %v3419_v58 = vpop.eup %3418  ;;  %v4592_v43 = vpop.f32.mrf.mxu0 }
 0x356   :  { %v3421_v7 = vpop.eup %3420  ;;  %2041 = vmatprep.subr.bf16.mxu1 %v2012_v24  ;;  %v4590_v41 = vpop.f32.mrf.mxu1 }
 0x357   :  { %v3423_v46 = vpop.eup %3422  ;;  %2042 = vmatpush1.bf16.xpose.msra.mxu1 %v2011_v29  ;;  %v1786_v19 = vpack.c.bf16 %v3417_v40, %v3421_v7  ;;  %v4596_v61 = vpop.f32.mrf.mxu0 }
 0x358   :  { %v1787_v16 = vpack.c.bf16 %v3419_v58, %v3423_v46  ;;  %v4594_v39 = vpop.f32.mrf.mxu1 }
 0x359   :  { %5772 = vst [vmem:[#allocation15_spill] sm:$0xff] %v4594_v39  ;;  %v4600_v55 = vpop.f32.mrf.mxu0 }
 0x35a   :  { %1816 = vmatprep.subr.bf16.mxu0 %v1787_v16  ;;  %v4598_v11 = vpop.f32.mrf.mxu1 }
 0x35b   :  { %1817 = vmatpush1.bf16.xpose.msra.mxu0 %v1786_v19  ;;  %v4604_v30 = vpop.f32.mrf.mxu0 }
 0x35c   :  { %v4602_v17 = vpop.f32.mrf.mxu1 }
 0x35d   :  { %5773 = vst [vmem:[#allocation16_spill] sm:$0xff] %v4602_v17  ;;  %v4608_v31 = vpop.f32.mrf.mxu0 }
 0x35e   :  { %2060 = vmatmul.mubr.bf16.vlgmr.msra.gmra.mxu1 %v1638_v1  ;;  %v4606_v38 = vpop.f32.mrf.mxu1 }
 0x35f   :  { %2067 = vmatprep.mubr.bf16.mxu1 %v1641_v52  ;;  %5774 = vst [vmem:[#allocation17_spill] sm:$0xff] %v4606_v38  ;;  %v4612_v13 = vpop.f32.mrf.mxu0 }
 0x360   :  { %v4610_v26 = vpop.f32.mrf.mxu1  ;;  %5776 = vst [vmem:[#allocation20_spill] sm:$0xff] %v4612_v13 }
 0x361   :  { %5775 = vst [vmem:[#allocation18_spill] sm:$0xff] %v4610_v26  ;;  %v4616_v6 = vpop.f32.mrf.mxu0 }
 0x362   :  { %1835 = vmatmul.mubr.bf16.vlgmr.msra.gmra.mxu0 %v1633_v42  ;;  %v4614_v25 = vpop.f32.mrf.mxu1  ;;  %5778 = vst [vmem:[#allocation14_spill] sm:$0xff] %v4616_v6 }
 0x363   :  { %1842 = vmatprep.mubr.bf16.mxu0 %v1636_v5  ;;  %5777 = vst [vmem:[#allocation19_spill] sm:$0xff] %v4614_v25  ;;  %v4620_v15 = vpop.f32.mrf.mxu0 }
 0x364   :  { %v4618_v59 = vpop.f32.mrf.mxu1  ;;  %5780 = vst [vmem:[#allocation13_spill] sm:$0xff] %v4620_v15 }
 0x365   :  { %5779 = vst [vmem:[#allocation22_spill] sm:$0xff] %v4618_v59  ;;  %v4624_v20 = vpop.f32.mrf.mxu0 }
 0x366   :  { %2068 = vmatmul.mubr.bf16.gmra.mxu1 %v1640_v21  ;;  %v4622_v3 = vpop.f32.mrf.mxu1  ;;  %5782 = vst [vmem:[#allocation8_spill] sm:$0xff] %v4624_v20 }
 0x367   :  { %2075 = vmatprep.mubr.bf16.mxu1 %v3635_v28  ;;  %5781 = vst [vmem:[#allocation21_spill] sm:$0xff] %v4622_v3  ;;  %v4628_v12 = vpop.f32.mrf.mxu0 }
 0x368   :  { %v4626_v27 = vpop.f32.mrf.mxu1  ;;  %5784 = vst [vmem:[#allocation5_spill] sm:$0xff] %v4628_v12 }
 0x369   :  { %5783 = vst [vmem:[#allocation10_spill] sm:$0xff] %v4626_v27  ;;  %v4632_v63 = vpop.f32.mrf.mxu0 }
 0x36a   :  { %1843 = vmatmul.mubr.bf16.gmra.mxu0 %v1635_v23  ;;  %5786 = vst [vmem:[#allocation11_spill] sm:$0xff] %v4632_v63 }
 0x36b   :  { %1850 = vmatprep.mubr.bf16.mxu0 %v3635_v28 }
 0x36c   :  { %v4630_v22 = vpop.f32.mrf.mxu1  ;;  %v4636_v53 = vpop.f32.mrf.mxu0 }
 0x36d   :  { %5785 = vst [vmem:[#allocation6_spill] sm:$0xff] %v4630_v22  ;;  %5788 = vst [vmem:[#allocation7_spill] sm:$0xff] %v4636_v53 }
 0x36e   :  { %2076 = vmatmul.mubr.bf16.gmra.mxu1 %v3635_v28  ;;  %v4634_v44 = vpop.f32.mrf.mxu1  ;;  %v4640_v29 = vpop.f32.mrf.mxu0 }
 0x36f   :  { %5787 = vst [vmem:[#allocation12_spill] sm:$0xff] %v4634_v44  ;;  %5790 = vst [vmem:[#allocation23_spill] sm:$0xff] %v4640_v29 }
 0x370   :  { %v4638_v33 = vpop.f32.mrf.mxu1  ;;  %v4644_v24 = vpop.f32.mrf.mxu0 }
 0x371   :  { %5789 = vst [vmem:[#allocation9_spill] sm:$0xff] %v4638_v33  ;;  %5792 = vst [vmem:[#allocation25_spill] sm:$0xff] %v4644_v24 }
 0x372   :  { %1851 = vmatmul.mubr.bf16.gmra.mxu0 %v3635_v28  ;;  %v4642_v40 = vpop.f32.mrf.mxu1  ;;  %v4648_v7 = vpop.f32.mrf.mxu0 }
 0x373   :  { %2400 = vmatprep.mubr.bf16.mxu0 %v5771_v50  ;;  %5791 = vst [vmem:[#allocation24_spill] sm:$0xff] %v4642_v40  ;;  %5794 = vst [vmem:[#allocation27_spill] sm:$0xff] %v4648_v7  ;;  %v1859_v40 = vlaneseq }
 0x376   :  { %v4646_v58 = vpop.f32.mrf.mxu1  ;;  %v4652_v19 = vpop.f32.mrf.mxu0 }
 0x377   :  { %5793 = vst [vmem:[#allocation26_spill] sm:$0xff] %v4646_v58  ;;  %5796 = vst [vmem:[#allocation29_spill] sm:$0xff] %v4652_v19 }
 0x378   :  { %v4650_v46 = vpop.f32.mrf.mxu1  ;;  %v4656_v57 = vpop.f32.mrf.mxu0 }
 0x379   :  { %5795 = vst [vmem:[#allocation28_spill] sm:$0xff] %v4650_v46  ;;  %5798 = vst [vmem:[#allocation31_spill] sm:$0xff] %v4656_v57 }
 0x37a   :  { %v4654_v16 = vpop.f32.mrf.mxu1  ;;  %v4660_v1 = vpop.f32.mrf.mxu0 }
 0x37b   :  { %5797 = vst [vmem:[#allocation30_spill] sm:$0xff] %v4654_v16  ;;  %5800 = vst [vmem:[#allocation33_spill] sm:$0xff] %v4660_v1 }
 0x37c   :  { %v4658_v32 = vpop.f32.mrf.mxu1  ;;  %v4664_v37 = vpop.f32.mrf.mxu0 }
 0x37d   :  { %5799 = vst [vmem:[#allocation32_spill] sm:$0xff] %v4658_v32  ;;  %5802 = vst [vmem:[#allocation35_spill] sm:$0xff] %v4664_v37 }
 0x37e   :  { %v4662_v48 = vpop.f32.mrf.mxu1  ;;  %v4668_v54 = vpop.f32.mrf.mxu0 }
 0x37f   :  { %5801 = vst [vmem:[#allocation34_spill] sm:$0xff] %v4662_v48  ;;  %5804 = vst [vmem:[#allocation37_spill] sm:$0xff] %v4668_v54 }
 0x380   :  { %v4666_v52 = vpop.f32.mrf.mxu1  ;;  %v4672_v42 = vpop.f32.mrf.mxu0 }
 0x381   :  { %5803 = vst [vmem:[#allocation36_spill] sm:$0xff] %v4666_v52  ;;  %5806 = vst [vmem:[#allocation39_spill] sm:$0xff] %v4672_v42 }
 0x382   :  { %v4670_v9 = vpop.f32.mrf.mxu1  ;;  %v4676_v47 = vpop.f32.mrf.mxu0 }
 0x383   :  { %5805 = vst [vmem:[#allocation38_spill] sm:$0xff] %v4670_v9  ;;  %5808 = vst [vmem:[#allocation41_spill] sm:$0xff] %v4676_v47 }
 0x384   :  { %v4674_v10 = vpop.f32.mrf.mxu1  ;;  %v4680_v2 = vpop.f32.mrf.mxu0 }
 0x385   :  { %5807 = vst [vmem:[#allocation40_spill] sm:$0xff] %v4674_v10  ;;  %5810 = vst [vmem:[#allocation43_spill] sm:$0xff] %v4680_v2 }
 0x386   :  { %v4678_v5 = vpop.f32.mrf.mxu1  ;;  %v4684_v21 = vpop.f32.mrf.mxu0 }
 0x387   :  { %5809 = vst [vmem:[#allocation42_spill] sm:$0xff] %v4678_v5  ;;  %5812 = vst [vmem:[#allocation45_spill] sm:$0xff] %v4684_v21 }
 0x388   :  { %v4682_v14 = vpop.f32.mrf.mxu1  ;;  %v4688_v0 = vpop.f32.mrf.mxu0 }
 0x389   :  { %5811 = vst [vmem:[#allocation44_spill] sm:$0xff] %v4682_v14  ;;  %5814 = vst [vmem:[#allocation47_spill] sm:$0xff] %v4688_v0 }
 0x38a   :  { %v4686_v8 = vpop.f32.mrf.mxu1  ;;  %v4692_v28 = vpop.f32.mrf.mxu0 }
 0x38b   :  { %5813 = vst [vmem:[#allocation46_spill] sm:$0xff] %v4686_v8  ;;  %5816 = vst [vmem:[#allocation49_spill] sm:$0xff] %v4692_v28 }
 0x38c   :  { %v4690_v23 = vpop.f32.mrf.mxu1  ;;  %v4694_v10 = vpop.f32.mrf.mxu0 }
 0x38d   :  { %5815 = vst [vmem:[#allocation48_spill] sm:$0xff] %v4690_v23  ;;  %5817 = vst [vmem:[#allocation50_spill] sm:$0xff] %v4694_v10 }
 0x41e   :  { %v2061_v9 = vpop.f32.mrf.mxu1 }
 0x420   :  { %v2063_v47 = vpop.f32.mrf.mxu1 }
 0x422   :  { %v1836_v32 = vpop.f32.mrf.mxu0  ;;  %v2064_v5 = vpop.f32.mrf.mxu1 }
 0x424   :  { %v1838_v52 = vpop.f32.mrf.mxu0  ;;  %v2066_v2 = vpop.f32.mrf.mxu1 }
 0x425   :  { %v1860_v2 = vshrl.u32 %v1859_v40, 7 }
 0x426   :  { %v1839_v48 = vpop.f32.mrf.mxu0  ;;  %v2069_v14 = vpop.f32.mrf.mxu1 }
 0x428   :  { %v1841_v42 = vpop.f32.mrf.mxu0  ;;  %v2071_v21 = vpop.f32.mrf.mxu1 }
 0x429   :  { %v1861_v42 = vsub.s32 0, %v1860_v2 }
 0x42a   :  { %v1844_v54 = vpop.f32.mrf.mxu0  ;;  %v2072_v8 = vpop.f32.mrf.mxu1 }
 0x42c   :  { %v1846_v16 = vpop.f32.mrf.mxu0  ;;  %v2074_v0 = vpop.f32.mrf.mxu1 }
 0x42e   :  { %v1847_v37 = vpop.f32.mrf.mxu0  ;;  %v2077_v23 = vpop.f32.mrf.mxu1 }
 0x42f   :  { %3424 = vrcp.f32 %v2077_v23 }
 0x430   :  { %v1849_v28 = vpop.f32.mrf.mxu0  ;;  %v2079_v1 = vpop.f32.mrf.mxu1 }
 0x432   :  { %v1852_v10 = vpop.f32.mrf.mxu0  ;;  %v2080_v47 = vpop.f32.mrf.mxu1 }
 0x433   :  { %3426 = vrcp.f32 %v1852_v10 }
 0x434   :  { %v1854_v46 = vpop.f32.mrf.mxu0  ;;  %v2081_v52 = vpop.f32.mrf.mxu1 }
 0x436   :  { %v1855_v58 = vpop.f32.mrf.mxu0 }
 0x438   :  { %v1856_v57 = vpop.f32.mrf.mxu0 }
 0x43c   :  { %v3425_v21 = vpop.eup %3424 }
 0x43d   :  { %v2087_v19 = vrot.slane %v3425_v21, %v1861_v42 }
 0x43f   :  { %v4696_v33 = vmul.f32 %v2087_v19, %v2072_v8  ;;  %v4698_v16 = vmul.f32 %v2087_v19, %v2069_v14  ;;  %v4708_v40 = vmul.f32 %v2087_v19, %v2064_v5  ;;  %v4710_v58 = vmul.f32 %v2087_v19, %v2061_v9 }
 0x440   :  { %v3427_v0 = vpop.eup %3426 }
 0x441   :  { %5818 = vst [vmem:[#allocation51_spill] sm:$0xff] %v4696_v33  ;;  %5819 = vst [vmem:[#allocation52_spill] sm:$0xff] %v4698_v16  ;;  %v1862_v23 = vrot.slane %v3427_v0, %v1861_v42  ;;  %2106 = vadd.xlane.f32.xlu1 %v4696_v33  ;;  %2104 = vadd.xlane.f32.xlu0 %v4698_v16  ;;  %v2120_v9 = vmul.f32 %v4710_v58, %v4710_v58 }
 0x442   :  { %5822 = vst [vmem:[#allocation55_spill] sm:$0xff] %v4708_v40  ;;  %5823 = vst [vmem:[#allocation56_spill] sm:$0xff] %v4710_v58 }
 0x443   :  { %v4702_v1 = vmul.f32 %v1862_v23, %v1847_v37  ;;  %v4704_v46 = vmul.f32 %v1862_v23, %v1844_v54  ;;  %v4714_v57 = vmul.f32 %v1862_v23, %v1839_v48  ;;  %v4716_v10 = vmul.f32 %v1862_v23, %v1836_v32 }
 0x444   :  { %v2123_v37 = vmul.f32 %v4696_v33, %v4696_v33  ;;  %v2122_v54 = vmul.f32 %v4698_v16, %v4698_v16  ;;  %v2121_v32 = vmul.f32 %v4708_v40, %v4708_v40 }
 0x445   :  { %5820 = vst [vmem:[#allocation53_spill] sm:$0xff] %v4702_v1  ;;  %5821 = vst [vmem:[#allocation54_spill] sm:$0xff] %v4704_v46  ;;  %2098 = vadd.xlane.f32.xlu1 %v4702_v1  ;;  %2096 = vadd.xlane.f32.xlu0 %v4704_v46  ;;  %v2119_v19 = vmul.f32 %v4702_v1, %v4702_v1  ;;  %v2118_v48 = vmul.f32 %v4704_v46, %v4704_v46 }
 0x446   :  { %5824 = vst [vmem:[#allocation57_spill] sm:$0xff] %v4714_v57  ;;  %5825 = vst [vmem:[#allocation58_spill] sm:$0xff] %v4716_v10  ;;  %v2117_v5 = vmul.f32 %v4714_v57, %v4714_v57  ;;  %v2116_v14 = vmul.f32 %v4716_v10, %v4716_v10 }
 0x449   :  { %2102 = vadd.xlane.f32.xlu1 %v4708_v40  ;;  %2100 = vadd.xlane.f32.xlu0 %v4710_v58 }
 0x44d   :  { %2094 = vadd.xlane.f32.xlu1 %v4714_v57  ;;  %2092 = vadd.xlane.f32.xlu0 %v4716_v10 }
 0x451   :  { %2138 = vadd.xlane.f32.xlu1 %v2123_v37  ;;  %2136 = vadd.xlane.f32.xlu0 %v2122_v54 }
 0x455   :  { %2130 = vadd.xlane.f32.xlu1 %v2119_v19  ;;  %2128 = vadd.xlane.f32.xlu0 %v2118_v48 }
 0x459   :  { %2134 = vadd.xlane.f32.xlu1 %v2121_v32  ;;  %2132 = vadd.xlane.f32.xlu0 %v2120_v9 }
 0x45d   :  { %2126 = vadd.xlane.f32.xlu1 %v2117_v5  ;;  %2124 = vadd.xlane.f32.xlu0 %v2116_v14 }
 0x4ca   :  { %v2107_v8 = vpop.xlane.xlu1 %2106  ;;  %v2105_v28 = vpop.xlane.xlu0 %2104 }
 0x4cb   :  { %v4736_v23 = vmul.f32 0.0078125, %v2107_v8  ;;  %v4738_v37 = vmul.f32 0.0078125, %v2105_v28 }
 0x4cd   :  { %v2155_v9 = vmul.f32 %v4736_v23, %v4736_v23  ;;  %v2154_v5 = vmul.f32 %v4738_v37, %v4738_v37 }
 0x4ce   :  { %v2099_v47 = vpop.xlane.xlu1 %2098  ;;  %v2097_v52 = vpop.xlane.xlu0 %2096 }
 0x4cf   :  { %v4740_v54 = vmul.f32 0.0078125, %v2099_v47  ;;  %v4742_v19 = vmul.f32 0.0078125, %v2097_v52 }
 0x4d1   :  { %v2151_v28 = vmul.f32 %v4740_v54, %v4740_v54  ;;  %v2150_v47 = vmul.f32 %v4742_v19, %v4742_v19 }
 0x4d2   :  { %v2103_v2 = vpop.xlane.xlu1 %2102  ;;  %v2101_v42 = vpop.xlane.xlu0 %2100 }
 0x4d3   :  { %v4748_v24 = vmul.f32 0.0078125, %v2103_v2  ;;  %v4754_v52 = vmul.f32 0.0078125, %v2101_v42 }
 0x4d5   :  { %v2153_v2 = vmul.f32 %v4748_v24, %v4748_v24 }
 0x4d6   :  { %v2095_v21 = vpop.xlane.xlu1 %2094  ;;  %v2093_v0 = vpop.xlane.xlu0 %2092 }
 0x4da   :  { %v2139_v48 = vpop.xlane.xlu1 %2138  ;;  %v2137_v32 = vpop.xlane.xlu0 %2136 }
 0x4db   :  { %v2147_v14 = vmul.f32 0.0078125, %v2139_v48  ;;  %v2146_v7 = vmul.f32 0.0078125, %v2137_v32  ;;  %v2152_v32 = vmul.f32 %v4754_v52, %v4754_v52 }
 0x4dd   :  { %v2163_v8 = vsub.f32 %v2147_v14, %v2155_v9  ;;  %v2162_v27 = vsub.f32 %v2146_v7, %v2154_v5  ;;  %v4760_v9 = vmul.f32 0.0078125, %v2095_v21  ;;  %v4762_v5 = vmul.f32 0.0078125, %v2093_v0 }
 0x4de   :  { %v2131_v44 = vpop.xlane.xlu1 %2130  ;;  %v2129_v22 = vpop.xlane.xlu0 %2128 }
 0x4df   :  { %v2171_v29 = vadd.f32 0.001, %v2163_v8  ;;  %v2170_v53 = vadd.f32 0.001, %v2162_v27  ;;  %v2143_v3 = vmul.f32 0.0078125, %v2131_v44  ;;  %v2142_v63 = vmul.f32 0.0078125, %v2129_v22 }
 0x4e1   :  { %3428 = vrsqrt.f32 %v2171_v29  ;;  %v2159_v48 = vsub.f32 %v2143_v3, %v2151_v28  ;;  %v2158_v7 = vsub.f32 %v2142_v63, %v2150_v47  ;;  %v2149_v3 = vmul.f32 %v4760_v9, %v4760_v9 }
 0x4e2   :  { %3430 = vrsqrt.f32 %v2170_v53  ;;  %v2135_v42 = vpop.xlane.xlu1 %2134  ;;  %v2133_v14 = vpop.xlane.xlu0 %2132  ;;  %v2148_v63 = vmul.f32 %v4762_v5, %v4762_v5 }
 0x4e3   :  { %v2167_v8 = vadd.f32 0.001, %v2159_v48  ;;  %v2166_v27 = vadd.f32 0.001, %v2158_v7  ;;  %v2145_v44 = vmul.f32 0.0078125, %v2135_v42  ;;  %v2144_v22 = vmul.f32 0.0078125, %v2133_v14 }
 0x4e4   :  { %v3166_v14 = vld [vmem:[%s5638_s1 + $0x50] sm:$0xff] }
 0x4e5   :  { %3432 = vrsqrt.f32 %v2167_v8  ;;  %v2161_v12 = vsub.f32 %v2145_v44, %v2153_v2  ;;  %v2160_v26 = vsub.f32 %v2144_v22, %v2152_v32  ;;  %v3167_v32 = vld [vmem:[%s5638_s1 + $0x58] sm:$0xff] }
 0x4e6   :  { %3434 = vrsqrt.f32 %v2166_v27  ;;  %v2127_v29 = vpop.xlane.xlu1 %2126  ;;  %v2125_v21 = vpop.xlane.xlu0 %2124 }
 0x4e7   :  { %v2169_v0 = vadd.f32 0.001, %v2161_v12  ;;  %v2168_v53 = vadd.f32 0.001, %v2160_v26  ;;  %v2141_v28 = vmul.f32 0.0078125, %v2127_v29  ;;  %v2140_v47 = vmul.f32 0.0078125, %v2125_v21 }
 0x4e8   :  { %v3165_v29 = vld [vmem:[%s5638_s1 + $0x48] sm:$0xff]  ;;  %v3164_v21 = vld [vmem:[%s5638_s1 + $0x40] sm:$0xff] }
 0x4e9   :  { %3436 = vrsqrt.f32 %v2169_v0  ;;  %v2157_v48 = vsub.f32 %v2141_v28, %v2149_v3  ;;  %v2156_v7 = vsub.f32 %v2140_v47, %v2148_v63 }
 0x4ea   :  { %3438 = vrsqrt.f32 %v2168_v53 }
 0x4eb   :  { %v2165_v42 = vadd.f32 0.001, %v2157_v48  ;;  %v2164_v2 = vadd.f32 0.001, %v2156_v7 }
 0x4ed   :  { %3440 = vrsqrt.f32 %v2165_v42 }
 0x4ee   :  { %v3429_v8 = vpop.eup %3428  ;;  %3442 = vrsqrt.f32 %v2164_v2 }
 0x4ef   :  { %v3431_v26 = vpop.eup %3430  ;;  %v2197_v12 = vmul.f32 %v3429_v8, %v3167_v32  ;;  %v3171_v8 = vld [vmem:[%s5638_s1 + $0x78] sm:$0xff] }
 0x4f0   :  { %v2196_v27 = vmul.f32 %v3431_v26, %v3166_v14  ;;  %v3170_v26 = vld [vmem:[%s5638_s1 + $0x70] sm:$0xff] }
 0x4f1   :  { %2251 = vperm.xlu1 %3251, %v2197_v12  }
 0x4f2   :  { %v3433_v44 = vpop.eup %3432  ;;  %2246 = vperm.xlu0 %3250, %v2196_v27  }
 0x4f3   :  { %v3435_v22 = vpop.eup %3434  ;;  %v2193_v3 = vmul.f32 %v3433_v44, %v3167_v32  ;;  %v2205_v32 = vmul.f32 %v2197_v12, %v4736_v23 }
 0x4f4   :  { %v2192_v63 = vmul.f32 %v3435_v22, %v3166_v14  ;;  %v2204_v14 = vmul.f32 %v2196_v27, %v4738_v37 }
 0x4f5   :  { %v2213_v44 = vsub.f32 %v3171_v8, %v2205_v32 }
 0x4f6   :  { %v3437_v0 = vpop.eup %3436  ;;  %2231 = vperm.xlu0 %3250, %v2193_v3   ;;  %2226 = vperm.xlu1 %3251, %v2192_v63   ;;  %v2212_v22 = vsub.f32 %v3170_v26, %v2204_v14 }
 0x4f7   :  { %v3439_v53 = vpop.eup %3438  ;;  %v2195_v28 = vmul.f32 %v3437_v0, %v3165_v29  ;;  %v2201_v0 = vmul.f32 %v2193_v3, %v4740_v54 }
 0x4f8   :  { %v2194_v47 = vmul.f32 %v3439_v53, %v3164_v21  ;;  %v3168_v53 = vld [vmem:[%s5638_s1 + $0x60] sm:$0xff] }
 0x4f9   :  { %v2209_v23 = vsub.f32 %v3171_v8, %v2201_v0  ;;  %v2203_v12 = vmul.f32 %v2195_v28, %v4748_v24 }
 0x4fa   :  { %v3441_v48 = vpop.eup %3440  ;;  %2241 = vperm.xlu0 %3250, %v2195_v28   ;;  %2236 = vperm.xlu1 %3251, %v2194_v47   ;;  %v2202_v27 = vmul.f32 %v2194_v47, %v4754_v52  ;;  %v3173_v28 = vld [vmem:[%s5638_s1 + $0x88] sm:$0xff]  ;;  %v3172_v47 = vld [vmem:[%s5638_s1 + $0x80] sm:$0xff] }
 0x4fb   :  { %v3443_v7 = vpop.eup %3442  ;;  %v2191_v42 = vmul.f32 %v3441_v48, %v3165_v29  ;;  %v2200_v29 = vmul.f32 %v2192_v63, %v4742_v19  ;;  %v3270_v48 = vld [vmem:[%s5643_s6 + $0x38] sm:$0xff]  }
 0x4fc   :  { %v2190_v2 = vmul.f32 %v3443_v7, %v3164_v21  ;;  %v3169_v21 = vld [vmem:[%s5638_s1 + $0x68] sm:$0xff]  ;;  %v2210_v19 = vsub.f32 %v3168_v53, %v2202_v27  ;;  %v3271_v7 = vld [vmem:[%s5643_s6 + $0x30] sm:$0xff]   ;;  %3221 = vmatprep.subr.bf16.mxu1 %v3270_v48 }
 0x4fd   :  { %v2208_v37 = vsub.f32 %v3170_v26, %v2200_v29  ;;  %v2211_v54 = vsub.f32 %v3169_v21, %v2203_v12  ;;  %v2199_v3 = vmul.f32 %v2191_v42, %v4760_v9  ;;  %v3175_v9 = vld [vmem:[%s5638_s1 + $0x98] sm:$0xff]  ;;  %3222 = vmatpush3.bf16.msra.mxu1 %v3270_v48 }
 0x4fe   :  { %2221 = vperm.xlu0 %3250, %v2191_v42   ;;  %2216 = vperm.xlu1 %3251, %v2190_v2   ;;  %v2198_v63 = vmul.f32 %v2190_v2, %v4762_v5  ;;  %v3174_v5 = vld [vmem:[%s5638_s1 + $0x90] sm:$0xff]  ;;  %v3272_v42 = vld [vmem:[%s5643_s6 + $0x28] sm:$0xff]  }
 0x4ff   :  { %v2207_v24 = vsub.f32 %v3169_v21, %v2199_v3  ;;  %3223 = vmatprep.subr.bf16.mxu1 %v3271_v7 }
 0x500   :  { %v2206_v52 = vsub.f32 %v3168_v53, %v2198_v63 }
 0x501   :  { %3224 = vmatpush3.bf16.msra.mxu1 %v3271_v7 }
 0x502   :  { %2299 = vperm.xlu0 %3250, %v2213_v44   ;;  %2294 = vperm.xlu1 %3251, %v2212_v22  }
 0x503   :  { %3225 = vmatprep.subr.bf16.mxu1 %v3272_v42 }
 0x505   :  { %3226 = vmatpush3.bf16.msra.mxu1 %v3272_v42 }
 0x506   :  { %2279 = vperm.xlu0 %3250, %v2209_v23   ;;  %2274 = vperm.xlu1 %3251, %v2208_v37  }
 0x50a   :  { %2289 = vperm.xlu0 %3250, %v2211_v54   ;;  %2284 = vperm.xlu1 %3251, %v2210_v19  }
 0x50e   :  { %2269 = vperm.xlu0 %3250, %v2207_v24   ;;  %2264 = vperm.xlu1 %3251, %v2206_v52  }
 0x512   :  { %2338 = vperm.xlu0 %3250, %v3173_v28   ;;  %2333 = vperm.xlu1 %3251, %v3172_v47  }
 0x516   :  { %2348 = vperm.xlu0 %3250, %v3175_v9   ;;  %2343 = vperm.xlu1 %3251, %v3174_v5  }
 0x56c   :  { %v2252_v2 = vpop.permute.xlu1 %2251 }
 0x56d   :  { %v2247_v32 = vpop.permute.xlu0 %2246  ;;  %v2261_v29 = vmul.f32 %v2252_v2, %v4696_v33 }
 0x56e   :  { %v2260_v23 = vmul.f32 %v2247_v32, %v4698_v16 }
 0x571   :  { %v2227_v14 = vpop.permute.xlu1 %2226  ;;  %v2232_v8 = vpop.permute.xlu0 %2231 }
 0x572   :  { %v2256_v53 = vmul.f32 %v2227_v14, %v4704_v46  ;;  %v2257_v54 = vmul.f32 %v2232_v8, %v4702_v1 }
 0x575   :  { %v2237_v26 = vpop.permute.xlu1 %2236  ;;  %v2242_v44 = vpop.permute.xlu0 %2241 }
 0x576   :  { %v2258_v9 = vmul.f32 %v2237_v26, %v4710_v58  ;;  %v2259_v5 = vmul.f32 %v2242_v44, %v4708_v40 }
 0x579   :  { %v2217_v22 = vpop.permute.xlu1 %2216  ;;  %v2222_v0 = vpop.permute.xlu0 %2221 }
 0x57a   :  { %v2254_v8 = vmul.f32 %v2217_v22, %v4716_v10  ;;  %v3269_v22 = vld [vmem:[%s5642_s5 + $0x8] sm:$0xff]  }
 0x57d   :  { %v2295_v37 = vpop.permute.xlu1 %2294  ;;  %v2300_v12 = vpop.permute.xlu0 %2299 }
 0x57e   :  { %v2308_v27 = vadd.f32 %v2295_v37, %v2260_v23  ;;  %v2309_v21 = vadd.f32 %v2300_v12, %v2261_v29  ;;  %v2255_v23 = vmul.f32 %v2222_v0, %v4714_v57  ;;  %v3273_v0 = vld [vmem:[%s5643_s6 + $0x20] sm:$0xff]  }
 0x57f   :  { %3227 = vmatprep.subr.bf16.mxu1 %v3273_v0 }
 0x580   :  { %v2316_v19 = vmax.f32 %v2308_v27, 0.0  ;;  %v2317_v3 = vmax.f32 %v2309_v21, 0.0  ;;  %3228 = vmatpush3.bf16.msra.mxu1 %v3273_v0 }
 0x581   :  { %v2275_v63 = vpop.permute.xlu1 %2274  ;;  %v2280_v24 = vpop.permute.xlu0 %2279 }
 0x582   :  { %v2325_v52 = vpack.c.bf16 %v2317_v3, %v2316_v19  ;;  %v2304_v28 = vadd.f32 %v2275_v63, %v2256_v53  ;;  %v2305_v47 = vadd.f32 %v2280_v24, %v2257_v54  ;;  %v3268_v63 = vld [vmem:[%s5642_s5] sm:$0xff]   ;;  %v3274_v24 = vld [vmem:[%s5643_s6 + $0x18] sm:$0xff]  }
 0x583   :  { %3229 = vmatprep.subr.bf16.mxu1 %v3274_v24 }
 0x584   :  { %v2312_v48 = vmax.f32 %v2304_v28, 0.0  ;;  %v2313_v7 = vmax.f32 %v2305_v47, 0.0  ;;  %2380 = vmatprep.subr.bf16.mxu0 %v2325_v52  ;;  %3230 = vmatpush3.bf16.msra.mxu1 %v3274_v24  ;;  %v3275_v52 = vld [vmem:[%s5643_s6 + $0x10] sm:$0xff]   ;;  %v3276_v28 = vld [vmem:[%s5643_s6 + $0x8] sm:$0xff]   ;;  %v3277_v47 = vld [vmem:[%s5643_s6] sm:$0xff]  }
 0x585   :  { %v2285_v42 = vpop.permute.xlu1 %2284  ;;  %v2290_v2 = vpop.permute.xlu0 %2289  ;;  %3231 = vmatprep.subr.bf16.mxu1 %v3275_v52 }
 0x586   :  { %v2324_v32 = vpack.c.bf16 %v2313_v7, %v2312_v48  ;;  %v2306_v14 = vadd.f32 %v2285_v42, %v2258_v9  ;;  %v2307_v29 = vadd.f32 %v2290_v2, %v2259_v5  ;;  %v3180_v7 = vld [vmem:[%s5639_s2] ss:$0 sm:$0xff] }
 0x588   :  { %v2314_v37 = vmax.f32 %v2306_v14, 0.0  ;;  %v2315_v12 = vmax.f32 %v2307_v29, 0.0  ;;  %2381 = vmatpush1.bf16.msra.mxu0 %v2324_v32  ;;  %3232 = vmatpush3.bf16.msra.mxu1 %v3275_v52  ;;  %v3182_v29 = vld [vmem:[%s5639_s2 + $0x1] ss:$0 sm:$0xff] }
 0x589   :  { %v2265_v27 = vpop.permute.xlu1 %2264  ;;  %v2270_v21 = vpop.permute.xlu0 %2269  ;;  %3233 = vmatprep.subr.bf16.mxu1 %v3276_v28 }
 0x58a   :  { %v2323_v26 = vpack.c.bf16 %v2315_v12, %v2314_v37  ;;  %v2302_v53 = vadd.f32 %v2265_v27, %v2254_v8  ;;  %v2303_v44 = vadd.f32 %v2270_v21, %v2255_v23 }
 0x58c   :  { %v2310_v54 = vmax.f32 %v2302_v53, 0.0  ;;  %v2311_v19 = vmax.f32 %v2303_v44, 0.0  ;;  %2382 = vmatprep.subr.bf16.mxu0 %v2323_v26  ;;  %3234 = vmatpush3.bf16.msra.mxu1 %v3276_v28 }
 0x58d   :  { %3235 = vmatprep.subr.bf16.mxu1 %v3277_v47  ;;  %v2334_v9 = vpop.permute.xlu1 %2333  ;;  %v2339_v2 = vpop.permute.xlu0 %2338 }
 0x58e   :  { %v2322_v3 = vpack.c.bf16 %v2311_v19, %v2310_v54 }
 0x590   :  { %2383 = vmatpush1.bf16.msra.mxu0 %v2322_v3  ;;  %3236 = vmatpush3.bf16.msra.mxu1 %v3277_v47 }
 0x591   :  { %v2344_v27 = vpop.permute.xlu1 %2343  ;;  %v2349_v0 = vpop.permute.xlu0 %2348 }
 0x593   :  { %3178 = vmatmul.mubr.msk.bf16.vlgmr.msra.gmra.mxu0 %vm2361_vm1, %v3268_v63 }
 0x594   :  { %2410 = vmatprep.mubr.bf16.mxu0 %v5771_v50 }
 0x59b   :  { %3179 = vmatmul.mubr.msk.bf16.gmra.mxu0 %vm2361_vm1, %v3269_v22 }
 0x59c   :  { %2916 = vmatprep.mubr.bf16.mxu0 %v5771_v50 }
 0x653   :  { %v2402_v5 = vpop.f32.mrf.mxu0 }
 0x654   :  { %v4854_v48 = vadd.f32 %v2402_v5, %v2334_v9 }
 0x655   :  { %v2404_v42 = vpop.f32.mrf.mxu0 }
 0x656   :  { %v2428_v32 = vmul.f32 %v3180_v7, %v4854_v48  ;;  %v4868_v26 = vadd.f32 %v2404_v42, %v2334_v9 }
 0x657   :  { %v2406_v14 = vpop.f32.mrf.mxu0 }
 0x658   :  { %v4863_v8 = vadd.f32 %v2406_v14, %v2339_v2  ;;  %v2444_v21 = vadd.f32 %v3182_v29, %v2428_v32  ;;  %v2432_v52 = vmul.f32 %v3180_v7, %v4868_v26 }
 0x659   :  { %v2408_v23 = vpop.f32.mrf.mxu0 }
 0x65a   :  { %v2429_v37 = vmul.f32 %v3180_v7, %v4863_v8  ;;  %v4866_v12 = vadd.f32 %v2408_v23, %v2339_v2  ;;  %v2452_v24 = vmax.f32 %v2444_v21, 0.0 }
 0x65b   :  { %v2412_v53 = vpop.f32.mrf.mxu0 }
 0x65c   :  { %v2445_v44 = vadd.f32 %v3182_v29, %v2429_v37  ;;  %v2413_v54 = vadd.f32 %v2412_v53, %v2344_v27  ;;  %v2433_v19 = vmul.f32 %v3180_v7, %v4866_v12  ;;  %v2448_v37 = vadd.f32 %v3182_v29, %v2432_v52 }
 0x65d   :  { %v2414_v3 = vpop.f32.mrf.mxu0 }
 0x65e   :  { %v2453_v63 = vmax.f32 %v2445_v44, 0.0  ;;  %v2430_v22 = vmul.f32 %v3180_v7, %v2413_v54  ;;  %v2449_v5 = vadd.f32 %v3182_v29, %v2433_v19  ;;  %v2415_v9 = vadd.f32 %v2414_v3, %v2344_v27  ;;  %v3184_v3 = vld [vmem:[%s5639_s2 + $0x2] ss:$0 sm:$0xff] }
 0x65f   :  { %v2416_v28 = vpop.f32.mrf.mxu0  ;;  %v2456_v21 = vmax.f32 %v2448_v37, 0.0 }
 0x660   :  { %v2417_v47 = vadd.f32 %v2416_v28, %v2349_v0  ;;  %v2460_v14 = vpack.c.bf16 %v2453_v63, %v2452_v24  ;;  %v2446_v32 = vadd.f32 %v3182_v29, %v2430_v22  ;;  %v2457_v16 = vmax.f32 %v2449_v5, 0.0 }
 0x661   :  { %v2418_v2 = vpop.f32.mrf.mxu0  ;;  %v2434_v1 = vmul.f32 %v3180_v7, %v2415_v9 }
 0x662   :  { %v2431_v42 = vmul.f32 %v3180_v7, %v2417_v47  ;;  %v2419_v23 = vadd.f32 %v2418_v2, %v2349_v0  ;;  %3237 = vmatprep.mubr.bf16.mxu1 %v2460_v14  ;;  %v2454_v44 = vmax.f32 %v2446_v32, 0.0  ;;  %v2462_v57 = vpack.c.bf16 %v2457_v16, %v2456_v21 }
 0x663   :  { %v2450_v28 = vadd.f32 %v3182_v29, %v2434_v1 }
 0x664   :  { %v2447_v53 = vadd.f32 %v3182_v29, %v2431_v42  ;;  %v2435_v33 = vmul.f32 %v3180_v7, %v2419_v23 }
 0x665   :  { %v2458_v63 = vmax.f32 %v2450_v28, 0.0 }
 0x666   :  { %v2455_v46 = vmax.f32 %v2447_v53, 0.0  ;;  %v2451_v58 = vadd.f32 %v3182_v29, %v2435_v33 }
 0x668   :  { %v2461_v40 = vpack.c.bf16 %v2455_v46, %v2454_v44  ;;  %v2459_v19 = vmax.f32 %v2451_v58, 0.0 }
 0x66a   :  { %3238 = vmatmul.mubr.bf16.vlgmr.msra.gmra.mxu1 %v2461_v40  ;;  %v2463_v27 = vpack.c.bf16 %v2459_v19, %v2458_v63 }
 0x66b   :  { %3241 = vmatprep.mubr.bf16.mxu1 %v2462_v57 }
 0x672   :  { %3242 = vmatmul.mubr.bf16.gmra.mxu1 %v2463_v27 }
 0x673   :  { %2981 = vmatprep.mubr.bf16.mxu1 %v5771_v50 }
 0x72a   :  { %v3239_v22 = vpop.f32.mrf.mxu1 }
 0x72b   :  { %v2579_v7 = vadd.f32 %v3239_v22, %v3184_v3 }
 0x72c   :  { %v2570_v0 = vpop.f32.mrf.mxu1 }
 0x72d   :  { %v4876_v24 = vadd.f32 %v2579_v7, %v2413_v54  ;;  %v2571_v46 = vadd.f32 %v3184_v3, %v2570_v0 }
 0x72e   :  { %v3240_v33 = vpop.f32.mrf.mxu1 }
 0x72f   :  { %v2582_v16 = vadd.f32 %v3240_v33, %v3184_v3  ;;  %2613 = vadd.xlane.f32.xlu0 %v4876_v24  ;;  %v2635_v58 = vmul.f32 %v4876_v24, %v4876_v24  ;;  %v4885_v54 = vadd.f32 %v2571_v46, %v4854_v48 }
 0x730   :  { %v2573_v1 = vpop.f32.mrf.mxu1 }
 0x731   :  { %v4879_v40 = vadd.f32 %v2582_v16, %v2417_v47  ;;  %v2574_v5 = vadd.f32 %v3184_v3, %v2573_v1  ;;  %v2633_v19 = vmul.f32 %v4885_v54, %v4885_v54 }
 0x732   :  { %v3243_v57 = vpop.f32.mrf.mxu1 }
 0x733   :  { %v2595_v29 = vadd.f32 %v3243_v57, %v3184_v3  ;;  %2645 = vadd.xlane.f32.xlu0 %v2635_v58  ;;  %2615 = vadd.xlane.f32.xlu1 %v4879_v40  ;;  %v2636_v14 = vmul.f32 %v4879_v40, %v4879_v40  ;;  %v4893_v32 = vadd.f32 %v2574_v5, %v4863_v8 }
 0x734   :  { %v2586_v52 = vpop.f32.mrf.mxu1 }
 0x735   :  { %v4887_v2 = vadd.f32 %v2595_v29, %v2415_v9  ;;  %v2587_v42 = vadd.f32 %v3184_v3, %v2586_v52  ;;  %v2634_v63 = vmul.f32 %v4893_v32, %v4893_v32 }
 0x736   :  { %v3244_v47 = vpop.f32.mrf.mxu1 }
 0x737   :  { %2647 = vadd.xlane.f32.xlu1 %v2636_v14  ;;  %2609 = vadd.xlane.f32.xlu0 %v4885_v54  ;;  %v2598_v37 = vadd.f32 %v3244_v47, %v3184_v3  ;;  %v2639_v53 = vmul.f32 %v4887_v2, %v4887_v2  ;;  %v4899_v48 = vadd.f32 %v2587_v42, %v4868_v26 }
 0x738   :  { %v2589_v44 = vpop.f32.mrf.mxu1 }
 0x739   :  { %v4901_v9 = vadd.f32 %v2598_v37, %v2419_v23  ;;  %v2590_v8 = vadd.f32 %v3184_v3, %v2589_v44  ;;  %v2637_v26 = vmul.f32 %v4899_v48, %v4899_v48 }
 0x73b   :  { %2611 = vadd.xlane.f32.xlu1 %v4893_v32  ;;  %2653 = vadd.xlane.f32.xlu0 %v2639_v53  ;;  %v2640_v21 = vmul.f32 %v4901_v9, %v4901_v9  ;;  %v4909_v28 = vadd.f32 %v2590_v8, %v4866_v12  ;;  %v4931_v8 = vld [vmem:[%s5638_s1 + $0xb0] sm:$0xff] }
 0x73d   :  { %v2638_v23 = vmul.f32 %v4909_v28, %v4909_v28 }
 0x73f   :  { %2621 = vadd.xlane.f32.xlu1 %v4887_v2  ;;  %2617 = vadd.xlane.f32.xlu0 %v4899_v48 }
 0x743   :  { %2655 = vadd.xlane.f32.xlu1 %v2640_v21  ;;  %2623 = vadd.xlane.f32.xlu0 %v4901_v9 }
 0x747   :  { %2619 = vadd.xlane.f32.xlu1 %v4909_v28  ;;  %2649 = vadd.xlane.f32.xlu0 %v2637_v26 }
 0x74b   :  { %2651 = vadd.xlane.f32.xlu1 %v2638_v23  ;;  %2641 = vadd.xlane.f32.xlu0 %v2633_v19 }
 0x74f   :  { %2643 = vadd.xlane.f32.xlu1 %v2634_v63 }
 0x7b8   :  { %v2614_v12 = vpop.xlane.xlu0 %2613 }
 0x7b9   :  { %v4920_v27 = vmul.f32 0.0078125, %v2614_v12 }
 0x7bb   :  { %v2667_v7 = vmul.f32 %v4920_v27, %v4920_v27 }
 0x7bc   :  { %v2646_v3 = vpop.xlane.xlu0 %2645  ;;  %v2616_v22 = vpop.xlane.xlu1 %2615 }
 0x7bd   :  { %v2659_v0 = vmul.f32 0.0078125, %v2646_v3  ;;  %v4924_v33 = vmul.f32 0.0078125, %v2616_v22  ;;  %v4941_v3 = vld [vmem:[%s5638_s1 + $0xb8] sm:$0xff] }
 0x7bf   :  { %v2675_v16 = vsub.f32 %v2659_v0, %v2667_v7  ;;  %v2668_v57 = vmul.f32 %v4924_v33, %v4924_v33 }
 0x7c0   :  { %v2648_v1 = vpop.xlane.xlu1 %2647  ;;  %v2610_v46 = vpop.xlane.xlu0 %2609 }
 0x7c1   :  { %v2683_v58 = vadd.f32 0.001, %v2675_v16  ;;  %v2660_v29 = vmul.f32 0.0078125, %v2648_v1  ;;  %v4936_v12 = vmul.f32 0.0078125, %v2610_v46 }
 0x7c3   :  { %3444 = vrsqrt.f32 %v2683_v58  ;;  %v2676_v52 = vsub.f32 %v2660_v29, %v2668_v57  ;;  %v2665_v29 = vmul.f32 %v4936_v12, %v4936_v12 }
 0x7c4   :  { %v2612_v5 = vpop.xlane.xlu1 %2611  ;;  %v2654_v14 = vpop.xlane.xlu0 %2653 }
 0x7c5   :  { %v2684_v47 = vadd.f32 0.001, %v2676_v52  ;;  %v4945_v1 = vmul.f32 0.0078125, %v2612_v5 }
 0x7c7   :  { %3446 = vrsqrt.f32 %v2684_v47  ;;  %v2666_v5 = vmul.f32 %v4945_v1, %v4945_v1 }
 0x7c8   :  { %v2622_v42 = vpop.xlane.xlu1 %2621  ;;  %v2618_v37 = vpop.xlane.xlu0 %2617 }
 0x7c9   :  { %v4934_v63 = vmul.f32 0.0078125, %v2622_v42  ;;  %v4943_v7 = vmul.f32 0.0078125, %v2618_v37  ;;  %v2663_v42 = vmul.f32 0.0078125, %v2654_v14 }
 0x7cb   :  { %v2671_v58 = vmul.f32 %v4934_v63, %v4934_v63  ;;  %v2669_v37 = vmul.f32 %v4943_v7, %v4943_v7 }
 0x7cc   :  { %v2656_v53 = vpop.xlane.xlu1 %2655  ;;  %v2624_v44 = vpop.xlane.xlu0 %2623 }
 0x7cd   :  { %v2632_v46 = vmul.f32 0.0078125, %v2624_v44  ;;  %v2679_v38 = vsub.f32 %v2663_v42, %v2671_v58  ;;  %v2664_v25 = vmul.f32 0.0078125, %v2656_v53 }
 0x7cf   :  { %v2672_v6 = vmul.f32 %v2632_v46, %v2632_v46 }
 0x7d0   :  { %v3445_v21 = vpop.eup %3444  ;;  %v2620_v26 = vpop.xlane.xlu1 %2619 }
 0x7d1   :  { %v2650_v23 = vpop.xlane.xlu0 %2649  ;;  %v2709_v19 = vmul.f32 %v3445_v21, %v4931_v8  ;;  %v2630_v20 = vmul.f32 0.0078125, %v2620_v26  ;;  %v2680_v14 = vsub.f32 %v2664_v25, %v2672_v6  ;;  %v3199_v6 = vld [vmem:[%s5638_s1 + $0xd0] sm:$0xff] }
 0x7d2   :  { %v2661_v52 = vmul.f32 0.0078125, %v2650_v23  ;;  %v2687_v23 = vadd.f32 0.001, %v2679_v38 }
 0x7d3   :  { %2743 = vperm.xlu1 %3251, %v2709_v19   ;;  %v2670_v17 = vmul.f32 %v2630_v20, %v2630_v20  ;;  %v2717_v38 = vmul.f32 %v2709_v19, %v4920_v27 }
 0x7d4   :  { %v3447_v22 = vpop.eup %3446  ;;  %v2652_v0 = vpop.xlane.xlu1 %2651 }
 0x7d5   :  { %v2642_v16 = vpop.xlane.xlu0 %2641  ;;  %v2710_v57 = vmul.f32 %v3447_v22, %v4941_v3  ;;  %v2677_v22 = vsub.f32 %v2661_v52, %v2669_v37  ;;  %v2725_v53 = vsub.f32 %v3199_v6, %v2717_v38  ;;  %v3200_v52 = vld [vmem:[%s5638_s1 + $0xd8] sm:$0xff]  ;;  %v551_v38 = vld [vmem:[%s5640_s3 + $0xa8] sm:$0xff] }
 0x7d6   :  { %v2657_v47 = vmul.f32 0.0078125, %v2642_v16  ;;  %v2662_v16 = vmul.f32 0.0078125, %v2652_v0 }
 0x7d7   :  { %2748 = vperm.xlu0 %3250, %v2710_v57   ;;  %v2685_v39 = vadd.f32 0.001, %v2677_v22  ;;  %v2718_v27 = vmul.f32 %v2710_v57, %v4924_v33  ;;  %v3197_v57 = vld [vmem:[%s5638_s1 + $0xc0] sm:$0xff] }
 0x7d8   :  { %v2673_v21 = vsub.f32 %v2657_v47, %v2665_v29  ;;  %v2644_v10 = vpop.xlane.xlu1 %2643  ;;  %v2688_v29 = vadd.f32 0.001, %v2680_v14  ;;  %v2678_v47 = vsub.f32 %v2662_v16, %v2670_v17 }
 0x7d9   :  { %v2658_v59 = vmul.f32 0.0078125, %v2644_v10  ;;  %v2726_v37 = vsub.f32 %v3200_v52, %v2718_v27  ;;  %v561_v27 = vld [vmem:[%s5640_s3 + $0xf8] sm:$0xff] }
 0x7da   :  { %v2681_v44 = vadd.f32 0.001, %v2673_v21  ;;  %v2686_v58 = vadd.f32 0.001, %v2678_v47 }
 0x7db   :  { %v2674_v15 = vsub.f32 %v2658_v59, %v2666_v5  ;;  %v3193_v59 = vld [vmem:[%s5638_s1 + $0xa0] sm:$0xff] }
 0x7dc   :  { %3448 = vrsqrt.f32 %v2681_v44 }
 0x7dd   :  { %v2682_v13 = vadd.f32 0.001, %v2674_v15 }
 0x7df   :  { %3450 = vrsqrt.f32 %v2682_v13 }
 0x7e0   :  { %3452 = vrsqrt.f32 %v2687_v23 }
 0x7e1   :  { %3454 = vrsqrt.f32 %v2685_v39  ;;  %v3194_v39 = vld [vmem:[%s5638_s1 + $0xa8] sm:$0xff] }
 0x7e2   :  { %3456 = vrsqrt.f32 %v2688_v29 }
 0x7e3   :  { %3458 = vrsqrt.f32 %v2686_v58 }
 0x7e9   :  { %v3449_v10 = vpop.eup %3448 }
 0x7ea   :  { %v2707_v25 = vmul.f32 %v3449_v10, %v3193_v59  ;;  %v547_v10 = vld [vmem:[%s5640_s3 + $0x88] sm:$0xff] }
 0x7ec   :  { %v3451_v13 = vpop.eup %3450  ;;  %2733 = vperm.xlu1 %3251, %v2707_v25  }
 0x7ed   :  { %v2708_v17 = vmul.f32 %v3451_v13, %v3194_v39  ;;  %v3453_v15 = vpop.eup %3452  ;;  %v554_v13 = vld [vmem:[%s5640_s3 + $0xc0] sm:$0xff] }
 0x7ee   :  { %v3455_v26 = vpop.eup %3454  ;;  %v2713_v0 = vmul.f32 %v3453_v15, %v4931_v8  ;;  %v557_v15 = vld [vmem:[%s5640_s3 + $0xd8] sm:$0xff] }
 0x7ef   :  { %2738 = vperm.xlu0 %3250, %v2708_v17   ;;  %v3457_v19 = vpop.eup %3456  ;;  %v2711_v42 = vmul.f32 %v3455_v26, %v3193_v59  ;;  %v550_v59 = vld [vmem:[%s5640_s3 + $0xa0] sm:$0xff]  ;;  %v559_v26 = vld [vmem:[%s5640_s3 + $0xe8] sm:$0xff] }
 0x7f0   :  { %2791 = vperm.xlu1 %3251, %v2725_v53   ;;  %v2714_v21 = vmul.f32 %v3457_v19, %v4941_v3  ;;  %v3459_v5 = vpop.eup %3458  ;;  %v2721_v22 = vmul.f32 %v2713_v0, %v4934_v63  ;;  %v3198_v63 = vld [vmem:[%s5638_s1 + $0xc8] sm:$0xff]  ;;  %v2715_v3 = vmul.f32 %v2707_v25, %v4936_v12  ;;  %v548_v12 = vld [vmem:[%s5640_s3 + $0x90] sm:$0xff]  ;;  %v558_v53 = vld [vmem:[%s5640_s3 + $0xe0] sm:$0xff] }
 0x7f1   :  { %v2712_v8 = vmul.f32 %v3459_v5, %v3194_v39  ;;  %v2719_v33 = vmul.f32 %v2711_v42, %v4943_v7  ;;  %v2716_v7 = vmul.f32 %v2708_v17, %v4945_v1  ;;  %v549_v1 = vld [vmem:[%s5640_s3 + $0x98] sm:$0xff]  ;;  %v552_v25 = vld [vmem:[%s5640_s3 + $0xb0] sm:$0xff]  ;;  %v555_v39 = vld [vmem:[%s5640_s3 + $0xc8] sm:$0xff] }
 0x7f2   :  { %v2722_v44 = vmul.f32 %v2714_v21, %v2632_v46  ;;  %v2729_v23 = vsub.f32 %v3199_v6, %v2721_v22  ;;  %v2723_v47 = vsub.f32 %v3197_v57, %v2715_v3  ;;  %v553_v6 = vld [vmem:[%s5640_s3 + $0xb8] sm:$0xff]  ;;  %v556_v17 = vld [vmem:[%s5640_s3 + $0xd0] sm:$0xff]  ;;  %v3201_v19 = vld [vmem:[%s5638_s1 + $0xe0] sm:$0xff] }
 0x7f3   :  { %2763 = vperm.xlu0 %3250, %v2713_v0   ;;  %v2720_v16 = vmul.f32 %v2712_v8, %v2630_v20  ;;  %v2727_v29 = vsub.f32 %v3197_v57, %v2719_v33  ;;  %v2724_v58 = vsub.f32 %v3198_v63, %v2716_v7  ;;  %v546_v20 = vld [vmem:[%s5640_s3 + $0x80] sm:$0xff]  ;;  %v560_v0 = vld [vmem:[%s5640_s3 + $0xf0] sm:$0xff] }
 0x7f4   :  { %2753 = vperm.xlu1 %3251, %v2711_v42   ;;  %v2730_v14 = vsub.f32 %v3200_v52, %v2722_v44  ;;  %v3202_v52 = vld [vmem:[%s5638_s1 + $0xe8] sm:$0xff]  ;;  %v3203_v42 = vld [vmem:[%s5638_s1 + $0xf0] sm:$0xff] }
 0x7f5   :  { %v2728_v46 = vsub.f32 %v3198_v63, %v2720_v16 }
 0x7f7   :  { %2796 = vperm.xlu0 %3250, %v2726_v37   ;;  %v3204_v37 = vld [vmem:[%s5638_s1 + $0xf8] sm:$0xff] }
 0x7f8   :  { %2768 = vperm.xlu1 %3251, %v2714_v21  }
 0x7fb   :  { %2758 = vperm.xlu0 %3250, %v2712_v8  }
 0x7fc   :  { %2811 = vperm.xlu1 %3251, %v2729_v23  }
 0x7ff   :  { %2816 = vperm.xlu0 %3250, %v2730_v14  }
 0x800   :  { %2801 = vperm.xlu1 %3251, %v2727_v29  }
 0x803   :  { %2806 = vperm.xlu0 %3250, %v2728_v46  }
 0x804   :  { %2781 = vperm.xlu1 %3251, %v2723_v47  }
 0x807   :  { %2786 = vperm.xlu0 %3250, %v2724_v58  }
 0x808   :  { %644 = vperm.xlu1 %3251, %v546_v20  }
 0x80b   :  { %649 = vperm.xlu0 %3250, %v547_v10  }
 0x80c   :  { %654 = vperm.xlu1 %3251, %v548_v12  }
 0x80f   :  { %659 = vperm.xlu0 %3250, %v549_v1  }
 0x810   :  { %664 = vperm.xlu1 %3251, %v550_v59  }
 0x813   :  { %669 = vperm.xlu0 %3250, %v551_v38  }
 0x814   :  { %674 = vperm.xlu1 %3251, %v552_v25  }
 0x817   :  { %679 = vperm.xlu0 %3250, %v553_v6  }
 0x818   :  { %684 = vperm.xlu1 %3251, %v554_v13  }
 0x81b   :  { %689 = vperm.xlu0 %3250, %v555_v39  }
 0x81c   :  { %694 = vperm.xlu1 %3251, %v556_v17  }
 0x81f   :  { %699 = vperm.xlu0 %3250, %v557_v15  }
 0x820   :  { %704 = vperm.xlu1 %3251, %v558_v53  }
 0x823   :  { %709 = vperm.xlu0 %3250, %v559_v26  }
 0x824   :  { %714 = vperm.xlu1 %3251, %v560_v0  }
 0x827   :  { %719 = vperm.xlu0 %3250, %v561_v27  }
 0x828   :  { %2850 = vperm.xlu1 %3251, %v3201_v19  }
 0x82b   :  { %2855 = vperm.xlu0 %3250, %v3202_v52  }
 0x82c   :  { %2860 = vperm.xlu1 %3251, %v3203_v42  }
 0x82f   :  { %2865 = vperm.xlu0 %3250, %v3204_v37  }
 0x84e   :  { %v2744_v21 = vpop.permute.xlu1 %2743 }
 0x84f   :  { %v2773_v46 = vmul.f32 %v2744_v21, %v4876_v24 }
 0x852   :  { %v2749_v5 = vpop.permute.xlu0 %2748 }
 0x853   :  { %v2774_v16 = vmul.f32 %v2749_v5, %v4879_v40 }
 0x867   :  { %v2734_v22 = vpop.permute.xlu1 %2733 }
 0x868   :  { %v2771_v24 = vmul.f32 %v2734_v22, %v4885_v54 }
 0x86a   :  { %v2739_v44 = vpop.permute.xlu0 %2738 }
 0x86b   :  { %v2792_v8 = vpop.permute.xlu1 %2791  ;;  %v2772_v26 = vmul.f32 %v2739_v44, %v4893_v32 }
 0x86c   :  { %v2821_v20 = vadd.f32 %v2792_v8, %v2773_v46 }
 0x86e   :  { %v2764_v23 = vpop.permute.xlu0 %2763 }
 0x86f   :  { %v2754_v33 = vpop.permute.xlu1 %2753  ;;  %v2777_v63 = vmul.f32 %v2764_v23, %v4887_v2  ;;  %v2829_v2 = vmax.f32 %v2821_v20, 0.0 }
 0x870   :  { %v2775_v12 = vmul.f32 %v2754_v33, %v4899_v48 }
 0x872   :  { %v2797_v57 = vpop.permute.xlu0 %2796 }
 0x873   :  { %v2769_v14 = vpop.permute.xlu1 %2768  ;;  %v2822_v7 = vadd.f32 %v2797_v57, %v2774_v16 }
 0x874   :  { %v2778_v47 = vmul.f32 %v2769_v14, %v4901_v9 }
 0x875   :  { %v2830_v38 = vmax.f32 %v2822_v7, 0.0 }
 0x876   :  { %v2759_v29 = vpop.permute.xlu0 %2758 }
 0x877   :  { %v2812_v3 = vpop.permute.xlu1 %2811  ;;  %v2776_v40 = vmul.f32 %v2759_v29, %v4909_v28  ;;  %v2841_v53 = vpack.c.bf16 %v2830_v38, %v2829_v2  ;;  %v5851_v2 = vld [vmem:[#allocation8_spill] sm:$0xff] }
 0x878   :  { %v2825_v58 = vadd.f32 %v2812_v3, %v2777_v63 }
 0x87a   :  { %v2817_v10 = vpop.permute.xlu0 %2816  ;;  %v2833_v25 = vmax.f32 %v2825_v58, 0.0 }
 0x87b   :  { %v2802_v1 = vpop.permute.xlu1 %2801  ;;  %v2826_v59 = vadd.f32 %v2817_v10, %v2778_v47  ;;  %v5844_v10 = vld [vmem:[#allocation16_spill] sm:$0xff] }
 0x87c   :  { %v2823_v6 = vadd.f32 %v2802_v1, %v2775_v12  ;;  %v5846_v1 = vld [vmem:[#allocation15_spill] sm:$0xff] }
 0x87d   :  { %v2834_v13 = vmax.f32 %v2826_v59, 0.0 }
 0x87e   :  { %v2807_v39 = vpop.permute.xlu0 %2806  ;;  %v2831_v0 = vmax.f32 %v2823_v6, 0.0  ;;  %v5850_v6 = vld [vmem:[#allocation13_spill] sm:$0xff] }
 0x87f   :  { %v2842_v17 = vpack.c.bf16 %v2834_v13, %v2833_v25  ;;  %v2782_v15 = vpop.permute.xlu1 %2781  ;;  %v2824_v9 = vadd.f32 %v2807_v39, %v2776_v40  ;;  %v5848_v40 = vld [vmem:[#allocation20_spill] sm:$0xff] }
 0x880   :  { %v2819_v48 = vadd.f32 %v2782_v15, %v2771_v24  ;;  %v5852_v24 = vld [vmem:[#allocation19_spill] sm:$0xff]  ;;  %v3279_v15 = vld [vmem:[%s5644_s7 + $0x8] sm:$0xff]  }
 0x881   :  { %v2832_v27 = vmax.f32 %v2824_v9, 0.0  ;;  %2896 = vmatprep.subr.bf16.mxu0 %v2842_v17  ;;  %v5854_v9 = vld [vmem:[#allocation22_spill] sm:$0xff] }
 0x882   :  { %2897 = vmatpush1.bf16.msra.mxu0 %v2841_v53  ;;  %v2787_v19 = vpop.permute.xlu0 %2786  ;;  %v2827_v37 = vmax.f32 %v2819_v48, 0.0 }
 0x883   :  { %v2840_v52 = vpack.c.bf16 %v2832_v27, %v2831_v0  ;;  %v645_v28 = vpop.permute.xlu1 %644  ;;  %v2820_v42 = vadd.f32 %v2787_v19, %v2772_v26  ;;  %v5855_v19 = vld [vmem:[#allocation14_spill] sm:$0xff] }
 0x884   :  { %v5051_v54 = vadd.f32 %v4572_v60, %v645_v28  ;;  %v5054_v5 = vadd.f32 %v4576_v56, %v645_v28  ;;  %v5057_v32 = vadd.f32 %v4568_v45, %v645_v28  ;;  %v5069_v60 = vadd.f32 %v4570_v49, %v645_v28  ;;  %v5857_v28 = vld [vmem:[#allocation17_spill] sm:$0xff] }
 0x885   :  { %v2828_v21 = vmax.f32 %v2820_v42, 0.0  ;;  %2898 = vmatprep.subr.bf16.mxu0 %v2840_v52 }
 0x886   :  { %5826 = vst [vmem:[#allocation59_spill] sm:$0xff] %v5051_v54  ;;  %5827 = vst [vmem:[#allocation60_spill] sm:$0xff] %v5054_v5  ;;  %v650_v22 = vpop.permute.xlu0 %649 }
 0x887   :  { %5828 = vst [vmem:[#allocation61_spill] sm:$0xff] %v5057_v32  ;;  %v2839_v44 = vpack.c.bf16 %v2828_v21, %v2827_v37  ;;  %v655_v8 = vpop.permute.xlu1 %654  ;;  %v5060_v23 = vadd.f32 %v4580_v4, %v650_v22  ;;  %v5063_v33 = vadd.f32 %v4584_v62, %v650_v22  ;;  %v5066_v57 = vadd.f32 %v4574_v51, %v650_v22  ;;  %v3278_v4 = vld [vmem:[%s5644_s7] sm:$0xff]   ;;  %v5859_v37 = vld [vmem:[#allocation18_spill] sm:$0xff]  ;;  %s3636_s7 = smov [#allocation2]  }
 0x888   :  { %5832 = vst [vmem:[#allocation65_spill] sm:$0xff] %v5069_v60  ;;  %v5072_v56 = vadd.f32 %v4588_v35, %v655_v8  ;;  %v5075_v45 = vadd.f32 %v4592_v43, %v655_v8  ;;  %v5078_v14 = vadd.f32 %v4582_v36, %v655_v8  ;;  %v5084_v62 = vadd.f32 %v4578_v34, %v650_v22  ;;  %s3093_s11 = sshll.u32 %s3636_s7, 4  ;;  %s3094_s11 = int_to_ptr.vmem [resolvable:$true] %s3093_s11 }
 0x889   :  { %5829 = vst [vmem:[#allocation62_spill] sm:$0xff] %v5060_v23  ;;  %5830 = vst [vmem:[#allocation63_spill] sm:$0xff] %v5063_v33  ;;  %v1237_v49 = vmax.f32 %v5051_v54, %v5060_v23  ;;  %v1258_v51 = vmax.f32 %v5054_v5, %v5063_v33  ;;  %v1279_v35 = vmax.f32 %v5057_v32, %v5066_v57  ;;  %2899 = vmatpush1.bf16.msra.mxu0 %v2839_v44  ;;  %v5885_v32 = vld [vmem:[#allocation32_spill] sm:$0xff]  ;;  %v5891_v5 = vld [vmem:[#allocation42_spill] sm:$0xff]  ;;  %s3612_s12 = scalar_lea.vmem %s3094_s11, 2048  ;;  %p3617_p1 = scmp.lt.s32.totalorder %s3094_s11, %s3094_s11 }
 0x88a   :  { %5831 = vst [vmem:[#allocation64_spill] sm:$0xff] %v5066_v57  ;;  %5833 = vst [vmem:[#allocation66_spill] sm:$0xff] %v5072_v56  ;;  %v5093_v36 = vadd.f32 %v4586_v18, %v655_v8  ;;  %v660_v43 = vpop.permute.xlu0 %659  ;;  %v1300_v16 = vmax.f32 %v5069_v60, %v5084_v62  ;;  %p3613_p0 = scmp.ne.s32.totalorder %s3094_s11, %s3612_s12  ;;  %p3618_p2 = scmp.lt.s32.totalorder %s3612_s12, %s3612_s12 }
 0x88b   :  { %5834 = vst [vmem:[#allocation67_spill] sm:$0xff] %v5075_v45  ;;  %5835 = vst [vmem:[#allocation68_spill] sm:$0xff] %v5078_v14  ;;  %v665_v29 = vpop.permute.xlu1 %664  ;;  %v1238_v34 = vmax.f32 %v1237_v49, %v5072_v56  ;;  %v1259_v63 = vmax.f32 %v1258_v51, %v5075_v45  ;;  %v1280_v3 = vmax.f32 %v1279_v35, %v5078_v14  ;;  %v5862_v51 = vld [vmem:[#allocation11_spill] sm:$0xff]  ;;  %v5894_v56 = vld [vmem:[#allocation49_spill] sm:$0xff] }
 0x88c   :  { %5836 = vst [vmem:[#allocation69_spill] sm:$0xff] %v5084_v62  ;;  %5837 = vst [vmem:[#allocation70_spill] sm:$0xff] %v5093_v36  ;;  %v5101_v46 = vadd.f32 %v4604_v30, %v665_v29  ;;  %3207 = vmatmul.mubr.msk.bf16.vlgmr.msra.gmra.mxu0 %vm2361_vm1, %v3278_v4  ;;  %v1301_v7 = vmax.f32 %v1300_v16, %v5093_v36  ;;  %v5106_v18 = vadd.f32 %v4596_v61, %v660_v43  ;;  %v5861_v4 = vld [vmem:[#allocation5_spill] sm:$0xff]  ;;  %p3619_p3 = por %p3618_p2, %p3617_p1 }
 0x88d   :  { %v5109_v47 = vadd.f32 %v4600_v55, %v660_v43  ;;  %v5112_v58 = vadd.f32 %v4590_v41, %v660_v43  ;;  %2926 = vmatprep.mubr.bf16.mxu0 %v5771_v50  ;;  %v5116_v20 = vadd.f32 %v4608_v31, %v665_v29  ;;  %v5119_v30 = vadd.f32 %v4598_v11, %v665_v29 }
 0x88e   :  { %5838 = vst [vmem:[#allocation71_spill] sm:$0xff] %v5101_v46  ;;  %5839 = vst [vmem:[#allocation72_spill] sm:$0xff] %v5106_v18  ;;  %v5122_v12 = vadd.f32 %v5844_v10, %v665_v29  ;;  %v5125_v61 = vadd.f32 %v5846_v1, %v660_v43  ;;  %v670_v59 = vpop.permute.xlu0 %669  ;;  %v1239_v55 = vmax.f32 %v1238_v34, %v5106_v18  ;;  %v5863_v43 = vld [vmem:[#allocation21_spill] sm:$0xff]  ;;  %v5866_v10 = vld [vmem:[#allocation23_spill] sm:$0xff]  ;;  %p3620_p4 = pnand %p3619_p3, %p3613_p0 }
 0x88f   :  { %5840 = vst [vmem:[#allocation73_spill] sm:$0xff] %v5109_v47  ;;  %5841 = vst [vmem:[#allocation74_spill] sm:$0xff] %v5112_v58  ;;  %v1260_v41 = vmax.f32 %v1259_v63, %v5109_v47  ;;  %v1281_v38 = vmax.f32 %v1280_v3, %v5112_v58  ;;  %v675_v25 = vpop.permute.xlu1 %674  ;;  %v5131_v31 = vadd.f32 %v5848_v40, %v670_v59  ;;  %v5865_v3 = vld [vmem:[#allocation7_spill] sm:$0xff]  ;;  %v5892_v58 = vld [vmem:[#allocation44_spill] sm:$0xff] }
 0x890   :  { %5842 = vst [vmem:[#allocation75_spill] sm:$0xff] %v5116_v20  ;;  %5843 = vst [vmem:[#allocation76_spill] sm:$0xff] %v5119_v30  ;;  %v1302_v11 = vmax.f32 %v1301_v7, %v5125_v61  ;;  %v5135_v13 = vadd.f32 %v5850_v6, %v675_v25  ;;  %v5138_v39 = vadd.f32 %v5851_v2, %v675_v25  ;;  %v5869_v2 = vld [vmem:[#allocation10_spill] sm:$0xff]  ;;  %v5897_v47 = vld [vmem:[#allocation48_spill] sm:$0xff] }
 0x891   :  { %5845 = vst [vmem:[#allocation16_spill] sm:$0xff] %v5122_v12  ;;  %5847 = vst [vmem:[#allocation15_spill] sm:$0xff] %v5125_v61  ;;  %v5141_v17 = vadd.f32 %v5852_v24, %v675_v25  ;;  %v5147_v53 = vadd.f32 %v5854_v9, %v675_v25  ;;  %v1240_v26 = vmax.f32 %v1239_v55, %v5101_v46  ;;  %v5895_v61 = vld [vmem:[#allocation50_spill] sm:$0xff] }
 0x892   :  { %5849 = vst [vmem:[#allocation20_spill] sm:$0xff] %v5131_v31  ;;  %v1261_v0 = vmax.f32 %v1260_v41, %v5116_v20  ;;  %v1282_v48 = vmax.f32 %v1281_v38, %v5119_v30  ;;  %v1303_v27 = vmax.f32 %v1302_v11, %v5122_v12  ;;  %v5154_v52 = vadd.f32 %v5855_v19, %v670_v59  ;;  %v680_v22 = vpop.permute.xlu0 %679  ;;  %v5868_v41 = vld [vmem:[#allocation12_spill] sm:$0xff] }
 0x893   :  { %5853 = vst [vmem:[#allocation13_spill] sm:$0xff] %v5141_v17  ;;  %v5157_v42 = vadd.f32 %v5857_v28, %v670_v59  ;;  %v5160_v21 = vadd.f32 %v5859_v37, %v670_v59  ;;  %v1241_v44 = vmax.f32 %v1240_v26, %v5131_v31  ;;  %v685_v8 = vpop.permute.xlu1 %684  ;;  %v5164_v49 = vadd.f32 %v5861_v4, %v680_v22  ;;  %v5867_v59 = vld [vmem:[#allocation6_spill] sm:$0xff]  ;;  %v5872_v28 = vld [vmem:[#allocation9_spill] sm:$0xff] }
 0x894   :  { %5856 = vst [vmem:[#allocation8_spill] sm:$0xff] %v5154_v52  ;;  %v5167_v35 = vadd.f32 %v5862_v51, %v680_v22  ;;  %v5170_v16 = vadd.f32 %v5863_v43, %v680_v22  ;;  %v1262_v29 = vmax.f32 %v1261_v0, %v5154_v52  ;;  %v5176_v7 = vadd.f32 %v5865_v3, %v685_v8  ;;  %v5870_v0 = vld [vmem:[#allocation25_spill] sm:$0xff]  ;;  %v5874_v43 = vld [vmem:[#allocation31_spill] sm:$0xff]  ;;  %v5876_v3 = vld [vmem:[#allocation28_spill] sm:$0xff] }
 0x895   :  { %5858 = vst [vmem:[#allocation19_spill] sm:$0xff] %v5157_v42  ;;  %5860 = vst [vmem:[#allocation22_spill] sm:$0xff] %v5160_v21  ;;  %v1283_v34 = vmax.f32 %v1282_v48, %v5157_v42  ;;  %v1304_v63 = vmax.f32 %v1303_v27, %v5160_v21  ;;  %3208 = vmatmul.mubr.msk.bf16.gmra.mxu0 %vm2361_vm1, %v3279_v15  ;;  %v5180_v1 = vadd.f32 %v5866_v10, %v685_v8  ;;  %v5871_v27 = vld [vmem:[#allocation27_spill] sm:$0xff]  ;;  %v5873_v4 = vld [vmem:[#allocation29_spill] sm:$0xff] }
 0x896   :  { %5864 = vst [vmem:[#allocation14_spill] sm:$0xff] %v5170_v16  ;;  %v5183_v55 = vadd.f32 %v5867_v59, %v685_v8  ;;  %v5186_v38 = vadd.f32 %v5868_v41, %v685_v8  ;;  %v1242_v25 = vmax.f32 %v1241_v44, %v5135_v13  ;;  %3050 = vmatprep.mubr.bf16.mxu0 %v5771_v50  ;;  %v690_v15 = vpop.permute.xlu0 %689 }
 0x897   :  { %v1263_v40 = vmax.f32 %v1262_v29, %v5138_v39  ;;  %v1284_v11 = vmax.f32 %v1283_v34, %v5141_v17  ;;  %v1305_v6 = vmax.f32 %v1304_v63, %v5147_v53  ;;  %v5194_v24 = vadd.f32 %v5869_v2, %v680_v22  ;;  %v695_v26 = vpop.permute.xlu1 %694  ;;  %v5875_v34 = vld [vmem:[#allocation26_spill] sm:$0xff] }
 0x898   :  { %v1243_v9 = vmax.f32 %v1242_v25, %v5164_v49  ;;  %v5198_v48 = vadd.f32 %v5870_v0, %v690_v15  ;;  %v5201_v19 = vadd.f32 %v5871_v27, %v690_v15  ;;  %v5204_v37 = vadd.f32 %v5872_v28, %v690_v15  ;;  %v5878_v28 = vld [vmem:[#allocation33_spill] sm:$0xff] }
 0x899   :  { %v1264_v44 = vmax.f32 %v1263_v40, %v5167_v35  ;;  %v1285_v8 = vmax.f32 %v1284_v11, %v5170_v16  ;;  %v1306_v22 = vmax.f32 %v1305_v6, %v5194_v24  ;;  %v5210_v51 = vadd.f32 %v5873_v4, %v695_v26  ;;  %v5877_v11 = vld [vmem:[#allocation24_spill] sm:$0xff] }
 0x89a   :  { %v5213_v29 = vadd.f32 %v5874_v43, %v695_v26  ;;  %v5216_v63 = vadd.f32 %v5875_v34, %v695_v26  ;;  %v5219_v10 = vadd.f32 %v5876_v3, %v695_v26  ;;  %v1244_v59 = vmax.f32 %v1243_v9, %v5176_v7  ;;  %v700_v2 = vpop.permute.xlu0 %699  ;;  %v5879_v26 = vld [vmem:[#allocation35_spill] sm:$0xff]  ;;  %v5880_v9 = vld [vmem:[#allocation30_spill] sm:$0xff] }
 0x89b   :  { %v1265_v41 = vmax.f32 %v1264_v44, %v5180_v1  ;;  %v1286_v25 = vmax.f32 %v1285_v8, %v5183_v55  ;;  %v1307_v40 = vmax.f32 %v1306_v22, %v5186_v38  ;;  %v5226_v6 = vadd.f32 %v5877_v11, %v690_v15  ;;  %v705_v27 = vpop.permute.xlu1 %704  ;;  %v5881_v22 = vld [vmem:[#allocation37_spill] sm:$0xff] }
 0x89c   :  { %v1245_v0 = vmax.f32 %v1244_v59, %v5198_v48  ;;  %v5230_v4 = vadd.f32 %v5878_v28, %v700_v2  ;;  %v5233_v43 = vadd.f32 %v5879_v26, %v700_v2  ;;  %v5236_v34 = vadd.f32 %v5880_v9, %v700_v2  ;;  %v5882_v59 = vld [vmem:[#allocation39_spill] sm:$0xff]  ;;  %v5883_v28 = vld [vmem:[#allocation34_spill] sm:$0xff]  ;;  %v5884_v26 = vld [vmem:[#allocation36_spill] sm:$0xff] }
 0x89d   :  { %v1266_v44 = vmax.f32 %v1265_v41, %v5201_v19  ;;  %v1287_v8 = vmax.f32 %v1286_v25, %v5204_v37  ;;  %v1308_v15 = vmax.f32 %v1307_v40, %v5226_v6  ;;  %v5242_v3 = vadd.f32 %v5881_v22, %v705_v27 }
 0x89e   :  { %v5245_v11 = vadd.f32 %v5882_v59, %v705_v27  ;;  %v5248_v50 = vadd.f32 %v5883_v28, %v705_v27  ;;  %v5251_v57 = vadd.f32 %v5884_v26, %v705_v27  ;;  %v1246_v9 = vmax.f32 %v1245_v0, %v5210_v51  ;;  %v710_v23 = vpop.permute.xlu0 %709  ;;  %v5886_v28 = vld [vmem:[#allocation41_spill] sm:$0xff]  ;;  %v5887_v27 = vld [vmem:[#allocation43_spill] sm:$0xff]  ;;  %v5888_v0 = vld [vmem:[#allocation38_spill] sm:$0xff] }
 0x89f   :  { %v1267_v41 = vmax.f32 %v1266_v44, %v5213_v29  ;;  %v1288_v25 = vmax.f32 %v1287_v8, %v5216_v63  ;;  %v1309_v40 = vmax.f32 %v1308_v15, %v5219_v10  ;;  %v5258_v22 = vadd.f32 %v5885_v32, %v700_v2  ;;  %v715_v54 = vpop.permute.xlu1 %714  ;;  %v5889_v2 = vld [vmem:[#allocation45_spill] sm:$0xff] }
 0x8a0   :  { %v1247_v59 = vmax.f32 %v1246_v9, %v5230_v4  ;;  %v5262_v62 = vadd.f32 %v5886_v28, %v710_v23  ;;  %v5265_v26 = vadd.f32 %v5887_v27, %v710_v23  ;;  %v5268_v60 = vadd.f32 %v5888_v0, %v710_v23  ;;  %v5890_v9 = vld [vmem:[#allocation47_spill] sm:$0xff] }
 0x8a1   :  { %v1268_v44 = vmax.f32 %v1267_v41, %v5233_v43  ;;  %v1289_v8 = vmax.f32 %v1288_v25, %v5236_v34  ;;  %v1310_v32 = vmax.f32 %v1309_v40, %v5258_v22  ;;  %v5274_v15 = vadd.f32 %v5889_v2, %v715_v54  ;;  %v5893_v40 = vld [vmem:[#allocation40_spill] sm:$0xff] }
 0x8a2   :  { %v1038_v33 = vadd.f32 %v5890_v9, %v715_v54  ;;  %v5278_v28 = vadd.f32 %v5891_v5, %v715_v54  ;;  %v5281_v27 = vadd.f32 %v5892_v58, %v715_v54  ;;  %v1248_v0 = vmax.f32 %v1247_v59, %v5242_v3  ;;  %v720_v2 = vpop.permute.xlu0 %719  ;;  %v5896_v54 = vld [vmem:[#allocation46_spill] sm:$0xff] }
 0x8a3   :  { %v1269_v14 = vmax.f32 %v1268_v44, %v5245_v11  ;;  %v1290_v41 = vmax.f32 %v1289_v8, %v5248_v50  ;;  %v1311_v25 = vmax.f32 %v1310_v32, %v5251_v57  ;;  %v5288_v18 = vadd.f32 %v5893_v40, %v710_v23 }
 0x8a4   :  { %v1249_v9 = vmax.f32 %v1248_v0, %v5262_v62  ;;  %v1040_v5 = vadd.f32 %v5894_v56, %v720_v2  ;;  %v1042_v36 = vadd.f32 %v5895_v61, %v720_v2  ;;  %v1233_v58 = vadd.f32 %v5896_v54, %v720_v2 }
 0x8a5   :  { %v1270_v59 = vmax.f32 %v1269_v14, %v5265_v26  ;;  %v1291_v44 = vmax.f32 %v1290_v41, %v5268_v60  ;;  %v1312_v8 = vmax.f32 %v1311_v25, %v5288_v18  ;;  %v1235_v32 = vadd.f32 %v5897_v47, %v720_v2 }
 0x8a6   :  { %v1250_v23 = vmax.f32 %v1249_v9, %v5274_v15 }
 0x8a7   :  { %v1271_v40 = vmax.f32 %v1270_v59, %v1038_v33  ;;  %v1292_v45 = vmax.f32 %v1291_v44, %v5278_v28  ;;  %v1313_v0 = vmax.f32 %v1312_v8, %v5281_v27 }
 0x8a8   :  { %v1251_v56 = vmax.f32 %v1250_v23, %v1040_v5 }
 0x8a9   :  { %v1272_v42 = vmax.f32 %v1271_v40, %v1042_v36  ;;  %v1293_v61 = vmax.f32 %v1292_v45, %v1233_v58  ;;  %v1314_v30 = vmax.f32 %v1313_v0, %v1235_v32 }
 0x8aa   :  { %v1252_v54 = vrot.slane %v1251_v56, 4 }
 0x8ab   :  { %v1273_v31 = vrot.slane %v1272_v42, 4  ;;  %v1294_v14 = vrot.slane %v1293_v61, 4  ;;  %v1315_v46 = vrot.slane %v1314_v30, 4 }
 0x8ac   :  { %v1253_v41 = vmax.f32 %v1251_v56, %v1252_v54 }
 0x8ad   :  { %v1274_v21 = vmax.f32 %v1272_v42, %v1273_v31  ;;  %v1295_v25 = vmax.f32 %v1293_v61, %v1294_v14  ;;  %v1316_v12 = vmax.f32 %v1314_v30, %v1315_v46 }
 0x8ae   :  { %v1254_v47 = vrot.slane %v1253_v41, 2 }
 0x8af   :  { %v1275_v2 = vrot.slane %v1274_v21, 2  ;;  %v1296_v9 = vrot.slane %v1295_v25, 2  ;;  %v1317_v59 = vrot.slane %v1316_v12, 2 }
 0x8b0   :  { %v1255_v52 = vmax.f32 %v1253_v41, %v1254_v47 }
 0x8b1   :  { %v1276_v44 = vmax.f32 %v1274_v21, %v1275_v2  ;;  %v1297_v20 = vmax.f32 %v1295_v25, %v1296_v9  ;;  %v1318_v8 = vmax.f32 %v1316_v12, %v1317_v59 }
 0x8b2   :  { %v1256_v23 = vrot.slane %v1255_v52, 1 }
 0x8b3   :  { %v1277_v40 = vrot.slane %v1276_v44, 1  ;;  %v1298_v45 = vrot.slane %v1297_v20, 1  ;;  %v1319_v0 = vrot.slane %v1318_v8, 1 }
 0x8b4   :  { %v5301_v16 = vmax.f32 %v1255_v52, %v1256_v23 }
 0x8b5   :  { %v5303_v17 = vmax.f32 %v1276_v44, %v1277_v40  ;;  %v5305_v56 = vmax.f32 %v1297_v20, %v1298_v45  ;;  %v5307_v31 = vmax.f32 %v1318_v8, %v1319_v0 }
 0x8b6   :  { %v1381_v46 = vsub.f32 %v1040_v5, %v5301_v16  ;;  %v1377_v20 = vsub.f32 %v5274_v15, %v5301_v16 }
 0x8b7   :  { %v1382_v30 = vsub.f32 %v1042_v36, %v5303_v17  ;;  %v1383_v42 = vsub.f32 %v1233_v58, %v5305_v56  ;;  %v1384_v12 = vsub.f32 %v1235_v32, %v5307_v31  ;;  %v1378_v21 = vsub.f32 %v1038_v33, %v5303_v17 }
 0x8b8   :  { %v1505_v61 = vmul.f32 1.442695, %v1381_v46  ;;  %v1380_v52 = vsub.f32 %v5281_v27, %v5307_v31  ;;  %v1379_v5 = vsub.f32 %v5278_v28, %v5305_v56  ;;  %v1370_v58 = vsub.f32 %v5245_v11, %v5303_v17 }
 0x8b9   :  { %v1507_v54 = vmul.f32 1.442695, %v1382_v30  ;;  %v1509_v14 = vmul.f32 1.442695, %v1383_v42  ;;  %v1511_v41 = vmul.f32 1.442695, %v1384_v12  ;;  %v1374_v32 = vsub.f32 %v5265_v26, %v5303_v17 }
 0x8ba   :  { %3460 = vpow2.f32 %v1505_v61  ;;  %v1499_v36 = vmul.f32 1.442695, %v1378_v21  ;;  %v1503_v33 = vmul.f32 1.442695, %v1380_v52  ;;  %v1497_v27 = vmul.f32 1.442695, %v1377_v20 }
 0x8bb   :  { %3462 = vpow2.f32 %v1507_v54  ;;  %v1372_v15 = vsub.f32 %v5251_v57, %v5307_v31  ;;  %v1501_v25 = vmul.f32 1.442695, %v1379_v5  ;;  %v1376_v28 = vsub.f32 %v5288_v18, %v5307_v31 }
 0x8bc   :  { %3464 = vpow2.f32 %v1509_v14  ;;  %v1483_v47 = vmul.f32 1.442695, %v1370_v58  ;;  %v1369_v11 = vsub.f32 %v5242_v3, %v5301_v16  ;;  %v1491_v2 = vmul.f32 1.442695, %v1374_v32 }
 0x8bd   :  { %3466 = vpow2.f32 %v1511_v41  ;;  %v1373_v26 = vsub.f32 %v5262_v62, %v5301_v16  ;;  %v1487_v9 = vmul.f32 1.442695, %v1372_v15  ;;  %v1371_v57 = vsub.f32 %v5248_v50, %v5305_v56 }
 0x8be   :  { %3468 = vpow2.f32 %v1499_v36  ;;  %v1495_v59 = vmul.f32 1.442695, %v1376_v28  ;;  %v1375_v18 = vsub.f32 %v5268_v60, %v5305_v56  ;;  %v1481_v44 = vmul.f32 1.442695, %v1369_v11 }
 0x8bf   :  { %3470 = vpow2.f32 %v1503_v33  ;;  %v1362_v3 = vsub.f32 %v5213_v29, %v5303_v17  ;;  %v1489_v8 = vmul.f32 1.442695, %v1373_v26  ;;  %v1366_v62 = vsub.f32 %v5233_v43, %v5303_v17 }
 0x8c0   :  { %3472 = vpow2.f32 %v1497_v27  ;;  %v1485_v23 = vmul.f32 1.442695, %v1371_v57  ;;  %v1364_v50 = vsub.f32 %v5219_v10, %v5307_v31  ;;  %v1493_v40 = vmul.f32 1.442695, %v1375_v18 }
 0x8c1   :  { %3474 = vpow2.f32 %v1501_v25  ;;  %v1368_v60 = vsub.f32 %v5258_v22, %v5307_v31  ;;  %v1467_v45 = vmul.f32 1.442695, %v1362_v3  ;;  %v1361_v29 = vsub.f32 %v5210_v51, %v5301_v16 }
 0x8c2   :  { %3476 = vpow2.f32 %v1483_v47  ;;  %v1475_v46 = vmul.f32 1.442695, %v1366_v62  ;;  %v1365_v43 = vsub.f32 %v5230_v4, %v5301_v16  ;;  %v1471_v10 = vmul.f32 1.442695, %v1364_v50 }
 0x8c3   :  { %3478 = vpow2.f32 %v1491_v2  ;;  %v1363_v42 = vsub.f32 %v5216_v63, %v5305_v56  ;;  %v1479_v12 = vmul.f32 1.442695, %v1368_v60  ;;  %v1367_v51 = vsub.f32 %v5236_v34, %v5305_v56 }
 0x8c4   :  { %3480 = vpow2.f32 %v1487_v9  ;;  %v1465_v61 = vmul.f32 1.442695, %v1361_v29  ;;  %v1354_v4 = vsub.f32 %v5180_v1, %v5303_v17  ;;  %v1473_v20 = vmul.f32 1.442695, %v1365_v43 }
 0x8c5   :  { %3482 = vpow2.f32 %v1495_v59  ;;  %v1358_v63 = vsub.f32 %v5201_v19, %v5303_v17  ;;  %v1469_v34 = vmul.f32 1.442695, %v1363_v42  ;;  %v1356_v41 = vsub.f32 %v5186_v38, %v5307_v31  ;;  %v5910_v42 = vld [vmem:[#allocation13_spill] sm:$0xff] }
 0x8c6   :  { %3484 = vpow2.f32 %v1481_v44  ;;  %v1477_v36 = vmul.f32 1.442695, %v1367_v51  ;;  %v1360_v19 = vsub.f32 %v5226_v6, %v5307_v31  ;;  %v1451_v32 = vmul.f32 1.442695, %v1354_v4  ;;  %v5911_v4 = vld [vmem:[#allocation14_spill] sm:$0xff] }
 0x8c7   :  { %v5346_v0 = vpop.eup %3460  ;;  %3486 = vpow2.f32 %v1489_v8  ;;  %v1353_v38 = vsub.f32 %v5176_v7, %v5301_v16  ;;  %v1459_v25 = vmul.f32 1.442695, %v1358_v63  ;;  %v1357_v6 = vsub.f32 %v5198_v48, %v5301_v16 }
 0x8c8   :  { %5898 = vst [vmem:[#allocation17_spill] sm:$0xff] %v5346_v0  ;;  %v5350_v30 = vpop.eup %3462  ;;  %3488 = vpow2.f32 %v1485_v23  ;;  %v1455_v47 = vmul.f32 1.442695, %v1356_v41  ;;  %v1355_v11 = vsub.f32 %v5183_v55, %v5305_v56  ;;  %v1463_v26 = vmul.f32 1.442695, %v1360_v19  ;;  %v5913_v19 = vld [vmem:[#allocation8_spill] sm:$0xff] }
 0x8c9   :  { %5899 = vst [vmem:[#allocation18_spill] sm:$0xff] %v5350_v30  ;;  %v5354_v22 = vpop.eup %3464  ;;  %3490 = vpow2.f32 %v1493_v40  ;;  %v1359_v9 = vsub.f32 %v5204_v37, %v5305_v56  ;;  %v1449_v57 = vmul.f32 1.442695, %v1353_v38  ;;  %v1346_v59 = vsub.f32 %v5138_v39, %v5303_v17 }
 0x8ca   :  { %5900 = vst [vmem:[#allocation5_spill] sm:$0xff] %v5354_v22  ;;  %v5358_v21 = vpop.eup %3466  ;;  %3492 = vpow2.f32 %v1467_v45  ;;  %v1457_v44 = vmul.f32 1.442695, %v1357_v6  ;;  %v1350_v3 = vsub.f32 %v5167_v35, %v5303_v17  ;;  %v1453_v37 = vmul.f32 1.442695, %v1355_v11 }
 0x8cb   :  { %5901 = vst [vmem:[#allocation11_spill] sm:$0xff] %v5358_v21  ;;  %v5362_v52 = vpop.eup %3468  ;;  %3494 = vpow2.f32 %v1475_v46  ;;  %v1348_v62 = vsub.f32 %v5147_v53, %v5307_v31  ;;  %v1461_v50 = vmul.f32 1.442695, %v1359_v9  ;;  %v1352_v40 = vsub.f32 %v5194_v24, %v5307_v31 }
 0x8cc   :  { %5902 = vst [vmem:[#allocation21_spill] sm:$0xff] %v5362_v52  ;;  %v5366_v54 = vpop.eup %3470  ;;  %v1630_v14 = vpack.c.bf16 %v5350_v30, %v5362_v52  ;;  %3496 = vpow2.f32 %v1471_v10  ;;  %v1435_v35 = vmul.f32 1.442695, %v1346_v59  ;;  %v1345_v45 = vsub.f32 %v5135_v13, %v5301_v16  ;;  %v5916_v59 = vld [vmem:[#allocation71_spill] sm:$0xff] }
 0x8cd   :  { %5903 = vst [vmem:[#allocation7_spill] sm:$0xff] %v5366_v54  ;;  %v5372_v5 = vpop.eup %3472  ;;  %v1632_v1 = vpack.c.bf16 %v5358_v21, %v5366_v54  ;;  %3498 = vpow2.f32 %v1479_v12  ;;  %v1443_v46 = vmul.f32 1.442695, %v1350_v3  ;;  %v1349_v43 = vsub.f32 %v5164_v49, %v5301_v16 }
 0x8ce   :  { %5904 = vst [vmem:[#allocation23_spill] sm:$0xff] %v5372_v5  ;;  %v5378_v58 = vpop.eup %3474  ;;  %2949 = vmatprep.subr.bf16.mxu1 %v1630_v14  ;;  %v1629_v33 = vpack.c.bf16 %v5346_v0, %v5372_v5  ;;  %3500 = vpow2.f32 %v1465_v61  ;;  %v1439_v24 = vmul.f32 1.442695, %v1348_v62  ;;  %v1347_v12 = vsub.f32 %v5910_v42, %v5305_v56  ;;  %v5912_v14 = vld [vmem:[#allocation75_spill] sm:$0xff]  ;;  %v5917_v62 = vld [vmem:[#allocation20_spill] sm:$0xff] }
 0x8cf   :  { %5905 = vst [vmem:[#allocation6_spill] sm:$0xff] %v5378_v58  ;;  %v5384_v27 = vpop.eup %3476  ;;  %3018 = vmatprep.subr.bf16.mxu0 %v1632_v1  ;;  %v1631_v15 = vpack.c.bf16 %v5354_v22, %v5378_v58  ;;  %3502 = vpow2.f32 %v1473_v20  ;;  %v1447_v61 = vmul.f32 1.442695, %v1352_v40  ;;  %v1351_v20 = vsub.f32 %v5911_v4, %v5305_v56 }
 0x8d0   :  { %v5390_v28 = vpop.eup %3478  ;;  %2950 = vmatpush1.bf16.msra.mxu1 %v1629_v33  ;;  %3504 = vpow2.f32 %v1469_v34  ;;  %v1433_v49 = vmul.f32 1.442695, %v1345_v45  ;;  %v1338_v34 = vsub.f32 %v5912_v14, %v5303_v17  ;;  %v1342_v33 = vsub.f32 %v5913_v19, %v5303_v17 }
 0x8d1   :  { %5906 = vst [vmem:[#allocation12_spill] sm:$0xff] %v5390_v28  ;;  %v5394_v7 = vpop.eup %3480  ;;  %3019 = vmatpush1.bf16.msra.mxu0 %v1631_v15  ;;  %v1626_v2 = vpack.c.bf16 %v5390_v28, %v5384_v27  ;;  %3506 = vpow2.f32 %v1477_v36  ;;  %v1441_v36 = vmul.f32 1.442695, %v1349_v43  ;;  %v1437_v38 = vmul.f32 1.442695, %v1347_v12  ;;  %v5914_v15 = vld [vmem:[#allocation16_spill] sm:$0xff] }
 0x8d2   :  { %v5400_v48 = vpop.eup %3482  ;;  %3508 = vpow2.f32 %v1451_v32  ;;  %v1445_v11 = vmul.f32 1.442695, %v1351_v20 }
 0x8d3   :  { %5907 = vst [vmem:[#allocation10_spill] sm:$0xff] %v5400_v48  ;;  %v5404_v18 = vpop.eup %3484  ;;  %2951 = vmatprep.subr.bf16.mxu1 %v1626_v2  ;;  %v1628_v55 = vpack.c.bf16 %v5400_v48, %v5394_v7  ;;  %3510 = vpow2.f32 %v1459_v25  ;;  %v1340_v25 = vsub.f32 %v5914_v15, %v5307_v31  ;;  %v5915_v2 = vld [vmem:[#allocation22_spill] sm:$0xff] }
 0x8d4   :  { %v5410_v8 = vpop.eup %3486  ;;  %3512 = vpow2.f32 %v1455_v47 }
 0x8d5   :  { %5908 = vst [vmem:[#allocation25_spill] sm:$0xff] %v5410_v8  ;;  %v5414_v23 = vpop.eup %3488  ;;  %3020 = vmatprep.subr.bf16.mxu0 %v1628_v55  ;;  %v1625_v39 = vpack.c.bf16 %v5410_v8, %v5404_v18  ;;  %3514 = vpow2.f32 %v1463_v26  ;;  %v1344_v26 = vsub.f32 %v5915_v2, %v5307_v31  ;;  %v1337_v55 = vsub.f32 %v5916_v59, %v5301_v16  ;;  %v5924_v59 = vld [vmem:[#allocation66_spill] sm:$0xff] }
 0x8d6   :  { %v5420_v60 = vpop.eup %3490  ;;  %3516 = vpow2.f32 %v1449_v57  ;;  %v1419_v57 = vmul.f32 1.442695, %v1338_v34  ;;  %v1423_v40 = vmul.f32 1.442695, %v1340_v25  ;;  %v5921_v34 = vld [vmem:[#allocation73_spill] sm:$0xff] }
 0x8d7   :  { %5909 = vst [vmem:[#allocation27_spill] sm:$0xff] %v5420_v60  ;;  %v5424_v29 = vpop.eup %3492  ;;  %2952 = vmatpush1.bf16.msra.mxu1 %v1625_v39  ;;  %v1627_v53 = vpack.c.bf16 %v5420_v60, %v5414_v23  ;;  %3518 = vpow2.f32 %v1457_v44  ;;  %v1341_v39 = vsub.f32 %v5917_v62, %v5301_v16  ;;  %v1431_v43 = vmul.f32 1.442695, %v1344_v26 }
 0x8d8   :  { %v5430_v10 = vpop.eup %3494  ;;  %3520 = vpow2.f32 %v1453_v37  ;;  %v1427_v37 = vmul.f32 1.442695, %v1342_v33  ;;  %v5922_v33 = vld [vmem:[#allocation70_spill] sm:$0xff] }
 0x8d9   :  { %v5434_v51 = vpop.eup %3496  ;;  %3021 = vmatpush1.bf16.msra.mxu0 %v1627_v53  ;;  %v1622_v13 = vpack.c.bf16 %v5430_v10, %v5424_v29  ;;  %3522 = vpow2.f32 %v1461_v50  ;;  %v1425_v14 = vmul.f32 1.442695, %v1341_v39  ;;  %v5925_v39 = vld [vmem:[#allocation72_spill] sm:$0xff] }
 0x8da   :  { %v5440_v63 = vpop.eup %3498  ;;  %3524 = vpow2.f32 %v1435_v35  ;;  %v5918_v35 = vld [vmem:[#allocation76_spill] sm:$0xff] }
 0x8db   :  { %v5444_v41 = vpop.eup %3500  ;;  %2953 = vmatprep.subr.bf16.mxu1 %v1622_v13  ;;  %v1624_v1 = vpack.c.bf16 %v5440_v63, %v5434_v51  ;;  %3526 = vpow2.f32 %v1443_v46  ;;  %v1339_v45 = vsub.f32 %v5918_v35, %v5305_v56  ;;  %v1417_v13 = vmul.f32 1.442695, %v1337_v55 }
 0x8dc   :  { %v5450_v32 = vpop.eup %3502  ;;  %3528 = vpow2.f32 %v1439_v24  ;;  %v5919_v24 = vld [vmem:[#allocation19_spill] sm:$0xff]  ;;  %v1329_v55 = vsub.f32 %v5924_v59, %v5301_v16 }
 0x8dd   :  { %v5454_v6 = vpop.eup %3504  ;;  %3022 = vmatprep.subr.bf16.mxu0 %v1624_v1  ;;  %v1621_v47 = vpack.c.bf16 %v5450_v32, %v5444_v41  ;;  %3530 = vpow2.f32 %v1447_v61  ;;  %v1343_v42 = vsub.f32 %v5919_v24, %v5305_v56  ;;  %v5920_v61 = vld [vmem:[#allocation67_spill] sm:$0xff]  ;;  %v1334_v1 = vsub.f32 %v5921_v34, %v5303_v17  ;;  %v5928_v34 = vld [vmem:[#allocation60_spill] sm:$0xff] }
 0x8de   :  { %v5460_v9 = vpop.eup %3506  ;;  %3532 = vpow2.f32 %v1433_v49  ;;  %v1330_v4 = vsub.f32 %v5920_v61, %v5303_v17  ;;  %v1421_v19 = vmul.f32 1.442695, %v1339_v45  ;;  %v5927_v61 = vld [vmem:[#allocation74_spill] sm:$0xff] }
 0x8df   :  { %v5464_v44 = vpop.eup %3508  ;;  %2954 = vmatpush1.bf16.msra.mxu1 %v1621_v47  ;;  %v1623_v3 = vpack.c.bf16 %v5460_v9, %v5454_v6  ;;  %3534 = vpow2.f32 %v1441_v36  ;;  %v1429_v47 = vmul.f32 1.442695, %v1343_v42  ;;  %v1411_v62 = vmul.f32 1.442695, %v1334_v1 }
 0x8e0   :  { %v5470_v50 = vpop.eup %3510  ;;  %3536 = vpow2.f32 %v1437_v38  ;;  %v1332_v38 = vsub.f32 %v5922_v33, %v5307_v31  ;;  %v1322_v1 = vsub.f32 %v5928_v34, %v5303_v17 }
 0x8e1   :  { %v5474_v53 = vpop.eup %3512  ;;  %3023 = vmatpush1.bf16.msra.mxu0 %v1623_v3  ;;  %v1618_v46 = vpack.c.bf16 %v5470_v50, %v5464_v44  ;;  %3538 = vpow2.f32 %v1445_v11  ;;  %v5923_v11 = vld [vmem:[#allocation15_spill] sm:$0xff] }
 0x8e2   :  { %v5480_v12 = vpop.eup %3514  ;;  %3540 = vpow2.f32 %v1419_v57  ;;  %v1336_v2 = vsub.f32 %v5923_v11, %v5307_v31  ;;  %v1403_v57 = vmul.f32 1.442695, %v1330_v4  ;;  %v1407_v45 = vmul.f32 1.442695, %v1332_v38 }
 0x8e3   :  { %v5484_v20 = vpop.eup %3516  ;;  %2955 = vmatprep.subr.bf16.mxu1 %v1618_v46  ;;  %v1620_v49 = vpack.c.bf16 %v5480_v12, %v5474_v53  ;;  %3542 = vpow2.f32 %v1427_v37  ;;  %v5926_v46 = vld [vmem:[#allocation68_spill] sm:$0xff]  ;;  %v1335_v4 = vsub.f32 %v5927_v61, %v5305_v56 }
 0x8e4   :  { %v5490_v36 = vpop.eup %3518  ;;  %3544 = vpow2.f32 %v1423_v40  ;;  %v1333_v40 = vsub.f32 %v5925_v39, %v5301_v16 }
 0x8e5   :  { %v5494_v15 = vpop.eup %3520  ;;  %3024 = vmatprep.subr.bf16.mxu0 %v1620_v49  ;;  %v1617_v25 = vpack.c.bf16 %v5490_v36, %v5484_v20  ;;  %3546 = vpow2.f32 %v1431_v43  ;;  %v1331_v43 = vsub.f32 %v5926_v46, %v5305_v56  ;;  %v1413_v39 = vmul.f32 1.442695, %v1335_v4 }
 0x8e6   :  { %v5500_v26 = vpop.eup %3522  ;;  %3548 = vpow2.f32 %v1417_v13  ;;  %v1415_v13 = vmul.f32 1.442695, %v1336_v2  ;;  %v1409_v38 = vmul.f32 1.442695, %v1333_v40 }
 0x8e7   :  { %v5504_v3 = vpop.eup %3524  ;;  %2956 = vmatpush1.bf16.msra.mxu1 %v1617_v25  ;;  %v1619_v37 = vpack.c.bf16 %v5500_v26, %v5494_v15  ;;  %3550 = vpow2.f32 %v1425_v14  ;;  %v1401_v14 = vmul.f32 1.442695, %v1329_v55  ;;  %v5929_v25 = vld [vmem:[#allocation63_spill] sm:$0xff]  ;;  %v1405_v2 = vmul.f32 1.442695, %v1331_v43 }
 0x8e8   :  { %v5510_v35 = vpop.eup %3526  ;;  %3552 = vpow2.f32 %v1421_v19 }
 0x8e9   :  { %v5514_v24 = vpop.eup %3528  ;;  %3025 = vmatpush1.bf16.msra.mxu0 %v1619_v37  ;;  %v1614_v42 = vpack.c.bf16 %v5510_v35, %v5504_v3  ;;  %3554 = vpow2.f32 %v1429_v47  ;;  %v1326_v47 = vsub.f32 %v5929_v25, %v5303_v17  ;;  %v1387_v17 = vmul.f32 1.442695, %v1322_v1 }
 0x8ea   :  { %v5520_v49 = vpop.eup %3530  ;;  %3556 = vpow2.f32 %v1403_v57  ;;  %v5930_v57 = vld [vmem:[#allocation65_spill] sm:$0xff] }
 0x8eb   :  { %v5524_v19 = vpop.eup %3532  ;;  %2957 = vmatprep.subr.bf16.mxu1 %v1614_v42  ;;  %v1616_v33 = vpack.c.bf16 %v5520_v49, %v5514_v24  ;;  %3558 = vpow2.f32 %v1411_v62  ;;  %v1324_v59 = vsub.f32 %v5930_v57, %v5307_v31  ;;  %v5931_v62 = vld [vmem:[#allocation69_spill] sm:$0xff]  ;;  %v1395_v34 = vmul.f32 1.442695, %v1326_v47 }
 0x8ec   :  { %v5530_v11 = vpop.eup %3534  ;;  %3560 = vpow2.f32 %v1407_v45  ;;  %v1328_v40 = vsub.f32 %v5931_v62, %v5307_v31  ;;  %v5932_v45 = vld [vmem:[#allocation59_spill] sm:$0xff] }
 0x8ed   :  { %v5534_v55 = vpop.eup %3536  ;;  %3026 = vmatprep.subr.bf16.mxu0 %v1616_v33  ;;  %v1613_v37 = vpack.c.bf16 %v5530_v11, %v5524_v19  ;;  %3562 = vpow2.f32 %v1415_v13  ;;  %v1321_v43 = vsub.f32 %v5932_v45, %v5301_v16  ;;  %v5933_v13 = vld [vmem:[#allocation62_spill] sm:$0xff]  ;;  %v1391_v31 = vmul.f32 1.442695, %v1324_v59 }
 0x8ee   :  { %v5540_v46 = vpop.eup %3538  ;;  %3564 = vpow2.f32 %v1401_v14  ;;  %v1325_v4 = vsub.f32 %v5933_v13, %v5301_v16  ;;  %v5934_v14 = vld [vmem:[#allocation61_spill] sm:$0xff] }
 0x8ef   :  { %v5544_v42 = vpop.eup %3540  ;;  %2958 = vmatpush1.bf16.msra.mxu1 %v1613_v37  ;;  %v1615_v61 = vpack.c.bf16 %v5540_v46, %v5534_v55  ;;  %3566 = vpow2.f32 %v1409_v38  ;;  %v1323_v1 = vsub.f32 %v5934_v14, %v5305_v56  ;;  %v1399_v37 = vmul.f32 1.442695, %v1328_v40  ;;  %v5935_v38 = vld [vmem:[#allocation64_spill] sm:$0xff] }
 0x8f0   :  { %v5550_v33 = vpop.eup %3542  ;;  %3568 = vpow2.f32 %v1405_v2  ;;  %v1327_v47 = vsub.f32 %v5935_v38, %v5305_v56  ;;  %v1385_v16 = vmul.f32 1.442695, %v1321_v43  ;;  %v1393_v45 = vmul.f32 1.442695, %v1325_v4 }
 0x8f1   :  { %v5554_v25 = vpop.eup %3544  ;;  %3027 = vmatpush1.bf16.msra.mxu0 %v1615_v61  ;;  %v1610_v57 = vpack.c.bf16 %v5550_v33, %v5544_v42  ;;  %3570 = vpow2.f32 %v1413_v39  ;;  %v1389_v39 = vmul.f32 1.442695, %v1323_v1 }
 0x8f2   :  { %v5560_v62 = vpop.eup %3546  ;;  %3572 = vpow2.f32 %v1387_v17  ;;  %v1397_v17 = vmul.f32 1.442695, %v1327_v47 }
 0x8f3   :  { %v5562_v2 = vpop.eup %3548  ;;  %2959 = vmatprep.subr.bf16.mxu1 %v1610_v57  ;;  %v1612_v59 = vpack.c.bf16 %v5560_v62, %v5554_v25  ;;  %3574 = vpow2.f32 %v1395_v34 }
 0x8f4   :  { %v5566_v61 = vpop.eup %3550  ;;  %3576 = vpow2.f32 %v1391_v31 }
 0x8f5   :  { %v5568_v40 = vpop.eup %3552  ;;  %3028 = vmatprep.subr.bf16.mxu0 %v1612_v59  ;;  %v1609_v56 = vpack.c.bf16 %v5566_v61, %v5562_v2  ;;  %3578 = vpow2.f32 %v1399_v37 }
 0x8f6   :  { %v5572_v43 = vpop.eup %3554  ;;  %3580 = vpow2.f32 %v1385_v16 }
 0x8f7   :  { %v3557_v13 = vpop.eup %3556  ;;  %2960 = vmatpush1.bf16.msra.mxu1 %v1609_v56  ;;  %v1611_v34 = vpack.c.bf16 %v5572_v43, %v5568_v40  ;;  %3582 = vpow2.f32 %v1393_v45 }
 0x8f8   :  { %v3559_v4 = vpop.eup %3558  ;;  %3584 = vpow2.f32 %v1389_v39 }
 0x8f9   :  { %v3561_v31 = vpop.eup %3560  ;;  %3029 = vmatpush1.bf16.msra.mxu0 %v1611_v34  ;;  %v1606_v14 = vpack.c.bf16 %v3559_v4, %v3557_v13  ;;  %3586 = vpow2.f32 %v1397_v17 }
 0x8fa   :  { %v3563_v1 = vpop.eup %3562 }
 0x8fb   :  { %v3565_v57 = vpop.eup %3564  ;;  %2961 = vmatprep.subr.bf16.mxu1 %v1606_v14  ;;  %v1608_v37 = vpack.c.bf16 %v3563_v1, %v3561_v31 }
 0x8fc   :  { %v3567_v38 = vpop.eup %3566 }
 0x8fd   :  { %v3569_v47 = vpop.eup %3568  ;;  %3030 = vmatprep.subr.bf16.mxu0 %v1608_v37  ;;  %v1605_v16 = vpack.c.bf16 %v3567_v38, %v3565_v57 }
 0x8fe   :  { %v3571_v59 = vpop.eup %3570 }
 0x8ff   :  { %v3573_v56 = vpop.eup %3572  ;;  %2962 = vmatpush1.bf16.msra.mxu1 %v1605_v16  ;;  %v1607_v21 = vpack.c.bf16 %v3571_v59, %v3569_v47 }
 0x900   :  { %v3575_v22 = vpop.eup %3574 }
 0x901   :  { %v3577_v45 = vpop.eup %3576  ;;  %3031 = vmatpush1.bf16.msra.mxu0 %v1607_v21  ;;  %v1534_v39 = vadd.f32 %v3575_v22, %v3573_v56  ;;  %v1602_v30 = vpack.c.bf16 %v3575_v22, %v3573_v56 }
 0x902   :  { %v3579_v34 = vpop.eup %3578 }
 0x903   :  { %v3581_v0 = vpop.eup %3580  ;;  %v1535_v17 = vadd.f32 %v3557_v13, %v1534_v39  ;;  %2963 = vmatprep.subr.bf16.mxu1 %v1602_v30  ;;  %v1576_v54 = vadd.f32 %v3579_v34, %v3577_v45  ;;  %v1604_v14 = vpack.c.bf16 %v3579_v34, %v3577_v45 }
 0x904   :  { %v3583_v58 = vpop.eup %3582 }
 0x905   :  { %v3585_v52 = vpop.eup %3584  ;;  %v1536_v5 = vadd.f32 %v3559_v4, %v1535_v17  ;;  %v1577_v37 = vadd.f32 %v3561_v31, %v1576_v54  ;;  %3032 = vmatprep.subr.bf16.mxu0 %v1604_v14  ;;  %v1513_v48 = vadd.f32 %v3583_v58, %v3581_v0  ;;  %v1601_v60 = vpack.c.bf16 %v3583_v58, %v3581_v0  ;;  %v2856_v31 = vpop.permute.xlu0 %2855  ;;  %v5939_v17 = vld [vmem:[#allocation55_spill] sm:$0xff] }
 0x906   :  { %v3587_v16 = vpop.eup %3586 }
 0x907   :  { %v1537_v28 = vadd.f32 %v5544_v42, %v1536_v5  ;;  %v1578_v8 = vadd.f32 %v3563_v1, %v1577_v37  ;;  %v1514_v21 = vadd.f32 %v3565_v57, %v1513_v48  ;;  %2964 = vmatpush1.bf16.msra.mxu1 %v1601_v60  ;;  %v1555_v22 = vadd.f32 %v3587_v16, %v3585_v52 }
 0x908   :  { %v1603_v56 = vpack.c.bf16 %v3587_v16, %v3585_v52 }
 0x909   :  { %v1538_v13 = vadd.f32 %v5550_v33, %v1537_v28  ;;  %v1579_v30 = vadd.f32 %v5554_v25, %v1578_v8  ;;  %v1515_v45 = vadd.f32 %v3567_v38, %v1514_v21  ;;  %v1556_v39 = vadd.f32 %v3569_v47, %v1555_v22  ;;  %v2866_v22 = vpop.permute.xlu0 %2865 }
 0x90a   :  { %3033 = vmatpush1.bf16.msra.mxu0 %v1603_v56 }
 0x90b   :  { %v1539_v54 = vadd.f32 %v5504_v3, %v1538_v13  ;;  %v1580_v4 = vadd.f32 %v5560_v62, %v1579_v30  ;;  %v1516_v0 = vadd.f32 %v5562_v2, %v1515_v45  ;;  %v1557_v58 = vadd.f32 %v3571_v59, %v1556_v39 }
 0x90c   :  { %v5940_v13 = vmov 0  }
 0x90d   :  { %v1540_v5 = vadd.f32 %v5510_v35, %v1539_v54  ;;  %v1581_v48 = vadd.f32 %v5514_v24, %v1580_v4  ;;  %v1517_v52 = vadd.f32 %v5566_v61, %v1516_v0  ;;  %v1558_v28 = vadd.f32 %v5568_v40, %v1557_v58  ;;  %v5941_v54 = vld [vmem:[#allocation54_spill] sm:$0xff]  ;;  %v5942_v0 = vld [vmem:[#allocation53_spill] sm:$0xff] }
 0x90f   :  { %v1541_v8 = vadd.f32 %v5464_v44, %v1540_v5  ;;  %v1582_v60 = vadd.f32 %v5520_v49, %v1581_v48  ;;  %v1518_v42 = vadd.f32 %v5524_v19, %v1517_v52  ;;  %v1559_v3 = vadd.f32 %v5572_v43, %v1558_v28  ;;  %v5943_v48 = vld [vmem:[#allocation52_spill] sm:$0xff]  ;;  %v5944_v28 = vld [vmem:[#allocation51_spill] sm:$0xff] }
 0x911   :  { %v1542_v33 = vadd.f32 %v5470_v50, %v1541_v8  ;;  %v1583_v25 = vadd.f32 %v5474_v53, %v1582_v60  ;;  %v1519_v35 = vadd.f32 %v5530_v11, %v1518_v42  ;;  %v1560_v24 = vadd.f32 %v5534_v55, %v1559_v3 }
 0x913   :  { %v1543_v62 = vadd.f32 %v5424_v29, %v1542_v33  ;;  %v1584_v2 = vadd.f32 %v5480_v12, %v1583_v25  ;;  %v1520_v44 = vadd.f32 %v5484_v20, %v1519_v35  ;;  %v1561_v49 = vadd.f32 %v5540_v46, %v1560_v24  ;;  %v5945_v24 = vld [vmem:[#allocation25_spill] sm:$0xff] }
 0x915   :  { %v1544_v19 = vadd.f32 %v5430_v10, %v1543_v62  ;;  %v1585_v61 = vadd.f32 %v5434_v51, %v1584_v2  ;;  %v1521_v50 = vadd.f32 %v5490_v36, %v1520_v44  ;;  %v1562_v53 = vadd.f32 %v5494_v15, %v1561_v49  ;;  %v2851_v10 = vpop.permute.xlu1 %2850  ;;  %v5946_v2 = vld [vmem:[#allocation12_spill] sm:$0xff]  ;;  %v5947_v49 = vld [vmem:[#allocation27_spill] sm:$0xff] }
 0x917   :  { %v1586_v11 = vadd.f32 %v5440_v63, %v1585_v61  ;;  %v1522_v55 = vadd.f32 %v5444_v41, %v1521_v50  ;;  %v1563_v29 = vadd.f32 %v5500_v26, %v1562_v53  ;;  %v5936_v63 = vld [vmem:[#allocation58_spill] sm:$0xff]  ;;  %v5937_v41 = vld [vmem:[#allocation57_spill] sm:$0xff]  ;;  %v1545_v33 = vadd.f32 %v5384_v27, %v1544_v19 }
 0x918   :  { %v5948_v50 = vld [vmem:[#allocation10_spill] sm:$0xff]  ;;  %v5953_v19 = vld [vmem:[#allocation17_spill] sm:$0xff] }
 0x919   :  { %v1523_v12 = vadd.f32 %v5450_v32, %v1522_v55  ;;  %v1564_v20 = vadd.f32 %v5454_v6, %v1563_v29  ;;  %v5938_v32 = vld [vmem:[#allocation56_spill] sm:$0xff]  ;;  %v2861_v14 = vpop.permute.xlu1 %2860  ;;  %v1587_v35 = vadd.f32 %v5394_v7, %v1586_v11  ;;  %v1546_v44 = vadd.f32 %v5946_v2, %v1545_v33  ;;  %v5949_v55 = vld [vmem:[#allocation23_spill] sm:$0xff]  ;;  %v5955_v11 = vld [vmem:[#allocation5_spill] sm:$0xff] }
 0x91b   :  { %v1565_v46 = vadd.f32 %v5460_v9, %v1564_v20  ;;  %v1524_v3 = vadd.f32 %v5404_v18, %v1523_v12  ;;  %v1588_v53 = vadd.f32 %v5948_v50, %v1587_v35  ;;  %v5950_v20 = vld [vmem:[#allocation21_spill] sm:$0xff]  ;;  %v5952_v12 = vld [vmem:[#allocation7_spill] sm:$0xff] }
 0x91d   :  { %v1566_v25 = vadd.f32 %v5414_v23, %v1565_v46  ;;  %v1525_v62 = vadd.f32 %v5945_v24, %v1524_v3  ;;  %v1589_v27 = vadd.f32 %v5952_v12, %v1588_v53  ;;  %v5954_v46 = vld [vmem:[#allocation18_spill] sm:$0xff] }
 0x91f   :  { %v1567_v61 = vadd.f32 %v5947_v49, %v1566_v25  ;;  %v1526_v29 = vadd.f32 %v5949_v55, %v1525_v62 }
 0x921   :  { %v1527_v23 = vadd.f32 %v5953_v19, %v1526_v29 }
 0x94c   :  { %v2918_v40 = vpop.f32.mrf.mxu0 }
 0x94d   :  { %v2919_v51 = vadd.f32 %v2918_v40, %v2851_v10  ;;  %v1547_v40 = vadd.f32 %v5950_v20, %v1546_v44 }
 0x94e   :  { %v2920_v43 = vpop.f32.mrf.mxu0 }
 0x94f   :  { %v2921_v1 = vadd.f32 %v2920_v43, %v2851_v10  ;;  %v2937_v38 = vadd.f32 %v2919_v51, %v5936_v63  ;;  %v5951_v10 = vld [vmem:[#allocation6_spill] sm:$0xff]  ;;  %v1548_v7 = vadd.f32 %v5954_v46, %v1547_v40  ;;  %v5956_v51 = vld [vmem:[#allocation11_spill] sm:$0xff] }
 0x950   :  { %v2922_v36 = vpop.f32.mrf.mxu0  ;;  %v1568_v18 = vadd.f32 %v5951_v10, %v1567_v61 }
 0x951   :  { %v2923_v15 = vadd.f32 %v2922_v36, %v2856_v31  ;;  %v2941_v34 = vadd.f32 %v2921_v1, %v5938_v32  ;;  %v1528_v36 = vrot.slane %v1527_v23, 4  ;;  %v1549_v1 = vrot.slane %v1548_v7, 4 }
 0x952   :  { %v2924_v57 = vpop.f32.mrf.mxu0  ;;  %v1569_v43 = vadd.f32 %v5955_v11, %v1568_v18 }
 0x953   :  { %v2938_v47 = vadd.f32 %v2923_v15, %v5937_v41  ;;  %v2925_v26 = vadd.f32 %v2924_v57, %v2856_v31  ;;  %v1590_v31 = vadd.f32 %v5956_v51, %v1589_v27  ;;  %v1529_v63 = vadd.f32 %v1528_v36, %v1527_v23 }
 0x954   :  { %v1570_v15 = vrot.slane %v1569_v43, 4 }
 0x955   :  { %v2928_v59 = vpop.f32.mrf.mxu0  ;;  %v2945_v6 = vpack.c.bf16 %v2938_v47, %v2937_v38  ;;  %v2942_v9 = vadd.f32 %v2925_v26, %v5939_v17  ;;  %v1591_v57 = vrot.slane %v1590_v31, 4  ;;  %v1550_v38 = vadd.f32 %v1549_v1, %v1548_v7 }
 0x956   :  { %v2929_v21 = vadd.f32 %v2928_v59, %v2861_v14  ;;  %v1571_v41 = vadd.f32 %v1570_v15, %v1569_v43  ;;  %v1530_v47 = vrot.slane %v1529_v63, 2 }
 0x957   :  { %v2930_v37 = vpop.f32.mrf.mxu0  ;;  %v2947_v16 = vpack.c.bf16 %v2942_v9, %v2941_v34  ;;  %2982 = vmatmul.mubr.bf16.vlgmr.msra.gmra.mxu1 %v2945_v6  ;;  %v1592_v26 = vadd.f32 %v1591_v57, %v1590_v31  ;;  %v1551_v59 = vrot.slane %v1550_v38, 2 }
 0x958   :  { %2991 = vmatprep.mubr.bf16.mxu1 %v5940_v13  ;;  %v2931_v30 = vadd.f32 %v2930_v37, %v2861_v14  ;;  %v2939_v4 = vadd.f32 %v2929_v21, %v5941_v54  ;;  %v1572_v32 = vrot.slane %v1571_v41, 2  ;;  %v1531_v34 = vadd.f32 %v1530_v47, %v1529_v63 }
 0x959   :  { %v2932_v56 = vpop.f32.mrf.mxu0  ;;  %3051 = vmatmul.mubr.bf16.vlgmr.msra.gmra.mxu0 %v2947_v16  ;;  %v1593_v6 = vrot.slane %v1592_v26, 2  ;;  %v1552_v17 = vadd.f32 %v1551_v59, %v1550_v38 }
 0x95a   :  { %v2933_v45 = vadd.f32 %v2932_v56, %v2866_v22  ;;  %3060 = vmatprep.mubr.bf16.mxu0 %v5940_v13  ;;  %v2943_v52 = vadd.f32 %v2931_v30, %v5943_v48  ;;  %v1573_v9 = vadd.f32 %v1572_v32, %v1571_v41  ;;  %v1532_v14 = vrot.slane %v1531_v34, 1 }
 0x95b   :  { %v2934_v39 = vpop.f32.mrf.mxu0  ;;  %v1594_v37 = vadd.f32 %v1593_v6, %v1592_v26  ;;  %v1553_v16 = vrot.slane %v1552_v17, 1 }
 0x95c   :  { %v2940_v58 = vadd.f32 %v2933_v45, %v5942_v0  ;;  %v2935_v5 = vadd.f32 %v2934_v39, %v2866_v22  ;;  %v1574_v21 = vrot.slane %v1573_v9, 1  ;;  %v1533_v22 = vadd.f32 %v1532_v14, %v1531_v34 }
 0x95d   :  { %v1595_v56 = vrot.slane %v1594_v37, 1  ;;  %v1554_v13 = vadd.f32 %v1553_v16, %v1552_v17 }
 0x95e   :  { %v2944_v8 = vadd.f32 %v2935_v5, %v5944_v28  ;;  %v2946_v60 = vpack.c.bf16 %v2940_v58, %v2939_v4  ;;  %v1575_v30 = vadd.f32 %v1574_v21, %v1573_v9  ;;  %3588 = vrcp.f32 %v1533_v22 }
 0x95f   :  { %v1596_v45 = vadd.f32 %v1595_v56, %v1594_v37  ;;  %3590 = vrcp.f32 %v1554_v13 }
 0x960   :  { %2992 = vmatmul.mubr.bf16.gmra.mxu1 %v2946_v60  ;;  %v2948_v42 = vpack.c.bf16 %v2944_v8, %v2943_v52  ;;  %3592 = vrcp.f32 %v1575_v30 }
 0x961   :  { %3594 = vrcp.f32 %v1596_v45 }
 0x962   :  { %3061 = vmatmul.mubr.bf16.gmra.mxu0 %v2948_v42 }
 0x96b   :  { %v3589_v39 = vpop.eup %3588 }
 0x96c   :  { %v3591_v4 = vpop.eup %3590 }
 0x96d   :  { %v3593_v58 = vpop.eup %3592 }
 0x96e   :  { %v3595_v8 = vpop.eup %3594 }
 0xa17   :  { %v2983_v54 = vpop.f32.mrf.mxu1 }
 0xa18   :  { %v3002_v0 = vmul.f32 %v3589_v39, %v2983_v54 }
 0xa19   :  { %v2985_v5 = vpop.f32.mrf.mxu1  ;;  %v3052_v48 = vpop.f32.mrf.mxu0 }
 0xa1a   :  { %3010 = vst [vmem:[#allocation2] sm:$0xff] %v3002_v0  ;;  %v3003_v52 = vmul.f32 %v3591_v4, %v2985_v5  ;;  %v3071_v28 = vmul.f32 %v3593_v58, %v3052_v48 }
 0xa1b   :  { %v2987_v60 = vpop.f32.mrf.mxu1  ;;  %v3054_v42 = vpop.f32.mrf.mxu0 }
 0xa1c   :  { %3011 = vst [vmem:[#allocation2 + $0x8] sm:$0xff] %v3003_v52  ;;  %3080 = vst [vmem:[#allocation2 + $0x40] sm:$0xff] %v3071_v28  ;;  %v3004_v3 = vmul.f32 %v3589_v39, %v2987_v60  ;;  %v3072_v33 = vmul.f32 %v3595_v8, %v3054_v42 }
 0xa1d   :  { %v2989_v25 = vpop.f32.mrf.mxu1  ;;  %v3056_v35 = vpop.f32.mrf.mxu0 }
 0xa1e   :  { %3012 = vst [vmem:[#allocation2 + $0x10] sm:$0xff] %v3004_v3  ;;  %3081 = vst [vmem:[#allocation2 + $0x48] sm:$0xff] %v3072_v33  ;;  %v3005_v24 = vmul.f32 %v3591_v4, %v2989_v25  ;;  %v3073_v62 = vmul.f32 %v3593_v58, %v3056_v35 }
 0xa1f   :  { %v3058_v44 = vpop.f32.mrf.mxu0 }
 0xa20   :  { %v2993_v2 = vpop.f32.mrf.mxu1  ;;  %3013 = vst [vmem:[#allocation2 + $0x18] sm:$0xff] %v3005_v24  ;;  %3082 = vst [vmem:[#allocation2 + $0x50] sm:$0xff] %v3073_v62  ;;  %v3074_v61 = vmul.f32 %v3595_v8, %v3058_v44 }
 0xa21   :  { %v3006_v49 = vmul.f32 %v3589_v39, %v2993_v2 }
 0xa22   :  { %v2995_v50 = vpop.f32.mrf.mxu1  ;;  %v3062_v53 = vpop.f32.mrf.mxu0  ;;  %3083 = vst [vmem:[#allocation2 + $0x58] sm:$0xff] %v3074_v61 }
 0xa23   :  { %3014 = vst [vmem:[#allocation2 + $0x20] sm:$0xff] %v3006_v49  ;;  %v3007_v55 = vmul.f32 %v3591_v4, %v2995_v50  ;;  %v3075_v29 = vmul.f32 %v3593_v58, %v3062_v53 }
 0xa24   :  { %v2997_v20 = vpop.f32.mrf.mxu1  ;;  %v3064_v40 = vpop.f32.mrf.mxu0 }
 0xa25   :  { %3015 = vst [vmem:[#allocation2 + $0x28] sm:$0xff] %v3007_v55  ;;  %3084 = vst [vmem:[#allocation2 + $0x60] sm:$0xff] %v3075_v29  ;;  %v3008_v10 = vmul.f32 %v3589_v39, %v2997_v20  ;;  %v3076_v18 = vmul.f32 %v3595_v8, %v3064_v40 }
 0xa26   :  { %v2999_v12 = vpop.f32.mrf.mxu1  ;;  %v3066_v27 = vpop.f32.mrf.mxu0 }
 0xa27   :  { %3016 = vst [vmem:[#allocation2 + $0x30] sm:$0xff] %v3008_v10  ;;  %3085 = vst [vmem:[#allocation2 + $0x68] sm:$0xff] %v3076_v18  ;;  %v3009_v19 = vmul.f32 %v3591_v4, %v2999_v12  ;;  %v3077_v23 = vmul.f32 %v3593_v58, %v3066_v27 }
 0xa28   :  { %v3068_v46 = vpop.f32.mrf.mxu0 }
 0xa29   :  { %3017 = vst [vmem:[#allocation2 + $0x38] sm:$0xff] %v3009_v19  ;;  %3086 = vst [vmem:[#allocation2 + $0x70] sm:$0xff] %v3077_v23  ;;  %v3078_v7 = vmul.f32 %v3595_v8, %v3068_v46 }
 0xa2b   :  { %3087 = vst [vmem:[#allocation2 + $0x78] sm:$0xff] %v3078_v7 }
 0xa2c   :  { %3623 = shalt.err (!%p3620_p4)
}
 0xa2d   :  { %s3637_s13 = smov 256   ;;  %s3638_s14 = smov 16  }
 0xa2e   :  { %3099 = dma.vmem_to_hbm [thread:$0]  %s3094_s11, 2048, %s5645_s8, [#allocation3], %s3637_s13, %s3637_s13, %s3638_s14  }
 0xa2f   :  { %3632 = dma.done.wait [#allocation3], 2048  }
 0xa30   :  { %3633 = vsyncadd [#allocation3], 4294965248 }
 0xa31   :  { %3103 = vsyncpa [#allocation3], 1 }

</bundles_post_ra>
